<compile_context>
chip_gen: v7x
topology: tpu7x:2x2x1
jax: 0.10.0
libtpu: 0.0.40
codegen_flags: <defaults>
</compile_context>

<pallas_src>
import jax
import jax.numpy as jnp
from jax import lax
from jax.experimental import pallas as pl
from jax.experimental.pallas import tpu as pltpu

NUM_CAPS = 10
DIM_CAPS = 8
NUM_CLASSES = 3
IN_CH = 160        # channels of the backbone's last feature map
PW_FILTERS = 256   # pointwise conv output channels
OUT_LANES = 128    # lane-dense classifier width (wrapper slices [:, :3])


def _head_kernel(x_ref, w3_ref, b3_ref, w5_ref, b5_ref,
                 wp_ref, bp_ref, wc_ref, bc_ref, blk_ref,
                 wf_ref, bf_ref, out_ref, xpad_ref, cat_ref):
    BB, H, W, C = x_ref.shape          # (BLOCK_B, H, W, C) NHWC f32
    HW = H * W

    # ---- in-VMEM padding: zero ONLY the halo strips --------------------
    # Scratch layout (BB, H+4, W+16, C): image rows at H-offset 2, columns
    # at W-offset 8.  Taps only read rows [0, H+4) and cols [6, 10+W), so
    # only those halo strips need zeroing; the interior is overwritten every
    # step (safe under megacore grid splits, unlike a program_id==0 gate).
    zrow = jnp.zeros((BB, 2, W + 16, C), jnp.float32)
    zcol = jnp.zeros((BB, H, 2, C), jnp.float32)
    xpad_ref[:, 0:2, :, :] = zrow
    xpad_ref[:, 2 + H:4 + H, :, :] = zrow
    xpad_ref[:, 2:2 + H, 6:8, :] = zcol
    xpad_ref[:, 2:2 + H, 8 + W:10 + W, :] = zcol
    xpad_ref[:, 2:2 + H, 8:8 + W, :] = x_ref[...]

    w3 = w3_ref[...]                   # (3, 3, C)
    w5 = w5_ref[...]                   # (5, 5, C)
    b3 = b3_ref[...]                   # (1, C)
    b5 = b5_ref[...]                   # (1, C)

    # ---- depthwise 3x3 (pad=1) + 5x5 (pad=2), one output row at a time --
    # Live data per iteration is a handful of vregs (row accumulators +
    # one streamed tap); taps are loaded from VMEM scratch, not kept live.
    def row_body(y, carry):
        acc3 = jnp.zeros((BB, 1, W, C), jnp.float32)
        acc5 = jnp.zeros((BB, 1, W, C), jnp.float32)
        for ky in range(5):
            for kx in range(5):
                tap = xpad_ref[:, pl.ds(y + ky, 1), 6 + kx:6 + kx + W, :]
                acc5 = acc5 + tap * w5[ky, kx]
                if 1 <= ky <= 3 and 1 <= kx <= 3:
                    # 3x3 (pad=1) tap (ky-1, kx-1) coincides with this tap.
                    acc3 = acc3 + tap * w3[ky - 1, kx - 1]
        x3r = jnp.maximum(acc3 + b3, 0.0)
        x5r = jnp.maximum(acc5 + b5, 0.0)
        cat_ref[:, pl.ds(y, 1), :, :] = jnp.concatenate([x3r, x5r], axis=-1)
        return carry

    lax.fori_loop(0, H, row_body, 0)

    # ---- concat + 1x1 pointwise conv + ReLU as ONE fused K=2C matmul ----
    cat = cat_ref[...].reshape(BB * HW, 2 * C).astype(jnp.bfloat16)
    pw = jnp.dot(cat, wp_ref[...], preferred_element_type=jnp.float32)
    pw = jnp.maximum(pw + bp_ref[...], 0.0)                    # (BB*HW, F)

    # ---- AdaptiveAvgPool2d((1,1)) -> per-image spatial mean -------------
    pooled = jnp.mean(pw.reshape(BB, HW, -1), axis=1)          # (BB, F)

    # ---- CapsuleLikeLayer: Linear + ReLU --------------------------------
    caps = jnp.dot(pooled.astype(jnp.bfloat16), wc_ref[...],
                   preferred_element_type=jnp.float32) + bc_ref[...]
    caps = jnp.maximum(caps, 0.0)                              # (BB, E)

    # ---- per-capsule L2 normalize (F.normalize, eps=1e-12) --------------
    # blk is the precomputed (E,E) block-diagonal mask (constant input).
    denom2 = jnp.dot(caps * caps, blk_ref[...],
                     preferred_element_type=jnp.float32)
    denom = jnp.maximum(jnp.sqrt(denom2), 1e-12)
    capsn = caps / denom

    # Dropout(0.4) -> identity at inference.
    # ---- final classifier (lane-dense, 128-wide padded weights) ---------
    logits = jnp.dot(capsn, wf_ref[...],
                     preferred_element_type=jnp.float32) + bf_ref[...]
    out_ref[0] = logits


def _vmem_capacity_bytes():
    try:
        return int(pltpu.get_tpu_info().vmem_capacity_bytes)
    except Exception:
        return 64 << 20


def _num_tensorcores():
    try:
        kind = jax.devices()[0].device_kind.lower()
    except Exception:
        return 1
    # Only v7x has 2 TensorCores per chip; v5e / v6e are single-TC.
    return 2 if ("v7" in kind or "7x" in kind) else 1


def _head_config(B, H, W, C, F):
    """VMEM-budget-derived batch block; grid only grows when it must."""
    vmem_cap = _vmem_capacity_bytes()
    num_tc = _num_tensorcores()
    per_img = 4 * ((H + 4) * (W + 16) * C    # xpad scratch
                   + H * W * 2 * C           # concat scratch (f32)
                   + 2 * H * W * C           # double-buffered input block
                   + H * W * F)              # pointwise activation
    budget = max(vmem_cap // 3, 8 << 20)
    block_b = max(1, min(B, budget // max(per_img, 1)))
    nb = pl.cdiv(B, block_b)
    if num_tc > 1 and B >= num_tc:
        nb = max(nb, num_tc)                 # feed both TensorCores on v7x
    block_b = pl.cdiv(B, nb)
    nb = pl.cdiv(B, block_b)
    need = per_img * block_b + (4 << 20)
    vmem_limit = int(min(vmem_cap * 3 // 4, max(2 * need, 32 << 20)))
    return block_b, nb, vmem_limit


def init_params(key):
    ks = jax.random.split(key, 10)
    C, F = IN_CH, PW_FILTERS

    def rnd(k, shape, scale):
        return jax.random.normal(k, shape, jnp.float32) * scale

    return dict(
        w3=rnd(ks[0], (3, 3, C), 0.10),
        b3=rnd(ks[1], (1, C), 0.05),
        w5=rnd(ks[2], (5, 5, C), 0.05),
        b5=rnd(ks[3], (1, C), 0.05),
        wp=rnd(ks[4], (2 * C, F), 0.05),
        bp=rnd(ks[5], (1, F), 0.05),
        wc=rnd(ks[6], (F, NUM_CAPS * DIM_CAPS), 0.05),
        bc=rnd(ks[7], (1, NUM_CAPS * DIM_CAPS), 0.05),
        wf=rnd(ks[8], (NUM_CAPS * DIM_CAPS, NUM_CLASSES), 0.10),
        bf=rnd(ks[9], (1, NUM_CLASSES), 0.05),
    )


def prepare_params(params):
    """One-time weight preprocessing, hoisted out of the per-call jit:
    bf16 copies of the MXU weight operands, lane-dense (128-wide) padded
    classifier, and the precomputed block-diagonal capsule-norm mask."""
    E = NUM_CAPS * DIM_CAPS
    cap = jnp.arange(E) // DIM_CAPS
    blk = (cap[:, None] == cap[None, :]).astype(jnp.float32)
    wf_pad = jnp.zeros((E, OUT_LANES), jnp.float32).at[:, :NUM_CLASSES].set(
        params["wf"])
    bf_pad = jnp.zeros((1, OUT_LANES), jnp.float32).at[:, :NUM_CLASSES].set(
        params["bf"])
    return dict(
        w3=params["w3"], b3=params["b3"],
        w5=params["w5"], b5=params["b5"],
        wp=params["wp"].astype(jnp.bfloat16),   # fused (2C, F) weight
        bp=params["bp"],
        wc=params["wc"].astype(jnp.bfloat16),
        bc=params["bc"],
        blk=blk, wf_pad=wf_pad, bf_pad=bf_pad,
    )


@jax.jit
def lung_cancer_head(feat_nchw, prepped):
    """feat_nchw: (B, 160, H, W) float32 — the backbone's last feature map."""
    B, C, H, W = feat_nchw.shape
    F = prepped["wp"].shape[1]
    E = NUM_CAPS * DIM_CAPS
    x = jnp.transpose(feat_nchw, (0, 2, 3, 1)).astype(jnp.float32)   # NHWC

    block_b, nb, vmem_limit = _head_config(B, H, W, C, F)
    b_pad = nb * block_b
    if b_pad != B:      # pad B so every grid step reads real (zero) rows
        x = jnp.pad(x, ((0, b_pad - B), (0, 0), (0, 0), (0, 0)))

    def const_spec(shape):
        nd = len(shape)
        return pl.BlockSpec(shape, lambda i, _nd=nd: (0,) * _nd)

    out = pl.pallas_call(
        _head_kernel,
        out_shape=jax.ShapeDtypeStruct((nb, block_b, OUT_LANES), jnp.float32),
        grid=(nb,),
        in_specs=[
            pl.BlockSpec((block_b, H, W, C), lambda i: (i, 0, 0, 0)),
            const_spec((3, 3, C)),
            const_spec((1, C)),
            const_spec((5, 5, C)),
            const_spec((1, C)),
            const_spec((2 * C, F)),
            const_spec((1, F)),
            const_spec((F, E)),
            const_spec((1, E)),
            const_spec((E, E)),
            const_spec((E, OUT_LANES)),
            const_spec((1, OUT_LANES)),
        ],
        out_specs=pl.BlockSpec((1, block_b, OUT_LANES), lambda i: (i, 0, 0)),
        scratch_shapes=[
            pltpu.VMEM((block_b, H + 4, W + 16, C), jnp.float32),
            pltpu.VMEM((block_b, H, W, 2 * C), jnp.float32),
        ],
        compiler_params=pltpu.CompilerParams(
            dimension_semantics=("parallel",),
            vmem_limit_bytes=vmem_limit),
    )(x, prepped["w3"], prepped["b3"], prepped["w5"], prepped["b5"],
      prepped["wp"], prepped["bp"], prepped["wc"], prepped["bc"],
      prepped["blk"], prepped["wf_pad"], prepped["bf_pad"])

    return out.reshape(nb * block_b, OUT_LANES)[:B, :NUM_CLASSES]


def reference(feat_nchw, params):
    """Pure-JAX f32 reference of the same head (matches PyTorch semantics)."""
    B, C, H, W = feat_nchw.shape
    x = feat_nchw.astype(jnp.float32)
    dn = ("NCHW", "OIHW", "NCHW")
    w3 = jnp.transpose(params["w3"], (2, 0, 1))[:, None]   # (C,1,3,3)
    w5 = jnp.transpose(params["w5"], (2, 0, 1))[:, None]   # (C,1,5,5)
    x3 = lax.conv_general_dilated(x, w3, (1, 1), ((1, 1), (1, 1)),
                                  dimension_numbers=dn, feature_group_count=C)
    x3 = jax.nn.relu(x3 + params["b3"][0][None, :, None, None])
    x5 = lax.conv_general_dilated(x, w5, (1, 1), ((2, 2), (2, 2)),
                                  dimension_numbers=dn, feature_group_count=C)
    x5 = jax.nn.relu(x5 + params["b5"][0][None, :, None, None])
    cat = jnp.concatenate([x3, x5], axis=1)                 # (B, 2C, H, W)
    pw = jnp.einsum("bchw,cf->bfhw", cat, params["wp"])
    pw = jax.nn.relu(pw + params["bp"][0][None, :, None, None])
    pooled = pw.mean(axis=(2, 3))                           # (B, F)
    caps = jax.nn.relu(pooled @ params["wc"] + params["bc"])
    capsr = caps.reshape(B, NUM_CAPS, DIM_CAPS)
    nrm = jnp.maximum(jnp.sqrt((capsr * capsr).sum(-1, keepdims=True)), 1e-12)
    capsn = (capsr / nrm).reshape(B, NUM_CAPS * DIM_CAPS)
    return capsn @ params["wf"] + params["bf"]


if __name__ == "__main__":
    key = jax.random.PRNGKey(0)
    kp, kx = jax.random.split(key)
    params = init_params(kp)
    prepped = prepare_params(params)

    # Backbone ("ghostnet_100", stride 32) last feature map at small shape:
    # batch=2, channels=160, spatial=8x8.
    feat = jax.random.normal(kx, (2, IN_CH, 8, 8), jnp.float32)

    out = lung_cancer_head(feat, prepped)
    out = jax.block_until_ready(out)
    assert out.shape == (2, NUM_CLASSES), out.shape

    ref = reference(feat, params)
    if not jnp.allclose(out, ref, rtol=2e-2, atol=2e-2):
        raise RuntimeError(f"kernel/reference mismatch:\n{out}\nvs\n{ref}")
    print("KERNEL_OK")
</pallas_src>

<mosaic_0001>
module attributes {stable_mosaic.version = 11 : i64} {
  func.func @_head_kernel(%arg0: i32, %arg1: memref<2x8x8x160xf32, #tpu.memory_space<vmem>>, %arg2: memref<3x3x160xf32, #tpu.memory_space<vmem>>, %arg3: memref<1x160xf32, #tpu.memory_space<vmem>>, %arg4: memref<5x5x160xf32, #tpu.memory_space<vmem>>, %arg5: memref<1x160xf32, #tpu.memory_space<vmem>>, %arg6: memref<320x256xbf16, #tpu.memory_space<vmem>>, %arg7: memref<1x256xf32, #tpu.memory_space<vmem>>, %arg8: memref<256x80xbf16, #tpu.memory_space<vmem>>, %arg9: memref<1x80xf32, #tpu.memory_space<vmem>>, %arg10: memref<80x80xf32, #tpu.memory_space<vmem>>, %arg11: memref<80x128xf32, #tpu.memory_space<vmem>>, %arg12: memref<1x128xf32, #tpu.memory_space<vmem>>, %arg13: memref<1x2x128xf32, #tpu.memory_space<vmem>>, %arg14: memref<2x12x24x160xf32, #tpu.memory_space<vmem>>, %arg15: memref<2x8x8x320xf32, #tpu.memory_space<vmem>>) attributes {dimension_semantics = [#tpu.dimension_semantics<parallel>], iteration_bounds = array<i64: 1>, scalar_prefetch = 0 : i64, scratch_operands = 2 : i64, tpu.core_type = #tpu.core_type<tc>, window_params = [{transform_indices = @transform_0, window_bounds = array<i64: 2, 8, 8, 160>}, {pipeline_mode = #tpu.pipeline_mode<synchronous>, transform_indices = @transform_1, window_bounds = array<i64: 3, 3, 160>}, {pipeline_mode = #tpu.pipeline_mode<synchronous>, transform_indices = @transform_2, window_bounds = array<i64: 1, 160>}, {pipeline_mode = #tpu.pipeline_mode<synchronous>, transform_indices = @transform_3, window_bounds = array<i64: 5, 5, 160>}, {pipeline_mode = #tpu.pipeline_mode<synchronous>, transform_indices = @transform_4, window_bounds = array<i64: 1, 160>}, {pipeline_mode = #tpu.pipeline_mode<synchronous>, transform_indices = @transform_5, window_bounds = array<i64: 320, 256>}, {pipeline_mode = #tpu.pipeline_mode<synchronous>, transform_indices = @transform_6, window_bounds = array<i64: 1, 256>}, {pipeline_mode = #tpu.pipeline_mode<synchronous>, transform_indices = @transform_7, window_bounds = array<i64: 256, 80>}, {pipeline_mode = #tpu.pipeline_mode<synchronous>, transform_indices = @transform_8, window_bounds = array<i64: 1, 80>}, {pipeline_mode = #tpu.pipeline_mode<synchronous>, transform_indices = @transform_9, window_bounds = array<i64: 80, 80>}, {pipeline_mode = #tpu.pipeline_mode<synchronous>, transform_indices = @transform_10, window_bounds = array<i64: 80, 128>}, {pipeline_mode = #tpu.pipeline_mode<synchronous>, transform_indices = @transform_11, window_bounds = array<i64: 1, 128>}, {transform_indices = @transform_12, window_bounds = array<i64: 1, 2, 128>}]} {
    %cst = arith.constant 0.000000e+00 : f32
    %0 = vector.broadcast %cst : f32 to vector<2x2x24x160xf32>
    %cst_0 = arith.constant 0.000000e+00 : f32
    %1 = vector.broadcast %cst_0 : f32 to vector<2x8x2x160xf32>
    %c0 = arith.constant 0 : index
    %c0_1 = arith.constant 0 : index
    %c0_2 = arith.constant 0 : index
    %c0_3 = arith.constant 0 : index
    %2 = vector.load %arg14[%c0, %c0_1, %c0_2, %c0_3] : memref<2x12x24x160xf32, #tpu.memory_space<vmem>>, vector<2x2x24x160xf32>
    tpu.vector_store %arg14[%c0, %c0_1, %c0_2, %c0_3], %0 {strides = array<i32>} : memref<2x12x24x160xf32, #tpu.memory_space<vmem>>, vector<2x2x24x160xf32>,
    %c0_4 = arith.constant 0 : index
    %c10 = arith.constant 10 : index
    %c0_5 = arith.constant 0 : index
    %c0_6 = arith.constant 0 : index
    %3 = vector.load %arg14[%c0_4, %c10, %c0_5, %c0_6] : memref<2x12x24x160xf32, #tpu.memory_space<vmem>>, vector<2x2x24x160xf32>
    tpu.vector_store %arg14[%c0_4, %c10, %c0_5, %c0_6], %0 {strides = array<i32>} : memref<2x12x24x160xf32, #tpu.memory_space<vmem>>, vector<2x2x24x160xf32>,
    %c0_7 = arith.constant 0 : index
    %c2 = arith.constant 2 : index
    %c6 = arith.constant 6 : index
    %c0_8 = arith.constant 0 : index
    %4 = vector.load %arg14[%c0_7, %c2, %c6, %c0_8] : memref<2x12x24x160xf32, #tpu.memory_space<vmem>>, vector<2x8x2x160xf32>
    tpu.vector_store %arg14[%c0_7, %c2, %c6, %c0_8], %1 {strides = array<i32>} : memref<2x12x24x160xf32, #tpu.memory_space<vmem>>, vector<2x8x2x160xf32>,
    %c0_9 = arith.constant 0 : index
    %c2_10 = arith.constant 2 : index
    %c16 = arith.constant 16 : index
    %c0_11 = arith.constant 0 : index
    %5 = vector.load %arg14[%c0_9, %c2_10, %c16, %c0_11] : memref<2x12x24x160xf32, #tpu.memory_space<vmem>>, vector<2x8x2x160xf32>
    tpu.vector_store %arg14[%c0_9, %c2_10, %c16, %c0_11], %1 {strides = array<i32>} : memref<2x12x24x160xf32, #tpu.memory_space<vmem>>, vector<2x8x2x160xf32>,
    %c0_12 = arith.constant 0 : index
    %c0_13 = arith.constant 0 : index
    %c0_14 = arith.constant 0 : index
    %c0_15 = arith.constant 0 : index
    %6 = vector.load %arg1[%c0_12, %c0_13, %c0_14, %c0_15] : memref<2x8x8x160xf32, #tpu.memory_space<vmem>>, vector<2x8x8x160xf32>
    %c0_16 = arith.constant 0 : index
    %c2_17 = arith.constant 2 : index
    %c8 = arith.constant 8 : index
    %c0_18 = arith.constant 0 : index
    %7 = vector.load %arg14[%c0_16, %c2_17, %c8, %c0_18] : memref<2x12x24x160xf32, #tpu.memory_space<vmem>>, vector<2x8x8x160xf32>
    tpu.vector_store %arg14[%c0_16, %c2_17, %c8, %c0_18], %6 {strides = array<i32>} : memref<2x12x24x160xf32, #tpu.memory_space<vmem>>, vector<2x8x8x160xf32>,
    %c0_19 = arith.constant 0 : index
    %c0_20 = arith.constant 0 : index
    %c0_21 = arith.constant 0 : index
    %8 = vector.load %arg2[%c0_19, %c0_20, %c0_21] : memref<3x3x160xf32, #tpu.memory_space<vmem>>, vector<3x3x160xf32>
    %c0_22 = arith.constant 0 : index
    %c0_23 = arith.constant 0 : index
    %c0_24 = arith.constant 0 : index
    %9 = vector.load %arg4[%c0_22, %c0_23, %c0_24] : memref<5x5x160xf32, #tpu.memory_space<vmem>>, vector<5x5x160xf32>
    %c0_25 = arith.constant 0 : index
    %c0_26 = arith.constant 0 : index
    %10 = vector.load %arg3[%c0_25, %c0_26] : memref<1x160xf32, #tpu.memory_space<vmem>>, vector<1x160xf32>
    %c0_27 = arith.constant 0 : index
    %c0_28 = arith.constant 0 : index
    %11 = vector.load %arg5[%c0_27, %c0_28] : memref<1x160xf32, #tpu.memory_space<vmem>>, vector<1x160xf32>
    %c0_i32 = arith.constant 0 : i32
    %c8_i32 = arith.constant 8 : i32
    %12 = arith.addi %c0_i32, %c8_i32 : i32
    %c1_i32 = arith.constant 1 : i32
    scf.for %arg16 = %c0_i32 to %12 step %c1_i32  : i32 {
      %cst_60 = arith.constant 0.000000e+00 : f32
      %50 = vector.broadcast %cst_60 : f32 to vector<2x1x8x160xf32>
      %cst_61 = arith.constant 0.000000e+00 : f32
      %51 = vector.broadcast %cst_61 : f32 to vector<2x1x8x160xf32>
      %c0_i32_62 = arith.constant 0 : i32
      %52 = arith.addi %arg16, %c0_i32_62 : i32
      %c0_63 = arith.constant 0 : index
      %53 = arith.index_cast %52 : i32 to index
      %c6_64 = arith.constant 6 : index
      %c0_65 = arith.constant 0 : index
      %54 = vector.load %arg14[%c0_63, %53, %c6_64, %c0_65] : memref<2x12x24x160xf32, #tpu.memory_space<vmem>>, vector<2x1x8x160xf32>
      %55 = vector.extract_strided_slice %9 {offsets = [0, 0, 0], sizes = [1, 1, 160], strides = [1, 1, 1]} : vector<5x5x160xf32> to vector<1x1x160xf32>
      %56 = vector.shape_cast %55 : vector<1x1x160xf32> to vector<160xf32>
      %57 = vector.shape_cast %56 : vector<160xf32> to vector<1x1x1x160xf32>
      %58 = vector.broadcast %57 : vector<1x1x1x160xf32> to vector<2x1x8x160xf32>
      %59 = arith.mulf %54, %58 : vector<2x1x8x160xf32>
      %60 = arith.addf %51, %59 : vector<2x1x8x160xf32>
      %c0_i32_66 = arith.constant 0 : i32
      %61 = arith.addi %arg16, %c0_i32_66 : i32
      %c0_67 = arith.constant 0 : index
      %62 = arith.index_cast %61 : i32 to index
      %c7 = arith.constant 7 : index
      %c0_68 = arith.constant 0 : index
      %63 = vector.load %arg14[%c0_67, %62, %c7, %c0_68] : memref<2x12x24x160xf32, #tpu.memory_space<vmem>>, vector<2x1x8x160xf32>
      %64 = vector.extract_strided_slice %9 {offsets = [0, 1, 0], sizes = [1, 1, 160], strides = [1, 1, 1]} : vector<5x5x160xf32> to vector<1x1x160xf32>
      %65 = vector.shape_cast %64 : vector<1x1x160xf32> to vector<160xf32>
      %66 = vector.shape_cast %65 : vector<160xf32> to vector<1x1x1x160xf32>
      %67 = vector.broadcast %66 : vector<1x1x1x160xf32> to vector<2x1x8x160xf32>
      %68 = arith.mulf %63, %67 : vector<2x1x8x160xf32>
      %69 = arith.addf %60, %68 : vector<2x1x8x160xf32>
      %c0_i32_69 = arith.constant 0 : i32
      %70 = arith.addi %arg16, %c0_i32_69 : i32
      %c0_70 = arith.constant 0 : index
      %71 = arith.index_cast %70 : i32 to index
      %c8_71 = arith.constant 8 : index
      %c0_72 = arith.constant 0 : index
      %72 = vector.load %arg14[%c0_70, %71, %c8_71, %c0_72] : memref<2x12x24x160xf32, #tpu.memory_space<vmem>>, vector<2x1x8x160xf32>
      %73 = vector.extract_strided_slice %9 {offsets = [0, 2, 0], sizes = [1, 1, 160], strides = [1, 1, 1]} : vector<5x5x160xf32> to vector<1x1x160xf32>
      %74 = vector.shape_cast %73 : vector<1x1x160xf32> to vector<160xf32>
      %75 = vector.shape_cast %74 : vector<160xf32> to vector<1x1x1x160xf32>
      %76 = vector.broadcast %75 : vector<1x1x1x160xf32> to vector<2x1x8x160xf32>
      %77 = arith.mulf %72, %76 : vector<2x1x8x160xf32>
      %78 = arith.addf %69, %77 : vector<2x1x8x160xf32>
      %c0_i32_73 = arith.constant 0 : i32
      %79 = arith.addi %arg16, %c0_i32_73 : i32
      %c0_74 = arith.constant 0 : index
      %80 = arith.index_cast %79 : i32 to index
      %c9 = arith.constant 9 : index
      %c0_75 = arith.constant 0 : index
      %81 = vector.load %arg14[%c0_74, %80, %c9, %c0_75] : memref<2x12x24x160xf32, #tpu.memory_space<vmem>>, vector<2x1x8x160xf32>
      %82 = vector.extract_strided_slice %9 {offsets = [0, 3, 0], sizes = [1, 1, 160], strides = [1, 1, 1]} : vector<5x5x160xf32> to vector<1x1x160xf32>
      %83 = vector.shape_cast %82 : vector<1x1x160xf32> to vector<160xf32>
      %84 = vector.shape_cast %83 : vector<160xf32> to vector<1x1x1x160xf32>
      %85 = vector.broadcast %84 : vector<1x1x1x160xf32> to vector<2x1x8x160xf32>
      %86 = arith.mulf %81, %85 : vector<2x1x8x160xf32>
      %87 = arith.addf %78, %86 : vector<2x1x8x160xf32>
      %c0_i32_76 = arith.constant 0 : i32
      %88 = arith.addi %arg16, %c0_i32_76 : i32
      %c0_77 = arith.constant 0 : index
      %89 = arith.index_cast %88 : i32 to index
      %c10_78 = arith.constant 10 : index
      %c0_79 = arith.constant 0 : index
      %90 = vector.load %arg14[%c0_77, %89, %c10_78, %c0_79] : memref<2x12x24x160xf32, #tpu.memory_space<vmem>>, vector<2x1x8x160xf32>
      %91 = vector.extract_strided_slice %9 {offsets = [0, 4, 0], sizes = [1, 1, 160], strides = [1, 1, 1]} : vector<5x5x160xf32> to vector<1x1x160xf32>
      %92 = vector.shape_cast %91 : vector<1x1x160xf32> to vector<160xf32>
      %93 = vector.shape_cast %92 : vector<160xf32> to vector<1x1x1x160xf32>
      %94 = vector.broadcast %93 : vector<1x1x1x160xf32> to vector<2x1x8x160xf32>
      %95 = arith.mulf %90, %94 : vector<2x1x8x160xf32>
      %96 = arith.addf %87, %95 : vector<2x1x8x160xf32>
      %c1_i32_80 = arith.constant 1 : i32
      %97 = arith.addi %arg16, %c1_i32_80 : i32
      %c0_81 = arith.constant 0 : index
      %98 = arith.index_cast %97 : i32 to index
      %c6_82 = arith.constant 6 : index
      %c0_83 = arith.constant 0 : index
      %99 = vector.load %arg14[%c0_81, %98, %c6_82, %c0_83] : memref<2x12x24x160xf32, #tpu.memory_space<vmem>>, vector<2x1x8x160xf32>
      %100 = vector.extract_strided_slice %9 {offsets = [1, 0, 0], sizes = [1, 1, 160], strides = [1, 1, 1]} : vector<5x5x160xf32> to vector<1x1x160xf32>
      %101 = vector.shape_cast %100 : vector<1x1x160xf32> to vector<160xf32>
      %102 = vector.shape_cast %101 : vector<160xf32> to vector<1x1x1x160xf32>
      %103 = vector.broadcast %102 : vector<1x1x1x160xf32> to vector<2x1x8x160xf32>
      %104 = arith.mulf %99, %103 : vector<2x1x8x160xf32>
      %105 = arith.addf %96, %104 : vector<2x1x8x160xf32>
      %c1_i32_84 = arith.constant 1 : i32
      %106 = arith.addi %arg16, %c1_i32_84 : i32
      %c0_85 = arith.constant 0 : index
      %107 = arith.index_cast %106 : i32 to index
      %c7_86 = arith.constant 7 : index
      %c0_87 = arith.constant 0 : index
      %108 = vector.load %arg14[%c0_85, %107, %c7_86, %c0_87] : memref<2x12x24x160xf32, #tpu.memory_space<vmem>>, vector<2x1x8x160xf32>
      %109 = vector.extract_strided_slice %9 {offsets = [1, 1, 0], sizes = [1, 1, 160], strides = [1, 1, 1]} : vector<5x5x160xf32> to vector<1x1x160xf32>
      %110 = vector.shape_cast %109 : vector<1x1x160xf32> to vector<160xf32>
      %111 = vector.shape_cast %110 : vector<160xf32> to vector<1x1x1x160xf32>
      %112 = vector.broadcast %111 : vector<1x1x1x160xf32> to vector<2x1x8x160xf32>
      %113 = arith.mulf %108, %112 : vector<2x1x8x160xf32>
      %114 = arith.addf %105, %113 : vector<2x1x8x160xf32>
      %115 = vector.extract_strided_slice %8 {offsets = [0, 0, 0], sizes = [1, 1, 160], strides = [1, 1, 1]} : vector<3x3x160xf32> to vector<1x1x160xf32>
      %116 = vector.shape_cast %115 : vector<1x1x160xf32> to vector<160xf32>
      %117 = vector.shape_cast %116 : vector<160xf32> to vector<1x1x1x160xf32>
      %118 = vector.broadcast %117 : vector<1x1x1x160xf32> to vector<2x1x8x160xf32>
      %119 = arith.mulf %108, %118 : vector<2x1x8x160xf32>
      %120 = arith.addf %50, %119 : vector<2x1x8x160xf32>
      %c1_i32_88 = arith.constant 1 : i32
      %121 = arith.addi %arg16, %c1_i32_88 : i32
      %c0_89 = arith.constant 0 : index
      %122 = arith.index_cast %121 : i32 to index
      %c8_90 = arith.constant 8 : index
      %c0_91 = arith.constant 0 : index
      %123 = vector.load %arg14[%c0_89, %122, %c8_90, %c0_91] : memref<2x12x24x160xf32, #tpu.memory_space<vmem>>, vector<2x1x8x160xf32>
      %124 = vector.extract_strided_slice %9 {offsets = [1, 2, 0], sizes = [1, 1, 160], strides = [1, 1, 1]} : vector<5x5x160xf32> to vector<1x1x160xf32>
      %125 = vector.shape_cast %124 : vector<1x1x160xf32> to vector<160xf32>
      %126 = vector.shape_cast %125 : vector<160xf32> to vector<1x1x1x160xf32>
      %127 = vector.broadcast %126 : vector<1x1x1x160xf32> to vector<2x1x8x160xf32>
      %128 = arith.mulf %123, %127 : vector<2x1x8x160xf32>
      %129 = arith.addf %114, %128 : vector<2x1x8x160xf32>
      %130 = vector.extract_strided_slice %8 {offsets = [0, 1, 0], sizes = [1, 1, 160], strides = [1, 1, 1]} : vector<3x3x160xf32> to vector<1x1x160xf32>
      %131 = vector.shape_cast %130 : vector<1x1x160xf32> to vector<160xf32>
      %132 = vector.shape_cast %131 : vector<160xf32> to vector<1x1x1x160xf32>
      %133 = vector.broadcast %132 : vector<1x1x1x160xf32> to vector<2x1x8x160xf32>
      %134 = arith.mulf %123, %133 : vector<2x1x8x160xf32>
      %135 = arith.addf %120, %134 : vector<2x1x8x160xf32>
      %c1_i32_92 = arith.constant 1 : i32
      %136 = arith.addi %arg16, %c1_i32_92 : i32
      %c0_93 = arith.constant 0 : index
      %137 = arith.index_cast %136 : i32 to index
      %c9_94 = arith.constant 9 : index
      %c0_95 = arith.constant 0 : index
      %138 = vector.load %arg14[%c0_93, %137, %c9_94, %c0_95] : memref<2x12x24x160xf32, #tpu.memory_space<vmem>>, vector<2x1x8x160xf32>
      %139 = vector.extract_strided_slice %9 {offsets = [1, 3, 0], sizes = [1, 1, 160], strides = [1, 1, 1]} : vector<5x5x160xf32> to vector<1x1x160xf32>
      %140 = vector.shape_cast %139 : vector<1x1x160xf32> to vector<160xf32>
      %141 = vector.shape_cast %140 : vector<160xf32> to vector<1x1x1x160xf32>
      %142 = vector.broadcast %141 : vector<1x1x1x160xf32> to vector<2x1x8x160xf32>
      %143 = arith.mulf %138, %142 : vector<2x1x8x160xf32>
      %144 = arith.addf %129, %143 : vector<2x1x8x160xf32>
      %145 = vector.extract_strided_slice %8 {offsets = [0, 2, 0], sizes = [1, 1, 160], strides = [1, 1, 1]} : vector<3x3x160xf32> to vector<1x1x160xf32>
      %146 = vector.shape_cast %145 : vector<1x1x160xf32> to vector<160xf32>
      %147 = vector.shape_cast %146 : vector<160xf32> to vector<1x1x1x160xf32>
      %148 = vector.broadcast %147 : vector<1x1x1x160xf32> to vector<2x1x8x160xf32>
      %149 = arith.mulf %138, %148 : vector<2x1x8x160xf32>
      %150 = arith.addf %135, %149 : vector<2x1x8x160xf32>
      %c1_i32_96 = arith.constant 1 : i32
      %151 = arith.addi %arg16, %c1_i32_96 : i32
      %c0_97 = arith.constant 0 : index
      %152 = arith.index_cast %151 : i32 to index
      %c10_98 = arith.constant 10 : index
      %c0_99 = arith.constant 0 : index
      %153 = vector.load %arg14[%c0_97, %152, %c10_98, %c0_99] : memref<2x12x24x160xf32, #tpu.memory_space<vmem>>, vector<2x1x8x160xf32>
      %154 = vector.extract_strided_slice %9 {offsets = [1, 4, 0], sizes = [1, 1, 160], strides = [1, 1, 1]} : vector<5x5x160xf32> to vector<1x1x160xf32>
      %155 = vector.shape_cast %154 : vector<1x1x160xf32> to vector<160xf32>
      %156 = vector.shape_cast %155 : vector<160xf32> to vector<1x1x1x160xf32>
      %157 = vector.broadcast %156 : vector<1x1x1x160xf32> to vector<2x1x8x160xf32>
      %158 = arith.mulf %153, %157 : vector<2x1x8x160xf32>
      %159 = arith.addf %144, %158 : vector<2x1x8x160xf32>
      %c2_i32 = arith.constant 2 : i32
      %160 = arith.addi %arg16, %c2_i32 : i32
      %c0_100 = arith.constant 0 : index
      %161 = arith.index_cast %160 : i32 to index
      %c6_101 = arith.constant 6 : index
      %c0_102 = arith.constant 0 : index
      %162 = vector.load %arg14[%c0_100, %161, %c6_101, %c0_102] : memref<2x12x24x160xf32, #tpu.memory_space<vmem>>, vector<2x1x8x160xf32>
      %163 = vector.extract_strided_slice %9 {offsets = [2, 0, 0], sizes = [1, 1, 160], strides = [1, 1, 1]} : vector<5x5x160xf32> to vector<1x1x160xf32>
      %164 = vector.shape_cast %163 : vector<1x1x160xf32> to vector<160xf32>
      %165 = vector.shape_cast %164 : vector<160xf32> to vector<1x1x1x160xf32>
      %166 = vector.broadcast %165 : vector<1x1x1x160xf32> to vector<2x1x8x160xf32>
      %167 = arith.mulf %162, %166 : vector<2x1x8x160xf32>
      %168 = arith.addf %159, %167 : vector<2x1x8x160xf32>
      %c2_i32_103 = arith.constant 2 : i32
      %169 = arith.addi %arg16, %c2_i32_103 : i32
      %c0_104 = arith.constant 0 : index
      %170 = arith.index_cast %169 : i32 to index
      %c7_105 = arith.constant 7 : index
      %c0_106 = arith.constant 0 : index
      %171 = vector.load %arg14[%c0_104, %170, %c7_105, %c0_106] : memref<2x12x24x160xf32, #tpu.memory_space<vmem>>, vector<2x1x8x160xf32>
      %172 = vector.extract_strided_slice %9 {offsets = [2, 1, 0], sizes = [1, 1, 160], strides = [1, 1, 1]} : vector<5x5x160xf32> to vector<1x1x160xf32>
      %173 = vector.shape_cast %172 : vector<1x1x160xf32> to vector<160xf32>
      %174 = vector.shape_cast %173 : vector<160xf32> to vector<1x1x1x160xf32>
      %175 = vector.broadcast %174 : vector<1x1x1x160xf32> to vector<2x1x8x160xf32>
      %176 = arith.mulf %171, %175 : vector<2x1x8x160xf32>
      %177 = arith.addf %168, %176 : vector<2x1x8x160xf32>
      %178 = vector.extract_strided_slice %8 {offsets = [1, 0, 0], sizes = [1, 1, 160], strides = [1, 1, 1]} : vector<3x3x160xf32> to vector<1x1x160xf32>
      %179 = vector.shape_cast %178 : vector<1x1x160xf32> to vector<160xf32>
      %180 = vector.shape_cast %179 : vector<160xf32> to vector<1x1x1x160xf32>
      %181 = vector.broadcast %180 : vector<1x1x1x160xf32> to vector<2x1x8x160xf32>
      %182 = arith.mulf %171, %181 : vector<2x1x8x160xf32>
      %183 = arith.addf %150, %182 : vector<2x1x8x160xf32>
      %c2_i32_107 = arith.constant 2 : i32
      %184 = arith.addi %arg16, %c2_i32_107 : i32
      %c0_108 = arith.constant 0 : index
      %185 = arith.index_cast %184 : i32 to index
      %c8_109 = arith.constant 8 : index
      %c0_110 = arith.constant 0 : index
      %186 = vector.load %arg14[%c0_108, %185, %c8_109, %c0_110] : memref<2x12x24x160xf32, #tpu.memory_space<vmem>>, vector<2x1x8x160xf32>
      %187 = vector.extract_strided_slice %9 {offsets = [2, 2, 0], sizes = [1, 1, 160], strides = [1, 1, 1]} : vector<5x5x160xf32> to vector<1x1x160xf32>
      %188 = vector.shape_cast %187 : vector<1x1x160xf32> to vector<160xf32>
      %189 = vector.shape_cast %188 : vector<160xf32> to vector<1x1x1x160xf32>
      %190 = vector.broadcast %189 : vector<1x1x1x160xf32> to vector<2x1x8x160xf32>
      %191 = arith.mulf %186, %190 : vector<2x1x8x160xf32>
      %192 = arith.addf %177, %191 : vector<2x1x8x160xf32>
      %193 = vector.extract_strided_slice %8 {offsets = [1, 1, 0], sizes = [1, 1, 160], strides = [1, 1, 1]} : vector<3x3x160xf32> to vector<1x1x160xf32>
      %194 = vector.shape_cast %193 : vector<1x1x160xf32> to vector<160xf32>
      %195 = vector.shape_cast %194 : vector<160xf32> to vector<1x1x1x160xf32>
      %196 = vector.broadcast %195 : vector<1x1x1x160xf32> to vector<2x1x8x160xf32>
      %197 = arith.mulf %186, %196 : vector<2x1x8x160xf32>
      %198 = arith.addf %183, %197 : vector<2x1x8x160xf32>
      %c2_i32_111 = arith.constant 2 : i32
      %199 = arith.addi %arg16, %c2_i32_111 : i32
      %c0_112 = arith.constant 0 : index
      %200 = arith.index_cast %199 : i32 to index
      %c9_113 = arith.constant 9 : index
      %c0_114 = arith.constant 0 : index
      %201 = vector.load %arg14[%c0_112, %200, %c9_113, %c0_114] : memref<2x12x24x160xf32, #tpu.memory_space<vmem>>, vector<2x1x8x160xf32>
      %202 = vector.extract_strided_slice %9 {offsets = [2, 3, 0], sizes = [1, 1, 160], strides = [1, 1, 1]} : vector<5x5x160xf32> to vector<1x1x160xf32>
      %203 = vector.shape_cast %202 : vector<1x1x160xf32> to vector<160xf32>
      %204 = vector.shape_cast %203 : vector<160xf32> to vector<1x1x1x160xf32>
      %205 = vector.broadcast %204 : vector<1x1x1x160xf32> to vector<2x1x8x160xf32>
      %206 = arith.mulf %201, %205 : vector<2x1x8x160xf32>
      %207 = arith.addf %192, %206 : vector<2x1x8x160xf32>
      %208 = vector.extract_strided_slice %8 {offsets = [1, 2, 0], sizes = [1, 1, 160], strides = [1, 1, 1]} : vector<3x3x160xf32> to vector<1x1x160xf32>
      %209 = vector.shape_cast %208 : vector<1x1x160xf32> to vector<160xf32>
      %210 = vector.shape_cast %209 : vector<160xf32> to vector<1x1x1x160xf32>
      %211 = vector.broadcast %210 : vector<1x1x1x160xf32> to vector<2x1x8x160xf32>
      %212 = arith.mulf %201, %211 : vector<2x1x8x160xf32>
      %213 = arith.addf %198, %212 : vector<2x1x8x160xf32>
      %c2_i32_115 = arith.constant 2 : i32
      %214 = arith.addi %arg16, %c2_i32_115 : i32
      %c0_116 = arith.constant 0 : index
      %215 = arith.index_cast %214 : i32 to index
      %c10_117 = arith.constant 10 : index
      %c0_118 = arith.constant 0 : index
      %216 = vector.load %arg14[%c0_116, %215, %c10_117, %c0_118] : memref<2x12x24x160xf32, #tpu.memory_space<vmem>>, vector<2x1x8x160xf32>
      %217 = vector.extract_strided_slice %9 {offsets = [2, 4, 0], sizes = [1, 1, 160], strides = [1, 1, 1]} : vector<5x5x160xf32> to vector<1x1x160xf32>
      %218 = vector.shape_cast %217 : vector<1x1x160xf32> to vector<160xf32>
      %219 = vector.shape_cast %218 : vector<160xf32> to vector<1x1x1x160xf32>
      %220 = vector.broadcast %219 : vector<1x1x1x160xf32> to vector<2x1x8x160xf32>
      %221 = arith.mulf %216, %220 : vector<2x1x8x160xf32>
      %222 = arith.addf %207, %221 : vector<2x1x8x160xf32>
      %c3_i32 = arith.constant 3 : i32
      %223 = arith.addi %arg16, %c3_i32 : i32
      %c0_119 = arith.constant 0 : index
      %224 = arith.index_cast %223 : i32 to index
      %c6_120 = arith.constant 6 : index
      %c0_121 = arith.constant 0 : index
      %225 = vector.load %arg14[%c0_119, %224, %c6_120, %c0_121] : memref<2x12x24x160xf32, #tpu.memory_space<vmem>>, vector<2x1x8x160xf32>
      %226 = vector.extract_strided_slice %9 {offsets = [3, 0, 0], sizes = [1, 1, 160], strides = [1, 1, 1]} : vector<5x5x160xf32> to vector<1x1x160xf32>
      %227 = vector.shape_cast %226 : vector<1x1x160xf32> to vector<160xf32>
      %228 = vector.shape_cast %227 : vector<160xf32> to vector<1x1x1x160xf32>
      %229 = vector.broadcast %228 : vector<1x1x1x160xf32> to vector<2x1x8x160xf32>
      %230 = arith.mulf %225, %229 : vector<2x1x8x160xf32>
      %231 = arith.addf %222, %230 : vector<2x1x8x160xf32>
      %c3_i32_122 = arith.constant 3 : i32
      %232 = arith.addi %arg16, %c3_i32_122 : i32
      %c0_123 = arith.constant 0 : index
      %233 = arith.index_cast %232 : i32 to index
      %c7_124 = arith.constant 7 : index
      %c0_125 = arith.constant 0 : index
      %234 = vector.load %arg14[%c0_123, %233, %c7_124, %c0_125] : memref<2x12x24x160xf32, #tpu.memory_space<vmem>>, vector<2x1x8x160xf32>
      %235 = vector.extract_strided_slice %9 {offsets = [3, 1, 0], sizes = [1, 1, 160], strides = [1, 1, 1]} : vector<5x5x160xf32> to vector<1x1x160xf32>
      %236 = vector.shape_cast %235 : vector<1x1x160xf32> to vector<160xf32>
      %237 = vector.shape_cast %236 : vector<160xf32> to vector<1x1x1x160xf32>
      %238 = vector.broadcast %237 : vector<1x1x1x160xf32> to vector<2x1x8x160xf32>
      %239 = arith.mulf %234, %238 : vector<2x1x8x160xf32>
      %240 = arith.addf %231, %239 : vector<2x1x8x160xf32>
      %241 = vector.extract_strided_slice %8 {offsets = [2, 0, 0], sizes = [1, 1, 160], strides = [1, 1, 1]} : vector<3x3x160xf32> to vector<1x1x160xf32>
      %242 = vector.shape_cast %241 : vector<1x1x160xf32> to vector<160xf32>
      %243 = vector.shape_cast %242 : vector<160xf32> to vector<1x1x1x160xf32>
      %244 = vector.broadcast %243 : vector<1x1x1x160xf32> to vector<2x1x8x160xf32>
      %245 = arith.mulf %234, %244 : vector<2x1x8x160xf32>
      %246 = arith.addf %213, %245 : vector<2x1x8x160xf32>
      %c3_i32_126 = arith.constant 3 : i32
      %247 = arith.addi %arg16, %c3_i32_126 : i32
      %c0_127 = arith.constant 0 : index
      %248 = arith.index_cast %247 : i32 to index
      %c8_128 = arith.constant 8 : index
      %c0_129 = arith.constant 0 : index
      %249 = vector.load %arg14[%c0_127, %248, %c8_128, %c0_129] : memref<2x12x24x160xf32, #tpu.memory_space<vmem>>, vector<2x1x8x160xf32>
      %250 = vector.extract_strided_slice %9 {offsets = [3, 2, 0], sizes = [1, 1, 160], strides = [1, 1, 1]} : vector<5x5x160xf32> to vector<1x1x160xf32>
      %251 = vector.shape_cast %250 : vector<1x1x160xf32> to vector<160xf32>
      %252 = vector.shape_cast %251 : vector<160xf32> to vector<1x1x1x160xf32>
      %253 = vector.broadcast %252 : vector<1x1x1x160xf32> to vector<2x1x8x160xf32>
      %254 = arith.mulf %249, %253 : vector<2x1x8x160xf32>
      %255 = arith.addf %240, %254 : vector<2x1x8x160xf32>
      %256 = vector.extract_strided_slice %8 {offsets = [2, 1, 0], sizes = [1, 1, 160], strides = [1, 1, 1]} : vector<3x3x160xf32> to vector<1x1x160xf32>
      %257 = vector.shape_cast %256 : vector<1x1x160xf32> to vector<160xf32>
      %258 = vector.shape_cast %257 : vector<160xf32> to vector<1x1x1x160xf32>
      %259 = vector.broadcast %258 : vector<1x1x1x160xf32> to vector<2x1x8x160xf32>
      %260 = arith.mulf %249, %259 : vector<2x1x8x160xf32>
      %261 = arith.addf %246, %260 : vector<2x1x8x160xf32>
      %c3_i32_130 = arith.constant 3 : i32
      %262 = arith.addi %arg16, %c3_i32_130 : i32
      %c0_131 = arith.constant 0 : index
      %263 = arith.index_cast %262 : i32 to index
      %c9_132 = arith.constant 9 : index
      %c0_133 = arith.constant 0 : index
      %264 = vector.load %arg14[%c0_131, %263, %c9_132, %c0_133] : memref<2x12x24x160xf32, #tpu.memory_space<vmem>>, vector<2x1x8x160xf32>
      %265 = vector.extract_strided_slice %9 {offsets = [3, 3, 0], sizes = [1, 1, 160], strides = [1, 1, 1]} : vector<5x5x160xf32> to vector<1x1x160xf32>
      %266 = vector.shape_cast %265 : vector<1x1x160xf32> to vector<160xf32>
      %267 = vector.shape_cast %266 : vector<160xf32> to vector<1x1x1x160xf32>
      %268 = vector.broadcast %267 : vector<1x1x1x160xf32> to vector<2x1x8x160xf32>
      %269 = arith.mulf %264, %268 : vector<2x1x8x160xf32>
      %270 = arith.addf %255, %269 : vector<2x1x8x160xf32>
      %271 = vector.extract_strided_slice %8 {offsets = [2, 2, 0], sizes = [1, 1, 160], strides = [1, 1, 1]} : vector<3x3x160xf32> to vector<1x1x160xf32>
      %272 = vector.shape_cast %271 : vector<1x1x160xf32> to vector<160xf32>
      %273 = vector.shape_cast %272 : vector<160xf32> to vector<1x1x1x160xf32>
      %274 = vector.broadcast %273 : vector<1x1x1x160xf32> to vector<2x1x8x160xf32>
      %275 = arith.mulf %264, %274 : vector<2x1x8x160xf32>
      %276 = arith.addf %261, %275 : vector<2x1x8x160xf32>
      %c3_i32_134 = arith.constant 3 : i32
      %277 = arith.addi %arg16, %c3_i32_134 : i32
      %c0_135 = arith.constant 0 : index
      %278 = arith.index_cast %277 : i32 to index
      %c10_136 = arith.constant 10 : index
      %c0_137 = arith.constant 0 : index
      %279 = vector.load %arg14[%c0_135, %278, %c10_136, %c0_137] : memref<2x12x24x160xf32, #tpu.memory_space<vmem>>, vector<2x1x8x160xf32>
      %280 = vector.extract_strided_slice %9 {offsets = [3, 4, 0], sizes = [1, 1, 160], strides = [1, 1, 1]} : vector<5x5x160xf32> to vector<1x1x160xf32>
      %281 = vector.shape_cast %280 : vector<1x1x160xf32> to vector<160xf32>
      %282 = vector.shape_cast %281 : vector<160xf32> to vector<1x1x1x160xf32>
      %283 = vector.broadcast %282 : vector<1x1x1x160xf32> to vector<2x1x8x160xf32>
      %284 = arith.mulf %279, %283 : vector<2x1x8x160xf32>
      %285 = arith.addf %270, %284 : vector<2x1x8x160xf32>
      %c4_i32 = arith.constant 4 : i32
      %286 = arith.addi %arg16, %c4_i32 : i32
      %c0_138 = arith.constant 0 : index
      %287 = arith.index_cast %286 : i32 to index
      %c6_139 = arith.constant 6 : index
      %c0_140 = arith.constant 0 : index
      %288 = vector.load %arg14[%c0_138, %287, %c6_139, %c0_140] : memref<2x12x24x160xf32, #tpu.memory_space<vmem>>, vector<2x1x8x160xf32>
      %289 = vector.extract_strided_slice %9 {offsets = [4, 0, 0], sizes = [1, 1, 160], strides = [1, 1, 1]} : vector<5x5x160xf32> to vector<1x1x160xf32>
      %290 = vector.shape_cast %289 : vector<1x1x160xf32> to vector<160xf32>
      %291 = vector.shape_cast %290 : vector<160xf32> to vector<1x1x1x160xf32>
      %292 = vector.broadcast %291 : vector<1x1x1x160xf32> to vector<2x1x8x160xf32>
      %293 = arith.mulf %288, %292 : vector<2x1x8x160xf32>
      %294 = arith.addf %285, %293 : vector<2x1x8x160xf32>
      %c4_i32_141 = arith.constant 4 : i32
      %295 = arith.addi %arg16, %c4_i32_141 : i32
      %c0_142 = arith.constant 0 : index
      %296 = arith.index_cast %295 : i32 to index
      %c7_143 = arith.constant 7 : index
      %c0_144 = arith.constant 0 : index
      %297 = vector.load %arg14[%c0_142, %296, %c7_143, %c0_144] : memref<2x12x24x160xf32, #tpu.memory_space<vmem>>, vector<2x1x8x160xf32>
      %298 = vector.extract_strided_slice %9 {offsets = [4, 1, 0], sizes = [1, 1, 160], strides = [1, 1, 1]} : vector<5x5x160xf32> to vector<1x1x160xf32>
      %299 = vector.shape_cast %298 : vector<1x1x160xf32> to vector<160xf32>
      %300 = vector.shape_cast %299 : vector<160xf32> to vector<1x1x1x160xf32>
      %301 = vector.broadcast %300 : vector<1x1x1x160xf32> to vector<2x1x8x160xf32>
      %302 = arith.mulf %297, %301 : vector<2x1x8x160xf32>
      %303 = arith.addf %294, %302 : vector<2x1x8x160xf32>
      %c4_i32_145 = arith.constant 4 : i32
      %304 = arith.addi %arg16, %c4_i32_145 : i32
      %c0_146 = arith.constant 0 : index
      %305 = arith.index_cast %304 : i32 to index
      %c8_147 = arith.constant 8 : index
      %c0_148 = arith.constant 0 : index
      %306 = vector.load %arg14[%c0_146, %305, %c8_147, %c0_148] : memref<2x12x24x160xf32, #tpu.memory_space<vmem>>, vector<2x1x8x160xf32>
      %307 = vector.extract_strided_slice %9 {offsets = [4, 2, 0], sizes = [1, 1, 160], strides = [1, 1, 1]} : vector<5x5x160xf32> to vector<1x1x160xf32>
      %308 = vector.shape_cast %307 : vector<1x1x160xf32> to vector<160xf32>
      %309 = vector.shape_cast %308 : vector<160xf32> to vector<1x1x1x160xf32>
      %310 = vector.broadcast %309 : vector<1x1x1x160xf32> to vector<2x1x8x160xf32>
      %311 = arith.mulf %306, %310 : vector<2x1x8x160xf32>
      %312 = arith.addf %303, %311 : vector<2x1x8x160xf32>
      %c4_i32_149 = arith.constant 4 : i32
      %313 = arith.addi %arg16, %c4_i32_149 : i32
      %c0_150 = arith.constant 0 : index
      %314 = arith.index_cast %313 : i32 to index
      %c9_151 = arith.constant 9 : index
      %c0_152 = arith.constant 0 : index
      %315 = vector.load %arg14[%c0_150, %314, %c9_151, %c0_152] : memref<2x12x24x160xf32, #tpu.memory_space<vmem>>, vector<2x1x8x160xf32>
      %316 = vector.extract_strided_slice %9 {offsets = [4, 3, 0], sizes = [1, 1, 160], strides = [1, 1, 1]} : vector<5x5x160xf32> to vector<1x1x160xf32>
      %317 = vector.shape_cast %316 : vector<1x1x160xf32> to vector<160xf32>
      %318 = vector.shape_cast %317 : vector<160xf32> to vector<1x1x1x160xf32>
      %319 = vector.broadcast %318 : vector<1x1x1x160xf32> to vector<2x1x8x160xf32>
      %320 = arith.mulf %315, %319 : vector<2x1x8x160xf32>
      %321 = arith.addf %312, %320 : vector<2x1x8x160xf32>
      %c4_i32_153 = arith.constant 4 : i32
      %322 = arith.addi %arg16, %c4_i32_153 : i32
      %c0_154 = arith.constant 0 : index
      %323 = arith.index_cast %322 : i32 to index
      %c10_155 = arith.constant 10 : index
      %c0_156 = arith.constant 0 : index
      %324 = vector.load %arg14[%c0_154, %323, %c10_155, %c0_156] : memref<2x12x24x160xf32, #tpu.memory_space<vmem>>, vector<2x1x8x160xf32>
      %325 = vector.extract_strided_slice %9 {offsets = [4, 4, 0], sizes = [1, 1, 160], strides = [1, 1, 1]} : vector<5x5x160xf32> to vector<1x1x160xf32>
      %326 = vector.shape_cast %325 : vector<1x1x160xf32> to vector<160xf32>
      %327 = vector.shape_cast %326 : vector<160xf32> to vector<1x1x1x160xf32>
      %328 = vector.broadcast %327 : vector<1x1x1x160xf32> to vector<2x1x8x160xf32>
      %329 = arith.mulf %324, %328 : vector<2x1x8x160xf32>
      %330 = arith.addf %321, %329 : vector<2x1x8x160xf32>
      %331 = vector.shape_cast %10 : vector<1x160xf32> to vector<1x1x1x160xf32>
      %332 = vector.broadcast %331 : vector<1x1x1x160xf32> to vector<2x1x8x160xf32>
      %333 = arith.addf %276, %332 : vector<2x1x8x160xf32>
      %cst_157 = arith.constant 0.000000e+00 : f32
      %334 = vector.broadcast %cst_157 : f32 to vector<2x1x8x160xf32>
      %335 = arith.maximumf %333, %334 : vector<2x1x8x160xf32>
      %336 = vector.shape_cast %11 : vector<1x160xf32> to vector<1x1x1x160xf32>
      %337 = vector.broadcast %336 : vector<1x1x1x160xf32> to vector<2x1x8x160xf32>
      %338 = arith.addf %330, %337 : vector<2x1x8x160xf32>
      %cst_158 = arith.constant 0.000000e+00 : f32
      %339 = vector.broadcast %cst_158 : f32 to vector<2x1x8x160xf32>
      %340 = arith.maximumf %338, %339 : vector<2x1x8x160xf32>
      %341 = tpu.concatenate %335, %340 in 3 : vector<2x1x8x160xf32>, vector<2x1x8x160xf32> -> vector<2x1x8x320xf32>
      %c0_159 = arith.constant 0 : index
      %342 = arith.index_cast %arg16 : i32 to index
      %c0_160 = arith.constant 0 : index
      %c0_161 = arith.constant 0 : index
      %343 = vector.load %arg15[%c0_159, %342, %c0_160, %c0_161] : memref<2x8x8x320xf32, #tpu.memory_space<vmem>>, vector<2x1x8x320xf32>
      tpu.vector_store %arg15[%c0_159, %342, %c0_160, %c0_161], %341 {strides = array<i32>} : memref<2x8x8x320xf32, #tpu.memory_space<vmem>>, vector<2x1x8x320xf32>,
    }
    %c8_i32_29 = arith.constant 8 : i32
    %c0_30 = arith.constant 0 : index
    %c0_31 = arith.constant 0 : index
    %c0_32 = arith.constant 0 : index
    %c0_33 = arith.constant 0 : index
    %13 = vector.load %arg15[%c0_30, %c0_31, %c0_32, %c0_33] : memref<2x8x8x320xf32, #tpu.memory_space<vmem>>, vector<2x8x8x320xf32>
    %14 = vector.shape_cast %13 : vector<2x8x8x320xf32> to vector<128x320xf32>
    %15 = arith.truncf %14 : vector<128x320xf32> to vector<128x320xbf16>
    %c0_34 = arith.constant 0 : index
    %c0_35 = arith.constant 0 : index
    %16 = vector.load %arg6[%c0_34, %c0_35] : memref<320x256xbf16, #tpu.memory_space<vmem>>, vector<320x256xbf16>
    %cst_36 = arith.constant dense<0.000000e+00> : vector<128x256xf32>
    %17 = tpu.matmul %15, %16, %cst_36 {dimension_numbers = #tpu.dot_dimension_numbers<[1], [0], [0], [1], [0, 0, 1, 1], [], []>} : vector<128x320xbf16>, vector<320x256xbf16>, vector<128x256xf32> -> vector<128x256xf32>
    %c0_37 = arith.constant 0 : index
    %c0_38 = arith.constant 0 : index
    %18 = vector.load %arg7[%c0_37, %c0_38] : memref<1x256xf32, #tpu.memory_space<vmem>>, vector<1x256xf32>
    %19 = vector.broadcast %18 : vector<1x256xf32> to vector<128x256xf32>
    %20 = arith.addf %17, %19 : vector<128x256xf32>
    %cst_39 = arith.constant 0.000000e+00 : f32
    %21 = vector.broadcast %cst_39 : f32 to vector<128x256xf32>
    %22 = arith.maximumf %20, %21 : vector<128x256xf32>
    %23 = vector.shape_cast %22 : vector<128x256xf32> to vector<2x64x256xf32>
    %cst_40 = arith.constant dense<0.000000e+00> : vector<2x256xf32>
    %24 = vector.multi_reduction <add>, %23, %cst_40 [1] : vector<2x64x256xf32> to vector<2x256xf32>
    %cst_41 = arith.constant 6.400000e+01 : f32
    %25 = vector.broadcast %cst_41 : f32 to vector<2x256xf32>
    %26 = arith.divf %24, %25 : vector<2x256xf32>
    %27 = arith.truncf %26 : vector<2x256xf32> to vector<2x256xbf16>
    %c0_42 = arith.constant 0 : index
    %c0_43 = arith.constant 0 : index
    %28 = vector.load %arg8[%c0_42, %c0_43] : memref<256x80xbf16, #tpu.memory_space<vmem>>, vector<256x80xbf16>
    %cst_44 = arith.constant dense<0.000000e+00> : vector<2x80xf32>
    %29 = tpu.matmul %27, %28, %cst_44 {dimension_numbers = #tpu.dot_dimension_numbers<[1], [0], [0], [1], [0, 0, 1, 1], [], []>} : vector<2x256xbf16>, vector<256x80xbf16>, vector<2x80xf32> -> vector<2x80xf32>
    %c0_45 = arith.constant 0 : index
    %c0_46 = arith.constant 0 : index
    %30 = vector.load %arg9[%c0_45, %c0_46] : memref<1x80xf32, #tpu.memory_space<vmem>>, vector<1x80xf32>
    %31 = vector.broadcast %30 : vector<1x80xf32> to vector<2x80xf32>
    %32 = arith.addf %29, %31 : vector<2x80xf32>
    %cst_47 = arith.constant 0.000000e+00 : f32
    %33 = vector.broadcast %cst_47 : f32 to vector<2x80xf32>
    %34 = arith.maximumf %32, %33 : vector<2x80xf32>
    %35 = arith.mulf %34, %34 : vector<2x80xf32>
    %c0_48 = arith.constant 0 : index
    %c0_49 = arith.constant 0 : index
    %36 = vector.load %arg10[%c0_48, %c0_49] : memref<80x80xf32, #tpu.memory_space<vmem>>, vector<80x80xf32>
    %cst_50 = arith.constant dense<0.000000e+00> : vector<2x80xf32>
    %37 = tpu.matmul %35, %36, %cst_50 {dimension_numbers = #tpu.dot_dimension_numbers<[1], [0], [0], [1], [0, 0, 1, 1], [], []>} : vector<2x80xf32>, vector<80x80xf32>, vector<2x80xf32> -> vector<2x80xf32>
    %38 = math.sqrt %37 : vector<2x80xf32>
    %cst_51 = arith.constant 9.99999996E-13 : f32
    %39 = vector.broadcast %cst_51 : f32 to vector<2x80xf32>
    %40 = arith.maximumf %38, %39 : vector<2x80xf32>
    %41 = arith.divf %34, %40 : vector<2x80xf32>
    %c0_52 = arith.constant 0 : index
    %c0_53 = arith.constant 0 : index
    %42 = vector.load %arg11[%c0_52, %c0_53] : memref<80x128xf32, #tpu.memory_space<vmem>>, vector<80x128xf32>
    %cst_54 = arith.constant dense<0.000000e+00> : vector<2x128xf32>
    %43 = tpu.matmul %41, %42, %cst_54 {dimension_numbers = #tpu.dot_dimension_numbers<[1], [0], [0], [1], [0, 0, 1, 1], [], []>} : vector<2x80xf32>, vector<80x128xf32>, vector<2x128xf32> -> vector<2x128xf32>
    %c0_55 = arith.constant 0 : index
    %c0_56 = arith.constant 0 : index
    %44 = vector.load %arg12[%c0_55, %c0_56] : memref<1x128xf32, #tpu.memory_space<vmem>>, vector<1x128xf32>
    %45 = vector.broadcast %44 : vector<1x128xf32> to vector<2x128xf32>
    %46 = arith.addf %43, %45 : vector<2x128xf32>
    %c0_57 = arith.constant 0 : index
    %c0_58 = arith.constant 0 : index
    %c0_59 = arith.constant 0 : index
    %47 = vector.load %arg13[%c0_57, %c0_58, %c0_59] : memref<1x2x128xf32, #tpu.memory_space<vmem>>, vector<1x2x128xf32>
    %48 = vector.shape_cast %47 : vector<1x2x128xf32> to vector<2x128xf32>
    %49 = vector.shape_cast %46 : vector<2x128xf32> to vector<1x2x128xf32>
    tpu.vector_store %arg13[%c0_57, %c0_58, %c0_59], %49 {strides = array<i32>} : memref<1x2x128xf32, #tpu.memory_space<vmem>>, vector<1x2x128xf32>,
    return
  }
  func.func @transform_0(%arg0: i32) -> (i32, i32, i32, i32) {
    %c0_i32 = arith.constant 0 : i32
    %c0_i32_0 = arith.constant 0 : i32
    %c0_i32_1 = arith.constant 0 : i32
    %c0_i32_2 = arith.constant 0 : i32
    return %arg0, %c0_i32, %c0_i32_0, %c0_i32_1 : i32, i32, i32, i32
  }
  func.func @transform_1(%arg0: i32) -> (i32, i32, i32) {
    %c0_i32 = arith.constant 0 : i32
    %c0_i32_0 = arith.constant 0 : i32
    %c0_i32_1 = arith.constant 0 : i32
    %c0_i32_2 = arith.constant 0 : i32
    return %c0_i32, %c0_i32_0, %c0_i32_1 : i32, i32, i32
  }
  func.func @transform_2(%arg0: i32) -> (i32, i32) {
    %c0_i32 = arith.constant 0 : i32
    %c0_i32_0 = arith.constant 0 : i32
    %c0_i32_1 = arith.constant 0 : i32
    return %c0_i32, %c0_i32_0 : i32, i32
  }
  func.func @transform_3(%arg0: i32) -> (i32, i32, i32) {
    %c0_i32 = arith.constant 0 : i32
    %c0_i32_0 = arith.constant 0 : i32
    %c0_i32_1 = arith.constant 0 : i32
    %c0_i32_2 = arith.constant 0 : i32
    return %c0_i32, %c0_i32_0, %c0_i32_1 : i32, i32, i32
  }
  func.func @transform_4(%arg0: i32) -> (i32, i32) {
    %c0_i32 = arith.constant 0 : i32
    %c0_i32_0 = arith.constant 0 : i32
    %c0_i32_1 = arith.constant 0 : i32
    return %c0_i32, %c0_i32_0 : i32, i32
  }
  func.func @transform_5(%arg0: i32) -> (i32, i32) {
    %c0_i32 = arith.constant 0 : i32
    %c0_i32_0 = arith.constant 0 : i32
    %c0_i32_1 = arith.constant 0 : i32
    return %c0_i32, %c0_i32_0 : i32, i32
  }
  func.func @transform_6(%arg0: i32) -> (i32, i32) {
    %c0_i32 = arith.constant 0 : i32
    %c0_i32_0 = arith.constant 0 : i32
    %c0_i32_1 = arith.constant 0 : i32
    return %c0_i32, %c0_i32_0 : i32, i32
  }
  func.func @transform_7(%arg0: i32) -> (i32, i32) {
    %c0_i32 = arith.constant 0 : i32
    %c0_i32_0 = arith.constant 0 : i32
    %c0_i32_1 = arith.constant 0 : i32
    return %c0_i32, %c0_i32_0 : i32, i32
  }
  func.func @transform_8(%arg0: i32) -> (i32, i32) {
    %c0_i32 = arith.constant 0 : i32
    %c0_i32_0 = arith.constant 0 : i32
    %c0_i32_1 = arith.constant 0 : i32
    return %c0_i32, %c0_i32_0 : i32, i32
  }
  func.func @transform_9(%arg0: i32) -> (i32, i32) {
    %c0_i32 = arith.constant 0 : i32
    %c0_i32_0 = arith.constant 0 : i32
    %c0_i32_1 = arith.constant 0 : i32
    return %c0_i32, %c0_i32_0 : i32, i32
  }
  func.func @transform_10(%arg0: i32) -> (i32, i32) {
    %c0_i32 = arith.constant 0 : i32
    %c0_i32_0 = arith.constant 0 : i32
    %c0_i32_1 = arith.constant 0 : i32
    return %c0_i32, %c0_i32_0 : i32, i32
  }
  func.func @transform_11(%arg0: i32) -> (i32, i32) {
    %c0_i32 = arith.constant 0 : i32
    %c0_i32_0 = arith.constant 0 : i32
    %c0_i32_1 = arith.constant 0 : i32
    return %c0_i32, %c0_i32_0 : i32, i32
  }
  func.func @transform_12(%arg0: i32) -> (i32, i32, i32) {
    %c0_i32 = arith.constant 0 : i32
    %c0_i32_0 = arith.constant 0 : i32
    %c0_i32_1 = arith.constant 0 : i32
    return %arg0, %c0_i32, %c0_i32_0 : i32, i32, i32
  }
}

</mosaic_0001>

<bundles_post_ra>
// kernel: lung_cancer_head.1
= control target key start
LH: loop header
LB: loop body
LE: loop exit
PB: predicated region body
PF: predicated region fallthrough
CT: control target
= control target key end

     0   :  { %17 = vsyncpa [#allocation5], 0  ;;  %s6244_s0 = inlined_call_operand.hbm [shape: f32[2,8,8,160], index: 0, kind: input, shape index: {}]   ;;  %s6245_s1 = inlined_call_operand.hbm [shape: f32[3,3,160], index: 1, kind: input, shape index: {}]   ;;  %s6246_s2 = inlined_call_operand.vmem [shape: f32[1,160], index: 2, kind: input, shape index: {}]   ;;  %s6247_s3 = inlined_call_operand.vmem [shape: f32[5,5,160], index: 3, kind: input, shape index: {}]   ;;  %s6248_s4 = inlined_call_operand.hbm [shape: f32[1,160], index: 4, kind: input, shape index: {}]   ;;  %s6249_s5 = inlined_call_operand.hbm [shape: bf16[320,256], index: 5, kind: input, shape index: {}]   ;;  %s6250_s6 = inlined_call_operand.hbm [shape: f32[1,256], index: 6, kind: input, shape index: {}]   ;;  %s6251_s7 = inlined_call_operand.vmem [shape: bf16[256,80], index: 7, kind: input, shape index: {}]   ;;  %s6252_s8 = inlined_call_operand.hbm [shape: f32[1,80], index: 8, kind: input, shape index: {}]   ;;  %s6253_s9 = inlined_call_operand.vmem [shape: f32[80,80], index: 9, kind: input, shape index: {}]   ;;  %s6254_s10 = inlined_call_operand.vmem [shape: f32[80,128], index: 10, kind: input, shape index: {}]   ;;  %s6255_s11 = inlined_call_operand.hbm [shape: f32[1,128], index: 11, kind: input, shape index: {}]   ;;  %s6256_s12 = inlined_call_operand.hbm [shape: f32[1,2,128], index: 12, kind: output, shape index: {}]  }
   0x1   :  { %18 = vsyncpa [#allocation8], 0 }
   0x2   :  { %19 = vsyncpa [#allocation11], 0 }
   0x3   :  { %20 = vsyncpa [#allocation14], 0 }
   0x4   :  { %21 = vsyncpa [#allocation6], 0  ;;  %s3978_s21 = smov [#allocation7]   ;;  %s3784_s25 = scalar_lea.hbm %s6245_s1, 384 }
   0x5   :  { %s39_s22 = sshll.u32 %s3978_s21, 4  ;;  %p3785_p0 = scmp.ne.s32.totalorder %s6245_s1, %s3784_s25  ;;  %s40_s22 = int_to_ptr.vmem [resolvable:$true] %s39_s22 }
   0x6   :  { %p3788_p1 = scmp.lt.u32.totalorder %s3784_s25, %s6245_s1 }
   0x8   :  { %p3790_p2 = pnand %p3788_p1, %p3785_p0 }
   0xa   :  { %3793 = shalt.err (!%p3790_p2)
}
   0xb   :  { %s3794_s30 = scalar_lea.vmem %s40_s22, 384  ;;  %p3799_p4 = scmp.lt.s32.totalorder %s40_s22, %s40_s22 }
   0xc   :  { %p3795_p3 = scmp.ne.s32.totalorder %s40_s22, %s3794_s30  ;;  %p3800_p5 = scmp.lt.s32.totalorder %s3794_s30, %s3794_s30 }
   0xe   :  { %p3801_p6 = por %p3800_p5, %p3799_p4 }
  0x10   :  { %p3802_p7 = pnand %p3801_p6, %p3795_p3 }
  0x12   :  { %3805 = shalt.err (!%p3802_p7)
}
  0x13   :  { %s3979_s13 = smov 128   ;;  %s3980_s14 = smov 8  }
  0x14   :  { %45 = dma.hbm_to_vmem [thread:$0]  %s6245_s1, 384, %s40_s22, [#allocation8], %s3979_s13, %s3979_s13, %s3980_s14  }
  0x15   :  { %s3981_s17 = smov [#allocation10]   ;;  %s3982_s19 = smov [#allocation13]  }
  0x16   :  { %s65_s18 = sshll.u32 %s3981_s17, 4  ;;  %s90_s20 = sshll.u32 %s3982_s19, 4  ;;  %s66_s18 = int_to_ptr.vmem [resolvable:$true] %s65_s18  ;;  %s91_s20 = int_to_ptr.vmem [resolvable:$true] %s90_s20 }
  0x17   :  { %s3806_s24 = scalar_lea.hbm %s6249_s5, 5120 }
  0x18   :  { %p3807_p8 = scmp.ne.s32.totalorder %s6249_s5, %s3806_s24  ;;  %p3810_p9 = scmp.lt.u32.totalorder %s3806_s24, %s6249_s5 }
  0x1a   :  { %p3812_p10 = pnand %p3810_p9, %p3807_p8 }
  0x1c   :  { %3815 = shalt.err (!%p3812_p10)
}
  0x1d   :  { %s3816_s1 = scalar_lea.vmem %s66_s18, 5120  ;;  %p3821_p12 = scmp.lt.s32.totalorder %s66_s18, %s66_s18 }
  0x1e   :  { %p3817_p11 = scmp.ne.s32.totalorder %s66_s18, %s3816_s1  ;;  %p3822_p13 = scmp.lt.s32.totalorder %s3816_s1, %s3816_s1 }
  0x20   :  { %p3823_p0 = por %p3822_p13, %p3821_p12 }
  0x22   :  { %p3824_p1 = pnand %p3823_p0, %p3817_p11 }
  0x24   :  { %3827 = shalt.err (!%p3824_p1)
}
  0x25   :  { %71 = dma.hbm_to_vmem [thread:$0]  %s6249_s5, 5120, %s66_s18, [#allocation11], %s3979_s13, %s3979_s13, %s3980_s14  }
  0x26   :  { %s3828_s16 = scalar_lea.hbm %s6252_s8, 16 }
  0x27   :  { %p3829_p2 = scmp.ne.s32.totalorder %s6252_s8, %s3828_s16  ;;  %p3832_p3 = scmp.lt.u32.totalorder %s3828_s16, %s6252_s8 }
  0x29   :  { %p3834_p4 = pnand %p3832_p3, %p3829_p2 }
  0x2b   :  { %3837 = shalt.err (!%p3834_p4)
}
  0x2c   :  { %s3838_s24 = scalar_lea.vmem %s91_s20, 16  ;;  %s3842_s25 = scalar_lea.vmem %s91_s20, 32 }
  0x2d   :  { %p3839_p5 = scmp.ne.s32.totalorder %s91_s20, %s3838_s24  ;;  %p3843_p6 = scmp.lt.s32.totalorder %s91_s20, %s91_s20 }
  0x2e   :  { %p3844_p7 = scmp.lt.s32.totalorder %s3842_s25, %s3838_s24 }
  0x30   :  { %p3845_p8 = por %p3844_p7, %p3843_p6 }
  0x32   :  { %p3846_p9 = pnand %p3845_p8, %p3839_p5 }
  0x34   :  { %3849 = shalt.err (!%p3846_p9)
}
  0x35   :  { %93 = dma.hbm_to_vmem [thread:$0]  %s6252_s8, 16, %s91_s20, [#allocation14]  }
  0x36   :  { %s3983_s14 = smov [#allocation4]   ;;  %s3850_s28 = scalar_lea.hbm %s6244_s0, 4096 }
  0x37   :  { %s27_s18 = sshll.u32 %s3983_s14, 4  ;;  %p3851_p10 = scmp.ne.s32.totalorder %s6244_s0, %s3850_s28  ;;  %s28_s18 = int_to_ptr.vmem [resolvable:$true] %s27_s18 }
  0x38   :  { %p3854_p11 = scmp.lt.u32.totalorder %s3850_s28, %s6244_s0 }
  0x3a   :  { %p3856_p12 = pnand %p3854_p11, %p3851_p10 }
  0x3c   :  { %3859 = shalt.err (!%p3856_p12)
}
  0x3d   :  { %s3860_s15 = scalar_lea.vmem %s28_s18, 4096  ;;  %p3865_p0 = scmp.lt.s32.totalorder %s28_s18, %s28_s18 }
  0x3e   :  { %p3861_p13 = scmp.ne.s32.totalorder %s28_s18, %s3860_s15  ;;  %p3866_p1 = scmp.lt.s32.totalorder %s3860_s15, %s3860_s15 }
  0x40   :  { %p3867_p2 = por %p3866_p1, %p3865_p0 }
  0x42   :  { %p3868_p3 = pnand %p3867_p2, %p3861_p13 }
  0x44   :  { %3871 = shalt.err (!%p3868_p3)
}
  0x45   :  { %s3984_s8 = smov 256   ;;  %s3985_s20 = smov 16  }
  0x46   :  { %33 = dma.hbm_to_vmem [thread:$0]  %s6244_s0, 4096, %s28_s18, [#allocation5], %s3984_s8, %s3984_s8, %s3985_s20  }
  0x47   :  { %s3986_s19 = smov [#allocation9]   ;;  %s3987_s23 = smov [#allocation12]  }
  0x48   :  { %s56_s21 = sshll.u32 %s3986_s19, 4  ;;  %s78_s24 = sshll.u32 %s3987_s23, 4  ;;  %s57_s21 = int_to_ptr.vmem [resolvable:$true] %s56_s21  ;;  %s79_s24 = int_to_ptr.vmem [resolvable:$true] %s78_s24 }
  0x49   :  { %s3872_s13 = scalar_lea.hbm %s6248_s4, 32 }
  0x4a   :  { %p3873_p4 = scmp.ne.s32.totalorder %s6248_s4, %s3872_s13  ;;  %p3876_p5 = scmp.lt.u32.totalorder %s3872_s13, %s6248_s4 }
  0x4c   :  { %p3878_p6 = pnand %p3876_p5, %p3873_p4 }
  0x4e   :  { %3881 = shalt.err (!%p3878_p6)
}
  0x4f   :  { %s3882_s0 = scalar_lea.vmem %s57_s21, 32  ;;  %p3887_p8 = scmp.lt.s32.totalorder %s57_s21, %s57_s21 }
  0x50   :  { %p3883_p7 = scmp.ne.s32.totalorder %s57_s21, %s3882_s0  ;;  %p3888_p9 = scmp.lt.s32.totalorder %s3882_s0, %s3882_s0 }
  0x52   :  { %p3889_p10 = por %p3888_p9, %p3887_p8 }
  0x54   :  { %p3890_p11 = pnand %p3889_p10, %p3883_p7 }
  0x56   :  { %3893 = shalt.err (!%p3890_p11)
}
  0x57   :  { %59 = dma.hbm_to_vmem [thread:$0]  %s6248_s4, 32, %s57_s21, [#allocation8]  }
  0x58   :  { %s3894_s30 = scalar_lea.hbm %s6250_s6, 32 }
  0x59   :  { %p3895_p12 = scmp.ne.s32.totalorder %s6250_s6, %s3894_s30  ;;  %p3898_p13 = scmp.lt.u32.totalorder %s3894_s30, %s6250_s6 }
  0x5b   :  { %p3900_p0 = pnand %p3898_p13, %p3895_p12 }
  0x5d   :  { %3903 = shalt.err (!%p3900_p0)
}
  0x5e   :  { %s3904_s17 = scalar_lea.vmem %s79_s24, 32  ;;  %p3909_p2 = scmp.lt.s32.totalorder %s79_s24, %s79_s24 }
  0x5f   :  { %p3905_p1 = scmp.ne.s32.totalorder %s79_s24, %s3904_s17  ;;  %p3910_p3 = scmp.lt.s32.totalorder %s3904_s17, %s3904_s17 }
  0x61   :  { %p3911_p4 = por %p3910_p3, %p3909_p2 }
  0x63   :  { %p3912_p5 = pnand %p3911_p4, %p3905_p1 }
  0x65   :  { %3915 = shalt.err (!%p3912_p5)
}
  0x66   :  { %81 = dma.hbm_to_vmem [thread:$0]  %s6250_s6, 32, %s79_s24, [#allocation11]  }
  0x67   :  { %s3988_s21 = smov [#allocation15]   ;;  %s3916_s13 = scalar_lea.hbm %s6255_s11, 16 }
  0x68   :  { %s104_s23 = sshll.u32 %s3988_s21, 4  ;;  %p3917_p6 = scmp.ne.s32.totalorder %s6255_s11, %s3916_s13  ;;  %s105_s23 = int_to_ptr.vmem [resolvable:$true] %s104_s23 }
  0x69   :  { %p3920_p7 = scmp.lt.u32.totalorder %s3916_s13, %s6255_s11 }
  0x6b   :  { %p3922_p8 = pnand %p3920_p7, %p3917_p6 }
  0x6d   :  { %3925 = shalt.err (!%p3922_p8)
}
  0x6e   :  { %s3926_s0 = scalar_lea.vmem %s105_s23, 16  ;;  %s3930_s6 = scalar_lea.vmem %s105_s23, 32 }
  0x6f   :  { %p3927_p9 = scmp.ne.s32.totalorder %s105_s23, %s3926_s0  ;;  %p3931_p10 = scmp.lt.s32.totalorder %s105_s23, %s105_s23 }
  0x70   :  { %p3932_p11 = scmp.lt.s32.totalorder %s3930_s6, %s3926_s0 }
  0x72   :  { %p3933_p12 = por %p3932_p11, %p3931_p10 }
  0x74   :  { %p3934_p13 = pnand %p3933_p12, %p3927_p9 }
  0x76   :  { %3937 = shalt.err (!%p3934_p13)
}
  0x77   :  { %107 = dma.hbm_to_vmem [thread:$0]  %s6255_s11, 16, %s105_s23, [#allocation14]  }
  0x78   :  { %3964 = dma.done.wait [#allocation5], 4096  }
  0x79   :  { %3965 = vsyncadd [#allocation5], 4294963200 }
  0x7a   :  { %3966 = dma.done.wait [#allocation8], 416  }
  0x7b   :  { %3967 = vsyncadd [#allocation8], 4294966880 }
  0x7c   :  { %3968 = dma.done.wait [#allocation11], 5152  }
  0x7d   :  { %3969 = vsyncadd [#allocation11], 4294962144 }
  0x7e   :  { %3970 = dma.done.wait [#allocation14], 32  }
  0x7f   :  { %3971 = vsyncadd [#allocation14], 4294967264  ;;  %vm131_vm0 = vcmask 261120   ;;  %vm182_vm1 = vcmask 261126   ;;  %vm215_vm2 = vcmask 254976   ;;  %v6257_v0 = vmov 0.0  }
  0x80   :  { %130 = vst [vmem:[#allocation2] sm:$0xff] %v6257_v0  ;;  %133 = vst [vmem:[#allocation2 + $0x10] sm:$0xff] %v6257_v0  ;;  %v4312_v1 = vld [vmem:[#allocation7] sm:$0x77]  ;;  %v4314_v2 = vld [vmem:[#allocation7 + $0x8] sm:$0x77] }
  0x81   :  { %135 = vst [vmem:[#allocation2 + $0x20] sm:$0xff] %v6257_v0  ;;  %137 = vst [vmem:[#allocation2 + $0x30] sm:$0xff] %v6257_v0  ;;  %v4316_v3 = vld [vmem:[#allocation7 + $0x10] sm:$0x77]  ;;  %v4321_v4 = vld [vmem:[%s6247_s3] sm:$0x1f] }
  0x82   :  { %139 = vst [vmem:[#allocation2 + $0x40] sm:$0xff] %v6257_v0  ;;  %141 = vst [vmem:[#allocation2 + $0x50] sm:$0xff] %v6257_v0  ;;  %v4326_v5 = vld [vmem:[%s6247_s3 + $0x8] sm:$0x1f]  ;;  %v4331_v6 = vld [vmem:[%s6247_s3 + $0x10] sm:$0x1f] }
  0x83   :  { %143 = vst [vmem:[#allocation2 + $0x240] sm:$0xff] %v6257_v0  ;;  %145 = vst [vmem:[#allocation2 + $0x250] sm:$0xff] %v6257_v0  ;;  %v4336_v7 = vld [vmem:[%s6247_s3 + $0x18] sm:$0x1f]  ;;  %v4341_v8 = vld [vmem:[%s6247_s3 + $0x20] sm:$0x1f] }
  0x84   :  { %147 = vst [vmem:[#allocation2 + $0x260] sm:$0xff] %v6257_v0  ;;  %149 = vst [vmem:[#allocation2 + $0x270] sm:$0xff] %v6257_v0  ;;  %v4346_v9 = vld [vmem:[%s6247_s3 + $0x28] sm:$0x1f]  ;;  %v4351_v10 = vld [vmem:[%s6247_s3 + $0x30] sm:$0x1f] }
  0x85   :  { %151 = vst [vmem:[#allocation2 + $0x280] sm:$0xff] %v6257_v0  ;;  %153 = vst [vmem:[#allocation2 + $0x290] sm:$0xff] %v6257_v0  ;;  %v4356_v11 = vld [vmem:[%s6247_s3 + $0x38] sm:$0x1f]  ;;  %v4361_v12 = vld [vmem:[%s6247_s3 + $0x40] sm:$0x1f] }
  0x86   :  { %156 = vst [vmem:[#allocation2 + $0x1e0] sm:$0xff] %v6257_v0  ;;  %158 = vst [vmem:[#allocation2 + $0x1f0] sm:$0xff] %v6257_v0  ;;  %v4366_v13 = vld [vmem:[%s6247_s3 + $0x48] sm:$0x1f]  ;;  %v4371_v14 = vld [vmem:[%s6246_s2] sm:$0x3] }
  0x87   :  { %160 = vst [vmem:[#allocation2 + $0x200] sm:$0xff] %v6257_v0  ;;  %162 = vst [vmem:[#allocation2 + $0x210] sm:$0xff] %v6257_v0  ;;  %v4373_v15 = vld [vmem:[#allocation9] sm:$0x3]  ;;  %v247_v16 = vld [vmem:[#allocation4] sm:$0xff]  ;;  %s4391_s2 = smov 0  }
  0x88   :  { %164 = vst [vmem:[#allocation2 + $0x220] sm:$0xff] %v6257_v0  ;;  %166 = vst [vmem:[#allocation2 + $0x230] sm:$0xff] %v6257_v0  ;;  %v248_v17 = vld [vmem:[#allocation4 + $0x8] sm:$0xff]  ;;  %v249_v18 = vld [vmem:[#allocation4 + $0x10] sm:$0xff] }
  0x89   :  { %168 = vst [vmem:[#allocation2 + $0x420] sm:$0xff] %v6257_v0  ;;  %170 = vst [vmem:[#allocation2 + $0x430] sm:$0xff] %v6257_v0  ;;  %v250_v19 = vld [vmem:[#allocation4 + $0x18] sm:$0xff]  ;;  %v251_v20 = vld [vmem:[#allocation4 + $0x20] sm:$0xff] }
  0x8a   :  { %172 = vst [vmem:[#allocation2 + $0x440] sm:$0xff] %v6257_v0  ;;  %174 = vst [vmem:[#allocation2 + $0x450] sm:$0xff] %v6257_v0  ;;  %v252_v21 = vld [vmem:[#allocation4 + $0x28] sm:$0xff]  ;;  %v253_v22 = vld [vmem:[#allocation4 + $0x30] sm:$0xff] }
  0x8b   :  { %176 = vst [vmem:[#allocation2 + $0x460] sm:$0xff] %v6257_v0  ;;  %178 = vst [vmem:[#allocation2 + $0x470] sm:$0xff] %v6257_v0  ;;  %v254_v23 = vld [vmem:[#allocation4 + $0x38] sm:$0xff]  ;;  %v255_v24 = vld [vmem:[#allocation4 + $0x40] sm:$0xff] }
  0x8c   :  { %181 = vst [vmem:[#allocation2 + $0x60] sm:$0xc0] %v6257_v0  ;;  %184 = vst [vmem:[#allocation2 + $0x90] sm:$0xc0] %v6257_v0  ;;  %v256_v25 = vld [vmem:[#allocation4 + $0x48] sm:$0xff]  ;;  %v257_v26 = vld [vmem:[#allocation4 + $0x50] sm:$0xff] }
  0x8d   :  { %186 = vst [vmem:[#allocation2 + $0xc0] sm:$0xc0] %v6257_v0  ;;  %188 = vst [vmem:[#allocation2 + $0xf0] sm:$0xc0] %v6257_v0  ;;  %v258_v27 = vld [vmem:[#allocation4 + $0x58] sm:$0xff]  ;;  %v259_v28 = vld [vmem:[#allocation4 + $0x60] sm:$0xff] }
  0x8e   :  { %190 = vst [vmem:[#allocation2 + $0x120] sm:$0xc0] %v6257_v0  ;;  %192 = vst [vmem:[#allocation2 + $0x150] sm:$0xc0] %v6257_v0  ;;  %v260_v29 = vld [vmem:[#allocation4 + $0x68] sm:$0xff]  ;;  %v261_v30 = vld [vmem:[#allocation4 + $0x70] sm:$0xff] }
  0x8f   :  { %194 = vst [vmem:[#allocation2 + $0x180] sm:$0xc0] %v6257_v0  ;;  %196 = vst [vmem:[#allocation2 + $0x1b0] sm:$0xc0] %v6257_v0  ;;  %v262_v31 = vld [vmem:[#allocation4 + $0x78] sm:$0xff]  ;;  %v263_v32 = vld [vmem:[#allocation4 + $0x80] sm:$0xff] }
  0x90   :  { %198 = vst [vmem:[#allocation2 + $0x2a0] sm:$0xc0] %v6257_v0  ;;  %200 = vst [vmem:[#allocation2 + $0x2d0] sm:$0xc0] %v6257_v0  ;;  %v264_v33 = vld [vmem:[#allocation4 + $0x88] sm:$0xff]  ;;  %v265_v34 = vld [vmem:[#allocation4 + $0x90] sm:$0xff] }
  0x91   :  { %202 = vst [vmem:[#allocation2 + $0x300] sm:$0xc0] %v6257_v0  ;;  %204 = vst [vmem:[#allocation2 + $0x330] sm:$0xc0] %v6257_v0  ;;  %v266_v35 = vld [vmem:[#allocation4 + $0x98] sm:$0xff]  ;;  %v267_v36 = vld [vmem:[#allocation4 + $0xa0] sm:$0xff] }
  0x92   :  { %206 = vst [vmem:[#allocation2 + $0x360] sm:$0xc0] %v6257_v0  ;;  %208 = vst [vmem:[#allocation2 + $0x390] sm:$0xc0] %v6257_v0  ;;  %v268_v37 = vld [vmem:[#allocation4 + $0xa8] sm:$0xff]  ;;  %v269_v38 = vld [vmem:[#allocation4 + $0xb0] sm:$0xff] }
  0x93   :  { %210 = vst [vmem:[#allocation2 + $0x3c0] sm:$0xc0] %v6257_v0  ;;  %212 = vst [vmem:[#allocation2 + $0x3f0] sm:$0xc0] %v6257_v0  ;;  %v270_v39 = vld [vmem:[#allocation4 + $0xb8] sm:$0xff]  ;;  %v271_v40 = vld [vmem:[#allocation4 + $0xc0] sm:$0xff] }
  0x94   :  { %214 = vst [vmem:[#allocation2 + $0x80] sm:$0x3] %v6257_v0  ;;  %217 = vst [vmem:[#allocation2 + $0xb0] sm:$0x3] %v6257_v0  ;;  %v272_v41 = vld [vmem:[#allocation4 + $0xc8] sm:$0xff]  ;;  %v273_v42 = vld [vmem:[#allocation4 + $0xd0] sm:$0xff] }
  0x95   :  { %219 = vst [vmem:[#allocation2 + $0xe0] sm:$0x3] %v6257_v0  ;;  %221 = vst [vmem:[#allocation2 + $0x110] sm:$0x3] %v6257_v0  ;;  %v274_v43 = vld [vmem:[#allocation4 + $0xd8] sm:$0xff]  ;;  %v275_v44 = vld [vmem:[#allocation4 + $0xe0] sm:$0xff] }
  0x96   :  { %223 = vst [vmem:[#allocation2 + $0x140] sm:$0x3] %v6257_v0  ;;  %225 = vst [vmem:[#allocation2 + $0x170] sm:$0x3] %v6257_v0  ;;  %v276_v45 = vld [vmem:[#allocation4 + $0xe8] sm:$0xff]  ;;  %v277_v46 = vld [vmem:[#allocation4 + $0xf0] sm:$0xff] }
  0x97   :  { %227 = vst [vmem:[#allocation2 + $0x1a0] sm:$0x3] %v6257_v0  ;;  %229 = vst [vmem:[#allocation2 + $0x1d0] sm:$0x3] %v6257_v0  ;;  %v278_v47 = vld [vmem:[#allocation4 + $0xf8] sm:$0xff] }
  0x98   :  { %231 = vst [vmem:[#allocation2 + $0x2c0] sm:$0x3] %v6257_v0  ;;  %233 = vst [vmem:[#allocation2 + $0x2f0] sm:$0x3] %v6257_v0 }
  0x99   :  { %235 = vst [vmem:[#allocation2 + $0x320] sm:$0x3] %v6257_v0  ;;  %237 = vst [vmem:[#allocation2 + $0x350] sm:$0x3] %v6257_v0 }
  0x9a   :  { %239 = vst [vmem:[#allocation2 + $0x380] sm:$0x3] %v6257_v0  ;;  %241 = vst [vmem:[#allocation2 + $0x3b0] sm:$0x3] %v6257_v0 }
  0x9b   :  { %243 = vst [vmem:[#allocation2 + $0x3e0] sm:$0x3] %v6257_v0  ;;  %245 = vst [vmem:[#allocation2 + $0x410] sm:$0x3] %v6257_v0 }
  0x9c   :  { %132 = vst.msk [vmem:[#allocation2 + $0x8] sm:$0xff] %vm131_vm0, %v6257_v0  ;;  %134 = vst.msk [vmem:[#allocation2 + $0x18] sm:$0xff] %vm131_vm0, %v6257_v0 }
  0x9d   :  { %136 = vst.msk [vmem:[#allocation2 + $0x28] sm:$0xff] %vm131_vm0, %v6257_v0  ;;  %138 = vst.msk [vmem:[#allocation2 + $0x38] sm:$0xff] %vm131_vm0, %v6257_v0 }
  0x9e   :  { %140 = vst.msk [vmem:[#allocation2 + $0x48] sm:$0xff] %vm131_vm0, %v6257_v0  ;;  %142 = vst.msk [vmem:[#allocation2 + $0x58] sm:$0xff] %vm131_vm0, %v6257_v0 }
  0x9f   :  { %144 = vst.msk [vmem:[#allocation2 + $0x248] sm:$0xff] %vm131_vm0, %v6257_v0  ;;  %146 = vst.msk [vmem:[#allocation2 + $0x258] sm:$0xff] %vm131_vm0, %v6257_v0 }
  0xa0   :  { %148 = vst.msk [vmem:[#allocation2 + $0x268] sm:$0xff] %vm131_vm0, %v6257_v0  ;;  %150 = vst.msk [vmem:[#allocation2 + $0x278] sm:$0xff] %vm131_vm0, %v6257_v0 }
  0xa1   :  { %152 = vst.msk [vmem:[#allocation2 + $0x288] sm:$0xff] %vm131_vm0, %v6257_v0  ;;  %154 = vst.msk [vmem:[#allocation2 + $0x298] sm:$0xff] %vm131_vm0, %v6257_v0 }
  0xa2   :  { %157 = vst.msk [vmem:[#allocation2 + $0x1e8] sm:$0xff] %vm131_vm0, %v6257_v0  ;;  %159 = vst.msk [vmem:[#allocation2 + $0x1f8] sm:$0xff] %vm131_vm0, %v6257_v0 }
  0xa3   :  { %161 = vst.msk [vmem:[#allocation2 + $0x208] sm:$0xff] %vm131_vm0, %v6257_v0  ;;  %163 = vst.msk [vmem:[#allocation2 + $0x218] sm:$0xff] %vm131_vm0, %v6257_v0 }
  0xa4   :  { %165 = vst.msk [vmem:[#allocation2 + $0x228] sm:$0xff] %vm131_vm0, %v6257_v0  ;;  %167 = vst.msk [vmem:[#allocation2 + $0x238] sm:$0xff] %vm131_vm0, %v6257_v0 }
  0xa5   :  { %169 = vst.msk [vmem:[#allocation2 + $0x428] sm:$0xff] %vm131_vm0, %v6257_v0  ;;  %171 = vst.msk [vmem:[#allocation2 + $0x438] sm:$0xff] %vm131_vm0, %v6257_v0 }
  0xa6   :  { %173 = vst.msk [vmem:[#allocation2 + $0x448] sm:$0xff] %vm131_vm0, %v6257_v0  ;;  %175 = vst.msk [vmem:[#allocation2 + $0x458] sm:$0xff] %vm131_vm0, %v6257_v0 }
  0xa7   :  { %177 = vst.msk [vmem:[#allocation2 + $0x468] sm:$0xff] %vm131_vm0, %v6257_v0  ;;  %179 = vst.msk [vmem:[#allocation2 + $0x478] sm:$0xff] %vm131_vm0, %v6257_v0 }
  0xa8   :  { %183 = vst.msk [vmem:[#allocation2 + $0x68] sm:$0xc0] %vm182_vm1, %v6257_v0  ;;  %185 = vst.msk [vmem:[#allocation2 + $0x98] sm:$0xc0] %vm182_vm1, %v6257_v0 }
  0xa9   :  { %187 = vst.msk [vmem:[#allocation2 + $0xc8] sm:$0xc0] %vm182_vm1, %v6257_v0  ;;  %189 = vst.msk [vmem:[#allocation2 + $0xf8] sm:$0xc0] %vm182_vm1, %v6257_v0 }
  0xaa   :  { %191 = vst.msk [vmem:[#allocation2 + $0x128] sm:$0xc0] %vm182_vm1, %v6257_v0  ;;  %193 = vst.msk [vmem:[#allocation2 + $0x158] sm:$0xc0] %vm182_vm1, %v6257_v0 }
  0xab   :  { %195 = vst.msk [vmem:[#allocation2 + $0x188] sm:$0xc0] %vm182_vm1, %v6257_v0  ;;  %197 = vst.msk [vmem:[#allocation2 + $0x1b8] sm:$0xc0] %vm182_vm1, %v6257_v0 }
  0xac   :  { %199 = vst.msk [vmem:[#allocation2 + $0x2a8] sm:$0xc0] %vm182_vm1, %v6257_v0  ;;  %201 = vst.msk [vmem:[#allocation2 + $0x2d8] sm:$0xc0] %vm182_vm1, %v6257_v0 }
  0xad   :  { %203 = vst.msk [vmem:[#allocation2 + $0x308] sm:$0xc0] %vm182_vm1, %v6257_v0  ;;  %205 = vst.msk [vmem:[#allocation2 + $0x338] sm:$0xc0] %vm182_vm1, %v6257_v0 }
  0xae   :  { %207 = vst.msk [vmem:[#allocation2 + $0x368] sm:$0xc0] %vm182_vm1, %v6257_v0  ;;  %209 = vst.msk [vmem:[#allocation2 + $0x398] sm:$0xc0] %vm182_vm1, %v6257_v0 }
  0xaf   :  { %211 = vst.msk [vmem:[#allocation2 + $0x3c8] sm:$0xc0] %vm182_vm1, %v6257_v0  ;;  %213 = vst.msk [vmem:[#allocation2 + $0x3f8] sm:$0xc0] %vm182_vm1, %v6257_v0 }
  0xb0   :  { %216 = vst.msk [vmem:[#allocation2 + $0x88] sm:$0x3] %vm215_vm2, %v6257_v0  ;;  %218 = vst.msk [vmem:[#allocation2 + $0xb8] sm:$0x3] %vm215_vm2, %v6257_v0 }
  0xb1   :  { %220 = vst.msk [vmem:[#allocation2 + $0xe8] sm:$0x3] %vm215_vm2, %v6257_v0  ;;  %222 = vst.msk [vmem:[#allocation2 + $0x118] sm:$0x3] %vm215_vm2, %v6257_v0 }
  0xb2   :  { %224 = vst.msk [vmem:[#allocation2 + $0x148] sm:$0x3] %vm215_vm2, %v6257_v0  ;;  %226 = vst.msk [vmem:[#allocation2 + $0x178] sm:$0x3] %vm215_vm2, %v6257_v0 }
  0xb3   :  { %228 = vst.msk [vmem:[#allocation2 + $0x1a8] sm:$0x3] %vm215_vm2, %v6257_v0  ;;  %230 = vst.msk [vmem:[#allocation2 + $0x1d8] sm:$0x3] %vm215_vm2, %v6257_v0 }
  0xb4   :  { %232 = vst.msk [vmem:[#allocation2 + $0x2c8] sm:$0x3] %vm215_vm2, %v6257_v0  ;;  %234 = vst.msk [vmem:[#allocation2 + $0x2f8] sm:$0x3] %vm215_vm2, %v6257_v0 }
  0xb5   :  { %236 = vst.msk [vmem:[#allocation2 + $0x328] sm:$0x3] %vm215_vm2, %v6257_v0  ;;  %238 = vst.msk [vmem:[#allocation2 + $0x358] sm:$0x3] %vm215_vm2, %v6257_v0 }
  0xb6   :  { %240 = vst.msk [vmem:[#allocation2 + $0x388] sm:$0x3] %vm215_vm2, %v6257_v0  ;;  %242 = vst.msk [vmem:[#allocation2 + $0x3b8] sm:$0x3] %vm215_vm2, %v6257_v0 }
  0xb7   :  { %244 = vst.msk [vmem:[#allocation2 + $0x3e8] sm:$0x3] %vm215_vm2, %v6257_v0  ;;  %246 = vst.msk [vmem:[#allocation2 + $0x418] sm:$0x3] %vm215_vm2, %v6257_v0 }
  0xb8   :  { %6428 = vst [vmem:[#allocation22_spill] sm:$0xff] %v4312_v1  ;;  %6429 = vst [vmem:[#allocation23_spill] sm:$0xff] %v4314_v2 }
  0xb9   :  { %6430 = vst [vmem:[#allocation24_spill] sm:$0xff] %v4316_v3  ;;  %6431 = vst [vmem:[#allocation25_spill] sm:$0xff] %v4321_v4 }
  0xba   :  { %6432 = vst [vmem:[#allocation26_spill] sm:$0xff] %v4326_v5  ;;  %6433 = vst [vmem:[#allocation27_spill] sm:$0xff] %v4331_v6 }
  0xbb   :  { %6434 = vst [vmem:[#allocation28_spill] sm:$0xff] %v4336_v7  ;;  %6435 = vst [vmem:[#allocation29_spill] sm:$0xff] %v4341_v8 }
  0xbc   :  { %6436 = vst [vmem:[#allocation30_spill] sm:$0xff] %v4346_v9  ;;  %6437 = vst [vmem:[#allocation31_spill] sm:$0xff] %v4351_v10 }
  0xbd   :  { %6438 = vst [vmem:[#allocation32_spill] sm:$0xff] %v4356_v11  ;;  %6439 = vst [vmem:[#allocation33_spill] sm:$0xff] %v4361_v12 }
  0xbe   :  { %6440 = vst [vmem:[#allocation34_spill] sm:$0xff] %v4366_v13  ;;  %6441 = vst [vmem:[#allocation35_spill] sm:$0xff] %v4371_v14 }
  0xbf   :  { %6442 = vst [vmem:[#allocation36_spill] sm:$0xff] %v4373_v15  ;;  %279 = vst [vmem:[#allocation2 + $0x70] sm:$0xff] %v247_v16 }
  0xc0   :  { %280 = vst.msk [vmem:[#allocation2 + $0x78] sm:$0xff] %vm131_vm0, %v248_v17  ;;  %281 = vst [vmem:[#allocation2 + $0xa0] sm:$0xff] %v249_v18 }
  0xc1   :  { %282 = vst.msk [vmem:[#allocation2 + $0xa8] sm:$0xff] %vm131_vm0, %v250_v19  ;;  %283 = vst [vmem:[#allocation2 + $0xd0] sm:$0xff] %v251_v20 }
  0xc2   :  { %284 = vst.msk [vmem:[#allocation2 + $0xd8] sm:$0xff] %vm131_vm0, %v252_v21  ;;  %285 = vst [vmem:[#allocation2 + $0x100] sm:$0xff] %v253_v22 }
  0xc3   :  { %286 = vst.msk [vmem:[#allocation2 + $0x108] sm:$0xff] %vm131_vm0, %v254_v23  ;;  %287 = vst [vmem:[#allocation2 + $0x130] sm:$0xff] %v255_v24 }
  0xc4   :  { %288 = vst.msk [vmem:[#allocation2 + $0x138] sm:$0xff] %vm131_vm0, %v256_v25  ;;  %289 = vst [vmem:[#allocation2 + $0x160] sm:$0xff] %v257_v26 }
  0xc5   :  { %290 = vst.msk [vmem:[#allocation2 + $0x168] sm:$0xff] %vm131_vm0, %v258_v27  ;;  %291 = vst [vmem:[#allocation2 + $0x190] sm:$0xff] %v259_v28 }
  0xc6   :  { %292 = vst.msk [vmem:[#allocation2 + $0x198] sm:$0xff] %vm131_vm0, %v260_v29  ;;  %293 = vst [vmem:[#allocation2 + $0x1c0] sm:$0xff] %v261_v30 }
  0xc7   :  { %294 = vst.msk [vmem:[#allocation2 + $0x1c8] sm:$0xff] %vm131_vm0, %v262_v31  ;;  %295 = vst [vmem:[#allocation2 + $0x2b0] sm:$0xff] %v263_v32 }
  0xc8   :  { %296 = vst.msk [vmem:[#allocation2 + $0x2b8] sm:$0xff] %vm131_vm0, %v264_v33  ;;  %297 = vst [vmem:[#allocation2 + $0x2e0] sm:$0xff] %v265_v34 }
  0xc9   :  { %298 = vst.msk [vmem:[#allocation2 + $0x2e8] sm:$0xff] %vm131_vm0, %v266_v35  ;;  %299 = vst [vmem:[#allocation2 + $0x310] sm:$0xff] %v267_v36 }
  0xca   :  { %300 = vst.msk [vmem:[#allocation2 + $0x318] sm:$0xff] %vm131_vm0, %v268_v37  ;;  %301 = vst [vmem:[#allocation2 + $0x340] sm:$0xff] %v269_v38 }
  0xcb   :  { %302 = vst.msk [vmem:[#allocation2 + $0x348] sm:$0xff] %vm131_vm0, %v270_v39  ;;  %303 = vst [vmem:[#allocation2 + $0x370] sm:$0xff] %v271_v40 }
  0xcc   :  { %304 = vst.msk [vmem:[#allocation2 + $0x378] sm:$0xff] %vm131_vm0, %v272_v41  ;;  %305 = vst [vmem:[#allocation2 + $0x3a0] sm:$0xff] %v273_v42 }
  0xcd   :  { %306 = vst.msk [vmem:[#allocation2 + $0x3a8] sm:$0xff] %vm131_vm0, %v274_v43  ;;  %307 = vst [vmem:[#allocation2 + $0x3d0] sm:$0xff] %v275_v44 }
  0xce   :  { %308 = vst.msk [vmem:[#allocation2 + $0x3d8] sm:$0xff] %vm131_vm0, %v276_v45  ;;  %309 = vst [vmem:[#allocation2 + $0x400] sm:$0xff] %v277_v46 }
  0xcf   :  { %310 = vst.msk [vmem:[#allocation2 + $0x408] sm:$0xff] %vm131_vm0, %v278_v47 }
  0xd0 LB: > { %v6443_v15 = vld [vmem:[#allocation36_spill] sm:$0xff]  ;;  %v6444_v12 = vld [vmem:[#allocation33_spill] sm:$0xff]  ;;  %v6445_v10 = vld [vmem:[#allocation31_spill] sm:$0xff]  ;;  %v343_v48 = vlaneseq  ;;  %s3455_s3 = smul.u32 48, %s3976_s2  ;;  %vm399_vm3 = vcmask 1046528   ;;  %s3990_s24 = smov 32   ;;  %s3976_s2 = sphi %s4391_s2, %s331_s2  }
  0xd1   : > { %v6446_v8 = vld [vmem:[#allocation29_spill] sm:$0xff]  ;;  %v6447_v13 = vld [vmem:[#allocation34_spill] sm:$0xff]  ;;  %v6448_v6 = vld [vmem:[#allocation27_spill] sm:$0xff]  ;;  %vm496_vm4 = vcmask 1044480   ;;  %vm557_vm5 = vcmask 1043456   ;;  %vm2074_vm6 = vcmask 1040384  }
  0xd2   : > { %v6449_v4 = vld [vmem:[#allocation25_spill] sm:$0xff]  ;;  %v6450_v11 = vld [vmem:[#allocation32_spill] sm:$0xff]  ;;  %v6451_v9 = vld [vmem:[#allocation30_spill] sm:$0xff]  ;;  %v4397_v49 = vshrl.u32 %v343_v48, 7  ;;  %s4411_s6 = scalar_lea.vmem [#allocation2], %s3455_s3  ;;  %vm889_vm7 = vcmask 1045504  }
  0xd3   : > { %v6452_v7 = vld [vmem:[#allocation28_spill] sm:$0xff]  ;;  %v6453_v5 = vld [vmem:[#allocation26_spill] sm:$0xff]  ;;  %s3456_s18 = smul.u32 24, %s3976_s2  ;;  %vm2152_vm8 = vcmask 523264   ;;  %s331_s2 = sadd.s32 1, %s3976_s2  }
  0xd4   : > { %6454 = vst [vmem:[#allocation37_spill] sm:$0xff] %v4397_v49  ;;  %v4400_v50 = vsub.s32 0, %v4397_v49  ;;  %v4403_v51 = vsub.s32 1, %v4397_v49  ;;  %v4406_v52 = vsub.s32 2, %v4397_v49  ;;  %v4409_v53 = vsub.s32 3, %v4397_v49  ;;  %p328_p0 = scmp.ge.s32.totalorder %s331_s2, 8  }
  0xd5   : > { %v4435_v63 = vsub.s32 4, %v4397_v49  ;;  %s5937_s11 = scalar_lea.vmem [#allocation3], %s3456_s18  ;;  %vm2872_vm9 = vcmask (%p328_p0), 1041409   ;;  %vm3993_vm10 = vmmov (%p328_p0), 0   ;;  %vm3027_vm11 = vcmask (%p328_p0), 654336  }
  0xd6   : > { %6455 = vst [vmem:[#allocation38_spill] sm:$0xff] %v4400_v50  ;;  %6456 = vst [vmem:[#allocation39_spill] sm:$0xff] %v4403_v51  ;;  %v372_v54 = vld [vmem:[%s4411_s6 + $0x248] sm:$0x80]  ;;  %v374_v55 = vld [vmem:[%s4411_s6 + $0x258] sm:$0x7f]  ;;  %v4418_v57 = vrot.slane %v6453_v5, %v4400_v50  ;;  %v4422_v58 = vrot.slane %v6453_v5, %v4403_v51  ;;  %v4427_v60 = vrot.slane %v6453_v5, %v4406_v52 }
  0xd7   : > { %6457 = vst [vmem:[#allocation40_spill] sm:$0xff] %v4406_v52  ;;  %v340_v56 = vld [vmem:[%s4411_s6 + $0x248] sm:$0xc0]  ;;  %v431_v59 = vld [vmem:[%s4411_s6 + $0x258] sm:$0xff]  ;;  %v4432_v62 = vrot.slane %v6453_v5, %v4409_v53  ;;  %6458 = vst [vmem:[#allocation41_spill] sm:$0xff] %v4435_v63  ;;  %v4447_v20 = vrot.slane %v6452_v7, %v4403_v51  ;;  %v4455_v23 = vrot.slane %v6453_v5, %v4435_v63 }
  0xd8   : > { %v469_v61 = vld [vmem:[%s4411_s6 + $0x258] sm:$0xfe]  ;;  %v388_v16 = vmul.f32 %v4422_v58, %v372_v54  ;;  %v4439_v17 = vmul.f32 %v4422_v58, %v374_v55  ;;  %v4442_v18 = vmul.f32 %v4427_v60, %v431_v59  ;;  %v356_v21 = vmul.f32 %v4418_v57, %v340_v56  ;;  %v3257_v25 = vld [vmem:[%s4411_s6 + $0x288] sm:$0x7f]  ;;  %v3291_v44 = vld [vmem:[%s4411_s6 + $0x2a8] sm:$0x80] }
  0xd9   : > { %v530_v19 = vld [vmem:[%s4411_s6 + $0x258] sm:$0xfc]  ;;  %v4451_v22 = vmul.f32 %v4432_v62, %v469_v61  ;;  %6462 = vst [vmem:[#allocation45_spill] sm:$0xff] %v4455_v23  ;;  %v4469_v32 = vmul.f32 %v3257_v25, %v4447_v20  ;;  %v4474_v35 = vrot.slane %v6452_v7, %v4400_v50  ;;  %v4478_v36 = vrot.slane %v6452_v7, %v4406_v52  ;;  %v3261_v38 = vld [vmem:[%s4411_s6 + $0x288] sm:$0xff]  ;;  %v464_v1 = vld [vmem:[%s4411_s6 + $0x10] sm:$0xfe] }
  0xda   : > { %6459 = vst [vmem:[#allocation42_spill] sm:$0xff] %v4439_v17  ;;  %6460 = vst [vmem:[#allocation43_spill] sm:$0xff] %v4442_v18  ;;  %v3255_v24 = vld [vmem:[%s4411_s6 + $0x278] sm:$0x80]  ;;  %v409_v26 = vrot.slane %v388_v16, 1  ;;  %v6263_v27 = vrot.slane %v4439_v17, 1  ;;  %v4462_v29 = vmul.f32 %v4455_v23, %v530_v19  ;;  %v4484_v39 = vrot.slane %v6452_v7, %v4409_v53 }
  0xdb   : > { %6461 = vst [vmem:[#allocation44_spill] sm:$0xff] %v4451_v22  ;;  %v6262_v28 = vrot.slane %v4442_v18, 2  ;;  %v643_v31 = vmul.f32 %v3255_v24, %v4447_v20  ;;  %6464 = vst [vmem:[#allocation47_spill] sm:$0xff] %v4469_v32  ;;  %v6261_v34 = vrot.slane %v4451_v22, 3  ;;  %v3247_v37 = vld [vmem:[%s4411_s6 + $0x278] sm:$0xc0]  ;;  %v4488_v40 = vrot.slane %v6451_v9, %v4403_v51 }
  0xdc   : > { %6463 = vst [vmem:[#allocation46_spill] sm:$0xff] %v4462_v29  ;;  %v411_v30 = vsel %vm399_vm3, %v409_v26, %v6263_v27  ;;  %6465 = vst [vmem:[#allocation48_spill] sm:$0xff] %v4474_v35  ;;  %v6260_v42 = vrot.slane %v4462_v29, 4  ;;  %v3267_v43 = vld [vmem:[%s4411_s6 + $0x288] sm:$0xfe]  ;;  %v6259_v46 = vrot.slane %v4469_v32, 1  ;;  %v611_v54 = vmul.f32 %v3247_v37, %v4474_v35 }
  0xdd   : > { %v425_v33 = vadd.f32 %v411_v30, %v356_v21  ;;  %6466 = vst [vmem:[#allocation49_spill] sm:$0xff] %v4484_v39  ;;  %v663_v45 = vrot.slane %v643_v31, 1  ;;  %v3293_v47 = vld [vmem:[%s4411_s6 + $0x2b8] sm:$0x7f]  ;;  %v4501_v55 = vmul.f32 %v3261_v38, %v4478_v36  ;;  %v4505_v56 = vrot.slane %v6452_v7, %v4435_v63  ;;  %v3275_v61 = vld [vmem:[%s4411_s6 + $0x288] sm:$0xfc] }
  0xde   : > { %v4508_v59 = vmul.f32 %v3267_v43, %v4484_v39  ;;  %v1035_v16 = vmul.f32 %v3291_v44, %v4488_v40  ;;  %v4514_v19 = vrot.slane %v6451_v9, %v4406_v52  ;;  %v4518_v21 = vrot.slane %v6451_v9, %v4409_v53  ;;  %v3297_v26 = vld [vmem:[%s4411_s6 + $0x2b8] sm:$0xff]  ;;  %v3333_v5 = vld [vmem:[%s4411_s6 + $0x2e8] sm:$0xff]  ;;  %v525_v22 = vld [vmem:[%s4411_s6 + $0x10] sm:$0xfc] }
  0xdf   : > { %v461_v41 = vadd.f32 %v6262_v28, %v425_v33  ;;  %6467 = vst [vmem:[#allocation50_spill] sm:$0xff] %v4501_v55  ;;  %6468 = vst [vmem:[#allocation51_spill] sm:$0xff] %v4505_v56  ;;  %v4523_v25 = vmul.f32 %v3293_v47, %v4488_v40  ;;  %v3303_v30 = vld [vmem:[%s4411_s6 + $0x2b8] sm:$0xfe]  ;;  %v4529_v31 = vrot.slane %v6450_v11, %v4403_v51  ;;  %v6264_v44 = vrot.slane %v4501_v55, 2 }
  0xe0   : > { %6469 = vst [vmem:[#allocation52_spill] sm:$0xff] %v4508_v59  ;;  %6470 = vst [vmem:[#allocation53_spill] sm:$0xff] %v4518_v21  ;;  %v665_v33 = vsel %vm399_vm3, %v663_v45, %v6259_v46  ;;  %v4536_v37 = vrot.slane %v6451_v9, %v4435_v63  ;;  %v3327_v38 = vld [vmem:[%s4411_s6 + $0x2d8] sm:$0x80]  ;;  %v4542_v47 = vmul.f32 %v3275_v61, %v4505_v56  ;;  %v3283_v46 = vld [vmem:[%s4411_s6 + $0x2a8] sm:$0xc0] }
  0xe1   : > { %v522_v48 = vadd.f32 %v6261_v34, %v461_v41  ;;  %6471 = vst [vmem:[#allocation54_spill] sm:$0xff] %v4523_v25  ;;  %v3329_v41 = vld [vmem:[%s4411_s6 + $0x2e8] sm:$0x7f]  ;;  %v3311_v0 = vld [vmem:[%s4411_s6 + $0x2b8] sm:$0xfc]  ;;  %v4552_v34 = vmul.f32 %v3297_v26, %v4514_v19  ;;  %v1426_v28 = vmul.f32 %v3327_v38, %v4529_v31  ;;  %v4582_v61 = vrot.slane %v6450_v11, %v4409_v53 }
  0xe2   : > { %6472 = vst [vmem:[#allocation55_spill] sm:$0xff] %v4536_v37  ;;  %6473 = vst [vmem:[#allocation56_spill] sm:$0xff] %v4542_v47  ;;  %v4560_v27 = vmul.f32 %v3329_v41, %v4529_v31  ;;  %v4563_v45 = vmul.f32 %v3311_v0, %v4536_v37  ;;  %v3319_v38 = vld [vmem:[%s4411_s6 + $0x2d8] sm:$0xc0]  ;;  %v4578_v0 = vrot.slane %v6450_v11, %v4406_v52  ;;  %v3339_v7 = vld [vmem:[%s4411_s6 + $0x2e8] sm:$0xfe] }
  0xe3   : > { %v583_v24 = vadd.f32 %v6260_v42, %v522_v48  ;;  %v4546_v48 = vrot.slane %v6451_v9, %v4400_v50  ;;  %v1055_v42 = vrot.slane %v1035_v16, 1  ;;  %6475 = vst [vmem:[#allocation58_spill] sm:$0xff] %v4552_v34  ;;  %v4567_v16 = vrot.slane %v6450_v11, %v4400_v50  ;;  %6481 = vst [vmem:[#allocation64_spill] sm:$0xff] %v4582_v61  ;;  %v3347_v32 = vld [vmem:[%s4411_s6 + $0x2e8] sm:$0xfc] }
  0xe4   : > { %6477 = vst [vmem:[#allocation60_spill] sm:$0xff] %v4560_v27  ;;  %6478 = vst [vmem:[#allocation61_spill] sm:$0xff] %v4563_v45  ;;  %v1446_v41 = vrot.slane %v1426_v28, 1  ;;  %v4598_v3 = vrot.slane %v6450_v11, %v4435_v63  ;;  %v367_v28 = vld [vmem:[%s4411_s6] sm:$0x80]  ;;  %v4610_v9 = vrot.slane %v6447_v13, %v4400_v50  ;;  %v428_v11 = vld [vmem:[%s4411_s6 + $0x10] sm:$0xff]  ;;  %v4620_v2 = vrot.slane %v6449_v4, %v4406_v52 }
  0xe5   : > { %v619_v43 = vadd.f32 %v611_v54, %v583_v24  ;;  %6474 = vst [vmem:[#allocation57_spill] sm:$0xff] %v4546_v48  ;;  %v4555_v54 = vmul.f32 %v3303_v30, %v4518_v21  ;;  %6479 = vst [vmem:[#allocation62_spill] sm:$0xff] %v4567_v16  ;;  %v4594_v14 = vmul.f32 %v3319_v38, %v4567_v16  ;;  %v335_v38 = vld [vmem:[%s4411_s6] sm:$0xc0]  ;;  %v6492_v55 = vrot.slane %v4560_v27, 1 }
  0xe6   : > { %6480 = vst [vmem:[#allocation63_spill] sm:$0xff] %v4578_v0  ;;  %6484 = vst [vmem:[#allocation65_spill] sm:$0xff] %v4598_v3  ;;  %v4635_v49 = vrot.slane %v6449_v4, %v4409_v53  ;;  %v4649_v17 = vmul.f32 %v4620_v2, %v428_v11  ;;  %v4666_v11 = vmul.f32 %v3347_v32, %v4598_v3 }
  0xe7   : > { %6476 = vst [vmem:[#allocation59_spill] sm:$0xff] %v4555_v54  ;;  %v679_v24 = vadd.f32 %v665_v33, %v619_v43  ;;  %v1003_v33 = vmul.f32 %v3283_v46, %v4546_v48  ;;  %v6483_v46 = vrot.slane %v4523_v25, 1  ;;  %6486 = vst [vmem:[#allocation66_spill] sm:$0xff] %v4610_v9  ;;  %v4615_v43 = vrot.slane %v6449_v4, %v4403_v51 }
  0xe8   : > { %6488 = vst [vmem:[#allocation68_spill] sm:$0xff] %v4620_v2  ;;  %v4624_v25 = vmul.f32 %v3333_v5, %v4578_v0  ;;  %v3355_v5 = vld [vmem:[%s4411_s6 + $0x308] sm:$0xc0]  ;;  %6493 = vst [vmem:[#allocation72_spill] sm:$0xff] %v4649_v17  ;;  %v6504_v3 = vrot.slane %v4649_v17, 2 }
  0xe9   : > { %v750_v26 = vadd.f32 %v6264_v44, %v679_v24  ;;  %v6482_v24 = vrot.slane %v4508_v59, 3  ;;  %v1057_v30 = vsel %vm399_vm3, %v1055_v42, %v6483_v46  ;;  %v369_v42 = vld [vmem:[%s4411_s6 + $0x10] sm:$0x7f]  ;;  %6487 = vst [vmem:[#allocation67_spill] sm:$0xff] %v4615_v43  ;;  %v1448_v59 = vsel %vm399_vm3, %v1446_v41, %v6492_v55  ;;  %v3250_v41 = vld [vmem:[%s4411_s6 + $0x30] sm:$0x80] }
  0xea   : > { %6489 = vst [vmem:[#allocation69_spill] sm:$0xff] %v4624_v25  ;;  %v383_v29 = vmul.f32 %v4615_v43, %v367_v28  ;;  %v4656_v55 = vrot.slane %v6449_v4, %v4435_v63  ;;  %v3252_v28 = vld [vmem:[%s4411_s6 + $0x40] sm:$0x7f]  ;;  %6496 = vst [vmem:[#allocation75_spill] sm:$0xff] %v4666_v11 }
  0xeb   : > { %v852_v44 = vadd.f32 %v6482_v24, %v750_v26  ;;  %v4602_v26 = vrot.slane %v6449_v4, %v4400_v50  ;;  %v6485_v24 = vrot.slane %v4542_v47, 4  ;;  %v3365_v4 = vld [vmem:[%s4411_s6 + $0x318] sm:$0x7f]  ;;  %v3262_v17 = vld [vmem:[%s4411_s6 + $0x40] sm:$0xfe] }
  0xec   : > { %6494 = vst [vmem:[#allocation73_spill] sm:$0xff] %v4656_v55  ;;  %v4673_v2 = vmul.f32 %v4656_v55, %v525_v22 }
  0xed   : > { %v975_v46 = vadd.f32 %v6485_v24, %v852_v44  ;;  %v4627_v44 = vmul.f32 %v3339_v7, %v4582_v61  ;;  %v4631_v24 = vrot.slane %v6447_v13, %v4403_v51  ;;  %v4644_v7 = vmul.f32 %v4615_v43, %v369_v42 }
  0xee   : > { %v351_v18 = vmul.f32 %v4602_v26, %v335_v38  ;;  %v400_v42 = vrot.slane %v383_v29, 1  ;;  %v4663_v38 = vrot.slane %v6448_v6, %v4403_v51  ;;  %6497 = vst [vmem:[#allocation76_spill] sm:$0xff] %v4673_v2  ;;  %v6498_v29 = vrot.slane %v4552_v34, 2 }
  0xef   : > { %6490 = vst [vmem:[#allocation70_spill] sm:$0xff] %v4627_v44  ;;  %6491 = vst [vmem:[#allocation71_spill] sm:$0xff] %v4631_v24  ;;  %v1011_v47 = vadd.f32 %v1003_v33, %v975_v46  ;;  %v4652_v33 = vmul.f32 %v4635_v49, %v464_v1  ;;  %v6292_v27 = vrot.slane %v4644_v7, 1  ;;  %v4669_v1 = vmul.f32 %v3355_v5, %v4610_v9 }
  0xf0   : > { %6495 = vst [vmem:[#allocation74_spill] sm:$0xff] %v4663_v38  ;;  %v638_v43 = vmul.f32 %v3250_v41, %v4663_v38  ;;  %v4683_v5 = vmul.f32 %v3252_v28, %v4663_v38  ;;  %v4689_v34 = vrot.slane %v6448_v6, %v4400_v50  ;;  %v3369_v38 = vld [vmem:[%s4411_s6 + $0x318] sm:$0xff]  ;;  %v4717_v41 = vmul.f32 %v3365_v4, %v4631_v24 }
  0xf1   : > { %v1071_v46 = vadd.f32 %v1057_v30, %v1011_v47  ;;  %v3363_v30 = vld [vmem:[%s4411_s6 + $0x308] sm:$0x80]  ;;  %v402_v32 = vsel %vm399_vm3, %v400_v42, %v6292_v27  ;;  %v3258_v27 = vld [vmem:[%s4411_s6 + $0x40] sm:$0xff] }
  0xf2   : > { %6499 = vst [vmem:[#allocation77_spill] sm:$0xff] %v4683_v5  ;;  %v420_v9 = vadd.f32 %v402_v32, %v351_v18  ;;  %6500 = vst [vmem:[#allocation78_spill] sm:$0xff] %v4689_v34  ;;  %v4701_v18 = vrot.slane %v6447_v13, %v4406_v52  ;;  %v3242_v32 = vld [vmem:[%s4411_s6 + $0x30] sm:$0xc0]  ;;  %v1817_v22 = vmul.f32 %v3363_v30, %v4631_v24  ;;  %v654_v55 = vrot.slane %v638_v43, 1 }
  0xf3   : > { %v1142_v47 = vadd.f32 %v6498_v29, %v1071_v46  ;;  %v4693_v46 = vrot.slane %v6448_v6, %v4406_v52  ;;  %v6502_v29 = vrot.slane %v4555_v54, 3  ;;  %6507 = vst [vmem:[#allocation82_spill] sm:$0xff] %v4717_v41  ;;  %v606_v54 = vmul.f32 %v3242_v32, %v4689_v34  ;;  %v3270_v30 = vld [vmem:[%s4411_s6 + $0x40] sm:$0xfc]  ;;  %v3288_v43 = vld [vmem:[%s4411_s6 + $0x70] sm:$0x7f] }
  0xf4   : > { %6503 = vst [vmem:[#allocation80_spill] sm:$0xff] %v4701_v18  ;;  %v456_v61 = vadd.f32 %v6504_v3, %v420_v9  ;;  %v6508_v3 = vrot.slane %v4652_v33, 3  ;;  %v1837_v32 = vrot.slane %v1817_v22, 1  ;;  %v4758_v22 = vrot.slane %v6443_v15, %v4403_v51  ;;  %v3383_v34 = vld [vmem:[%s4411_s6 + $0x318] sm:$0xfc] }
  0xf5   : > { %6501 = vst [vmem:[#allocation79_spill] sm:$0xff] %v4693_v46  ;;  %v1244_v42 = vadd.f32 %v6502_v29, %v1142_v47  ;;  %v4712_v47 = vrot.slane %v6448_v6, %v4409_v53  ;;  %v6506_v29 = vrot.slane %v4563_v45, 4  ;;  %v4725_v0 = vmul.f32 %v3258_v27, %v4693_v46 }
  0xf6   : > { %v517_v9 = vadd.f32 %v6508_v3, %v456_v61  ;;  %v4739_v61 = vrot.slane %v6446_v8, %v4403_v51  ;;  %v4743_v27 = vrot.slane %v6447_v13, %v4409_v53  ;;  %v6514_v3 = vrot.slane %v4673_v2, 4  ;;  %6516 = vst [vmem:[#allocation89_spill] sm:$0xff] %v4758_v22 }
  0xf7   : > { %6505 = vst [vmem:[#allocation81_spill] sm:$0xff] %v4712_v47  ;;  %v1366_v28 = vadd.f32 %v6506_v29, %v1244_v42  ;;  %6509 = vst [vmem:[#allocation83_spill] sm:$0xff] %v4725_v0  ;;  %v4729_v42 = vrot.slane %v6448_v6, %v4435_v63  ;;  %v4734_v29 = vmul.f32 %v3369_v38, %v4701_v18  ;;  %v6517_v46 = vrot.slane %v4683_v5, 1 }
  0xf8   : > { %6512 = vst [vmem:[#allocation86_spill] sm:$0xff] %v4739_v61  ;;  %6513 = vst [vmem:[#allocation87_spill] sm:$0xff] %v4743_v27  ;;  %v578_v6 = vadd.f32 %v6514_v3, %v517_v9  ;;  %v4754_v45 = vrot.slane %v6447_v13, %v4435_v63  ;;  %v4773_v5 = vrot.slane %v6446_v8, %v4400_v50 }
  0xf9   : > { %6510 = vst [vmem:[#allocation84_spill] sm:$0xff] %v4729_v42  ;;  %v1402_v4 = vadd.f32 %v4594_v14, %v1366_v28  ;;  %6511 = vst [vmem:[#allocation85_spill] sm:$0xff] %v4734_v29  ;;  %v4748_v14 = vmul.f32 %v3262_v17, %v4712_v47  ;;  %v3286_v28 = vld [vmem:[%s4411_s6 + $0x60] sm:$0x80]  ;;  %v656_v18 = vsel %vm399_vm3, %v654_v55, %v6517_v46  ;;  %v3375_v17 = vld [vmem:[%s4411_s6 + $0x318] sm:$0xfe] }
  0xfa   : > { %6515 = vst [vmem:[#allocation88_spill] sm:$0xff] %v4754_v45  ;;  %v614_v3 = vadd.f32 %v606_v54, %v578_v6  ;;  %6520 = vst [vmem:[#allocation91_spill] sm:$0xff] %v4773_v5  ;;  %v1030_v55 = vmul.f32 %v3286_v28, %v4739_v61  ;;  %v4777_v46 = vmul.f32 %v3288_v43, %v4739_v61  ;;  %v3294_v43 = vld [vmem:[%s4411_s6 + $0x70] sm:$0xff]  ;;  %v6526_v61 = vrot.slane %v4717_v41, 1 }
  0xfb   : > { %v1462_v38 = vadd.f32 %v1448_v59, %v1402_v4  ;;  %v4767_v59 = vmul.f32 %v3270_v30, %v4729_v42  ;;  %v6519_v4 = vrot.slane %v4624_v25, 2  ;;  %v3278_v30 = vld [vmem:[%s4411_s6 + $0x60] sm:$0xc0]  ;;  %v4783_v24 = vrot.slane %v6446_v8, %v4406_v52  ;;  %v3322_v54 = vld [vmem:[%s4411_s6 + $0x90] sm:$0x80] }
  0xfc   : > { %6521 = vst [vmem:[#allocation92_spill] sm:$0xff] %v4777_v46  ;;  %v674_v6 = vadd.f32 %v656_v18, %v614_v3  ;;  %v4793_v18 = vmul.f32 %v3375_v17, %v4743_v27  ;;  %v4798_v3 = vrot.slane %v6446_v8, %v4409_v53  ;;  %v3324_v25 = vld [vmem:[%s4411_s6 + $0xa0] sm:$0x7f]  ;;  %v1839_v42 = vsel %vm399_vm3, %v1837_v32, %v6526_v61  ;;  %v3306_v32 = vld [vmem:[%s4411_s6 + $0x70] sm:$0xfc] }
  0xfd   : > { %6518 = vst [vmem:[#allocation90_spill] sm:$0xff] %v4767_v59  ;;  %v1533_v13 = vadd.f32 %v6519_v4, %v1462_v38  ;;  %6522 = vst [vmem:[#allocation93_spill] sm:$0xff] %v4783_v24  ;;  %v4787_v38 = vrot.slane %v6445_v10, %v4403_v51  ;;  %v6524_v4 = vrot.slane %v4627_v44, 3  ;;  %v3298_v44 = vld [vmem:[%s4411_s6 + $0x70] sm:$0xfe]  ;;  %v4812_v17 = vrot.slane %v6446_v8, %v4435_v63 }
  0xfe   : > { %6525 = vst [vmem:[#allocation95_spill] sm:$0xff] %v4793_v18  ;;  %v6529_v27 = vrot.slane %v4666_v11, 4  ;;  %v998_v47 = vmul.f32 %v3278_v30, %v4773_v5  ;;  %v1046_v41 = vrot.slane %v1030_v55, 1  ;;  %v6329_v61 = vrot.slane %v4777_v46, 1  ;;  %v3334_v8 = vld [vmem:[%s4411_s6 + $0xa0] sm:$0xfe] }
  0xff   : > { %6523 = vst [vmem:[#allocation94_spill] sm:$0xff] %v4787_v38  ;;  %v1635_v9 = vadd.f32 %v6524_v4, %v1533_v13  ;;  %v6527_v13 = vrot.slane %v4725_v0, 2  ;;  %6528 = vst [vmem:[#allocation96_spill] sm:$0xff] %v4812_v17  ;;  %v6530_v0 = vrot.slane %v4748_v14, 3  ;;  %v1421_v28 = vmul.f32 %v3322_v54, %v4787_v38  ;;  %v429_v5 = vld [vmem:[%s4411_s6 + $0x18] sm:$0xff] }
 0x100   : > { %v4830_v55 = vmul.f32 %v3383_v34, %v4754_v45  ;;  %v4833_v30 = vmul.f32 %v3298_v44, %v4798_v3  ;;  %v6533_v54 = vrot.slane %v4767_v59, 4  ;;  %v4848_v34 = vrot.slane %v6445_v10, %v4406_v52 }
 0x101   : > { %v745_v4 = vadd.f32 %v6527_v13, %v674_v6  ;;  %v1757_v2 = vadd.f32 %v6529_v27, %v1635_v9  ;;  %v4822_v13 = vmul.f32 %v3294_v43, %v4783_v24  ;;  %v4826_v27 = vmul.f32 %v3324_v25, %v4787_v38  ;;  %v3330_v43 = vld [vmem:[%s4411_s6 + $0xa0] sm:$0xff] }
 0x102   : > { %6531 = vst [vmem:[#allocation97_spill] sm:$0xff] %v4830_v55  ;;  %v4843_v25 = vmul.f32 %v3306_v32, %v4812_v17  ;;  %6534 = vst [vmem:[#allocation99_spill] sm:$0xff] %v4848_v34  ;;  %v3342_v32 = vld [vmem:[%s4411_s6 + $0xa0] sm:$0xfc]  ;;  %v6537_v38 = vrot.slane %v4734_v29, 2  ;;  %v6539_v17 = vrot.slane %v4793_v18, 3 }
 0x103   : > { %v847_v6 = vadd.f32 %v6530_v0, %v745_v4  ;;  %v1793_v9 = vadd.f32 %v4669_v1, %v1757_v2  ;;  %v4837_v0 = vrot.slane %v6445_v10, %v4400_v50  ;;  %v3314_v2 = vld [vmem:[%s4411_s6 + $0x90] sm:$0xc0]  ;;  %v1048_v1 = vsel %vm399_vm3, %v1046_v41, %v6329_v61  ;;  %v368_v61 = vld [vmem:[%s4411_s6 + $0x8] sm:$0x80] }
 0x104   : > { %v4880_v41 = vrot.slane %v6444_v12, %v4400_v50 }
 0x105   : > { %6532 = vst [vmem:[#allocation98_spill] sm:$0xff] %v4837_v0  ;;  %v970_v4 = vadd.f32 %v6533_v54, %v847_v6  ;;  %v1853_v44 = vadd.f32 %v1839_v42, %v1793_v9  ;;  %v4857_v6 = vrot.slane %v6445_v10, %v4409_v53  ;;  %v4862_v54 = vrot.slane %v6445_v10, %v4435_v63  ;;  %v370_v10 = vld [vmem:[%s4411_s6 + $0x18] sm:$0x7f] }
 0x106   : > { %v6343_v42 = vrot.slane %v4822_v13, 2  ;;  %v1437_v9 = vrot.slane %v1421_v28, 1  ;;  %v1389_v59 = vmul.f32 %v3314_v2, %v4837_v0  ;;  %v4876_v28 = vmul.f32 %v3330_v43, %v4848_v34  ;;  %6538 = vst [vmem:[#allocation102_spill] sm:$0xff] %v4880_v41 }
 0x107   : > { %6535 = vst [vmem:[#allocation100_spill] sm:$0xff] %v4857_v6  ;;  %6536 = vst [vmem:[#allocation101_spill] sm:$0xff] %v4862_v54  ;;  %v1006_v11 = vadd.f32 %v998_v47, %v970_v4  ;;  %v1889_v24 = vadd.f32 %v6537_v38, %v1853_v44  ;;  %v336_v38 = vld [vmem:[%s4411_s6 + $0x8] sm:$0xc0]  ;;  %v465_v44 = vld [vmem:[%s4411_s6 + $0x18] sm:$0xfe]  ;;  %v4887_v46 = vmul.f32 %v3334_v8, %v4857_v6 }
 0x108   : > { %v384_v43 = vmul.f32 %v4422_v58, %v368_v61  ;;  %v6540_v4 = vrot.slane %v4826_v27, 1  ;;  %v4899_v34 = vmul.f32 %v4422_v58, %v370_v10  ;;  %v4902_v8 = vmul.f32 %v4427_v60, %v429_v5 }
 0x109   : > { %v1066_v47 = vadd.f32 %v1048_v1, %v1006_v11  ;;  %v1949_v2 = vadd.f32 %v6539_v17, %v1889_v24  ;;  %v4890_v11 = vmul.f32 %v3342_v32, %v4862_v54  ;;  %v526_v24 = vld [vmem:[%s4411_s6 + $0x18] sm:$0xfc]  ;;  %v6542_v17 = vrot.slane %v4830_v55, 4 }
 0x10a   : > { %v1439_v29 = vsel %vm399_vm3, %v1437_v9, %v6540_v4  ;;  %6541 = vst [vmem:[#allocation103_spill] sm:$0xff] %v4899_v34  ;;  %v352_v61 = vmul.f32 %v4418_v57, %v336_v38  ;;  %v403_v18 = vrot.slane %v384_v43, 1  ;;  %v3253_v9 = vld [vmem:[%s4411_s6 + $0x48] sm:$0x7f]  ;;  %v6544_v4 = vrot.slane %v4833_v30, 3 }
 0x10b   : > { %v1137_v1 = vadd.f32 %v6343_v42, %v1066_v47  ;;  %v2009_v32 = vadd.f32 %v6542_v17, %v1949_v2  ;;  %v4909_v47 = vmul.f32 %v4432_v62, %v465_v44  ;;  %v3251_v42 = vld [vmem:[%s4411_s6 + $0x38] sm:$0x80]  ;;  %v4918_v60 = vrot.slane %v6444_v12, %v4403_v51  ;;  %v3358_v2 = vld [vmem:[%s4411_s6 + $0xc0] sm:$0x80]  ;;  %v3360_v43 = vld [vmem:[%s4411_s6 + $0xd0] sm:$0x7f] }
 0x10c   : > { %v6350_v5 = vrot.slane %v4899_v34, 1  ;;  %v4936_v44 = vmul.f32 %v3253_v9, %v4447_v20  ;;  %v4940_v17 = vrot.slane %v6444_v12, %v4406_v52  ;;  %v3350_v34 = vld [vmem:[%s4411_s6 + $0xc0] sm:$0xc0]  ;;  %v3243_v9 = vld [vmem:[%s4411_s6 + $0x38] sm:$0xc0] }
 0x10d   : > { %6543 = vst [vmem:[#allocation104_spill] sm:$0xff] %v4909_v47  ;;  %v1239_v10 = vadd.f32 %v6544_v4, %v1137_v1  ;;  %6545 = vst [vmem:[#allocation105_spill] sm:$0xff] %v4918_v60  ;;  %v2055_v38 = vadd.f32 %v4758_v22, %v2009_v32  ;;  %v4927_v1 = vmul.f32 %v4455_v23, %v526_v24  ;;  %v6547_v4 = vrot.slane %v4843_v25, 4  ;;  %v3263_v52 = vld [vmem:[%s4411_s6 + $0x48] sm:$0xfe] }
 0x10e   : > { %v405_v55 = vsel %vm399_vm3, %v403_v18, %v6350_v5  ;;  %v639_v32 = vmul.f32 %v3251_v42, %v4447_v20  ;;  %6548 = vst [vmem:[#allocation107_spill] sm:$0xff] %v4936_v44  ;;  %6549 = vst [vmem:[#allocation108_spill] sm:$0xff] %v4940_v17  ;;  %v1812_v18 = vmul.f32 %v3358_v2, %v4918_v60  ;;  %v3370_v5 = vld [vmem:[%s4411_s6 + $0xd0] sm:$0xfe] }
 0x10f   : > { %6546 = vst [vmem:[#allocation106_spill] sm:$0xff] %v4927_v1  ;;  %v1361_v58 = vadd.f32 %v6547_v4, %v1239_v10  ;;  %v2063_v51 = vmax.f32 %v2055_v38, 0.0  ;;  %v421_v24 = vadd.f32 %v405_v55, %v352_v61  ;;  %v3259_v10 = vld [vmem:[%s4411_s6 + $0x48] sm:$0xff]  ;;  %v4947_v42 = vmul.f32 %v3360_v43, %v4918_v60  ;;  %v3366_v55 = vld [vmem:[%s4411_s6 + $0xd0] sm:$0xff] }
 0x110   : > { %v4951_v20 = vrot.slane %v6444_v12, %v4409_v53  ;;  %v4959_v61 = vrot.slane %v6444_v12, %v4435_v63  ;;  %v657_v23 = vrot.slane %v639_v32, 1  ;;  %v6554_v32 = vrot.slane %v4909_v47, 3  ;;  %v3271_v53 = vld [vmem:[%s4411_s6 + $0x48] sm:$0xfc] }
 0x111   : > { %v1397_v4 = vadd.f32 %v1389_v59, %v1361_v58  ;;  %v4954_v38 = vrot.slane %v2063_v51, 7  ;;  %v6552_v59 = vrot.slane %v4902_v8, 2  ;;  %v4967_v51 = vmul.f32 %v3259_v10, %v4478_v36 }
 0x112   : > { %6550 = vst [vmem:[#allocation109_spill] sm:$0xff] %v4951_v20  ;;  %v6555_v36 = vrot.slane %v4876_v28, 2  ;;  %v1828_v2 = vrot.slane %v1812_v18, 1  ;;  %v4983_v12 = vmul.f32 %v3366_v55, %v4940_v17  ;;  %v4988_v60 = vmul.f32 %v3370_v5, %v4951_v20 }
 0x113   : > { %6551 = vst [vmem:[#allocation110_spill] sm:$0xff] %v4954_v38  ;;  %v457_v58 = vadd.f32 %v6552_v59, %v421_v24  ;;  %v1457_v43 = vadd.f32 %v1439_v29, %v1397_v4  ;;  %6553 = vst [vmem:[#allocation111_spill] sm:$0xff] %v4967_v51  ;;  %2097 = vrot.lane.b32.xlu1 %v4954_v38, %s3990_s24  ;;  %v1780_v24 = vmul.f32 %v3350_v34, %v4880_v41  ;;  %v3378_v29 = vld [vmem:[%s4411_s6 + $0xd0] sm:$0xfc]  ;;  %v3287_v38 = vld [vmem:[%s4411_s6 + $0x68] sm:$0x80] }
 0x114   : > { %v607_v59 = vmul.f32 %v3243_v9, %v4474_v35  ;;  %6556 = vst [vmem:[#allocation112_spill] sm:$0xff] %v4983_v12  ;;  %v3289_v34 = vld [vmem:[%s4411_s6 + $0x78] sm:$0x7f]  ;;  %v4992_v9 = vrot.slane %v6443_v15, %v4400_v50  ;;  %v4997_v18 = vmul.f32 %v3263_v52, %v4484_v39  ;;  %v6560_v55 = vrot.slane %v4887_v46, 3  ;;  %v3279_v52 = vld [vmem:[%s4411_s6 + $0x68] sm:$0xc0] }
 0x115   : > { %v518_v4 = vadd.f32 %v6554_v32, %v457_v58  ;;  %v1528_v10 = vadd.f32 %v6555_v36, %v1457_v43  ;;  %v6558_v58 = vrot.slane %v4927_v1, 4  ;;  %v3295_v32 = vld [vmem:[%s4411_s6 + $0x78] sm:$0xff]  ;;  %v5003_v63 = vmul.f32 %v3378_v29, %v4959_v61  ;;  %v6593_v39 = vld [vmem:[#allocation71_spill] sm:$0xff] }
 0x116   : > { %6557 = vst [vmem:[#allocation113_spill] sm:$0xff] %v4992_v9  ;;  %6559 = vst [vmem:[#allocation114_spill] sm:$0xff] %v4997_v18  ;;  %v6561_v5 = vrot.slane %v4936_v44, 1  ;;  %v3299_v50 = vld [vmem:[%s4411_s6 + $0x78] sm:$0xfe] }
 0x117   : > { %v579_v43 = vadd.f32 %v6558_v58, %v518_v4  ;;  %v1630_v36 = vadd.f32 %v6560_v55, %v1528_v10  ;;  %v5011_v4 = vmul.f32 %v3271_v53, %v4505_v56  ;;  %v1031_v58 = vmul.f32 %v3287_v38, %v4488_v40  ;;  %v3307_v29 = vld [vmem:[%s4411_s6 + $0x78] sm:$0xfc] }
 0x118   : > { %v659_v17 = vsel %vm399_vm3, %v657_v23, %v6561_v5  ;;  %v5016_v10 = vmul.f32 %v3289_v34, %v4488_v40  ;;  %v6564_v55 = vrot.slane %v4890_v11, 4  ;;  %v6565_v5 = vrot.slane %v4947_v42, 1  ;;  %v3325_v40 = vld [vmem:[%s4411_s6 + $0xa8] sm:$0x7f]  ;;  %v3361_v56 = vld [vmem:[%s4411_s6 + $0xd8] sm:$0x7f] }
 0x119   : > { %v615_v35 = vadd.f32 %v607_v59, %v579_v43  ;;  %6562 = vst [vmem:[#allocation115_spill] sm:$0xff] %v5011_v4  ;;  %v5026_v43 = vmul.f32 %v3295_v32, %v4514_v19  ;;  %v5031_v15 = vmul.f32 %v3299_v50, %v4518_v21  ;;  %v999_v19 = vmul.f32 %v3279_v52, %v4546_v48  ;;  %v3343_v21 = vld [vmem:[%s4411_s6 + $0xa8] sm:$0xfc] }
 0x11a   : > { %6563 = vst [vmem:[#allocation116_spill] sm:$0xff] %v5016_v10  ;;  %v1752_v23 = vadd.f32 %v6564_v55, %v1630_v36  ;;  %v1830_v59 = vsel %vm399_vm3, %v1828_v2, %v6565_v5  ;;  %v3315_v36 = vld [vmem:[%s4411_s6 + $0x98] sm:$0xc0]  ;;  %v337_v55 = vld [vmem:[%s4411_s6 + $0x10] sm:$0x3f]  ;;  %v5038_v32 = vmul.f32 %v3307_v29, %v4536_v37  ;;  %v1049_v53 = vrot.slane %v1031_v58, 1 }
 0x11b   : > { %6566 = vst [vmem:[#allocation117_spill] sm:$0xff] %v5026_v43  ;;  %v675_v38 = vadd.f32 %v659_v17, %v615_v35  ;;  %6567 = vst [vmem:[#allocation118_spill] sm:$0xff] %v5031_v15  ;;  %v3323_v5 = vld [vmem:[%s4411_s6 + $0x98] sm:$0x80]  ;;  %v6569_v35 = vrot.slane %v4967_v51, 2  ;;  %v5049_v52 = vmul.f32 %v3315_v36, %v4567_v16  ;;  %v3331_v29 = vld [vmem:[%s4411_s6 + $0xa8] sm:$0xff]  ;;  %v353_v37 = vmul.f32 %v4602_v26, %v337_v55 }
 0x11c   : > { %v1788_v44 = vadd.f32 %v1780_v24, %v1752_v23  ;;  %6568 = vst [vmem:[#allocation119_spill] sm:$0xff] %v5038_v32  ;;  %v466_v24 = vld [vmem:[%s4411_s6 + $0x20] sm:$0x1]  ;;  %v1422_v34 = vmul.f32 %v3323_v5, %v4529_v31  ;;  %v6572_v36 = vrot.slane %v4983_v12, 2  ;;  %v6573_v50 = vrot.slane %v4644_v7, 1 }
 0x11d   : > { %v746_v17 = vadd.f32 %v6569_v35, %v675_v38  ;;  %v527_v51 = vld [vmem:[%s4411_s6 + $0x20] sm:$0x3]  ;;  %v6570_v38 = vrot.slane %v4997_v18, 3  ;;  %v6575_v5 = vrot.slane %v5016_v10, 1  ;;  %v5079_v55 = vld [vmem:[%s4411_s6 + $0x50] sm:$0x1] }
 0x11e   : > { %v1848_v23 = vadd.f32 %v1830_v59, %v1788_v44  ;;  %v5059_v44 = vmul.f32 %v3325_v40, %v4529_v31  ;;  %v3335_v59 = vld [vmem:[%s4411_s6 + $0xa8] sm:$0xfe]  ;;  %v422_v16 = vadd.f32 %v6573_v50, %v353_v37  ;;  %v6580_v37 = vrot.slane %v4988_v60, 3  ;;  %v6581_v50 = vld [vmem:[#allocation64_spill] sm:$0xff]  ;;  %v3272_v12 = vld [vmem:[%s4411_s6 + $0x50] sm:$0x3] }
 0x11f   : > { %v848_v35 = vadd.f32 %v6570_v38, %v746_v17  ;;  %v482_v17 = vmul.f32 %v4635_v49, %v466_v24  ;;  %v6574_v38 = vrot.slane %v5011_v4, 4  ;;  %v1051_v31 = vsel %vm399_vm3, %v1049_v53, %v6575_v5  ;;  %v6576_v40 = vld [vmem:[#allocation63_spill] sm:$0xff]  ;;  %v3244_v5 = vld [vmem:[%s4411_s6 + $0x40] sm:$0x3f] }
 0x120   : > { %6571 = vst [vmem:[#allocation120_spill] sm:$0xff] %v5059_v44  ;;  %v1884_v2 = vadd.f32 %v6572_v36, %v1848_v23  ;;  %v5074_v18 = vmul.f32 %v3331_v29, %v6576_v40  ;;  %v6578_v23 = vld [vmem:[#allocation73_spill] sm:$0xff]  ;;  %v5084_v24 = vmul.f32 %v3335_v59, %v6581_v50  ;;  %v1440_v4 = vrot.slane %v1422_v34, 1 }
 0x121   : > { %v971_v58 = vadd.f32 %v6574_v38, %v848_v35  ;;  %v543_v36 = vmul.f32 %v6578_v23, %v527_v51  ;;  %6579 = vst [vmem:[#allocation73_spill] sm:$0xff] %v5079_v55  ;;  %v3359_v35 = vld [vmem:[%s4411_s6 + $0xc8] sm:$0x80]  ;;  %v6583_v38 = vld [vmem:[#allocation72_spill] sm:$0xff]  ;;  %v499_v29 = vrot.slane %v482_v17, 3  ;;  %v6586_v59 = vld [vmem:[#allocation65_spill] sm:$0xff] }
 0x122   : > { %6577 = vst [vmem:[#allocation63_spill] sm:$0xff] %v5074_v18  ;;  %v1944_v7 = vadd.f32 %v6580_v37, %v1884_v2  ;;  %6582 = vst [vmem:[#allocation121_spill] sm:$0xff] %v5084_v24  ;;  %v6584_v10 = vrot.slane %v6583_v38, 2  ;;  %v6585_v2 = vrot.slane %v5003_v63, 4  ;;  %v5095_v50 = vmul.f32 %v3343_v21, %v6586_v59  ;;  %v3367_v17 = vld [vmem:[%s4411_s6 + $0xd8] sm:$0xff] }
 0x123   : > { %v1007_v40 = vadd.f32 %v999_v19, %v971_v58  ;;  %v560_v48 = vrot.slane %v543_v36, 4  ;;  %v6588_v38 = vrot.slane %v4652_v33, 3  ;;  %v3351_v58 = vld [vmem:[%s4411_s6 + $0xc8] sm:$0xc0]  ;;  %v6590_v51 = vld [vmem:[#allocation76_spill] sm:$0xff] }
 0x124   : > { %v458_v53 = vadd.f32 %v6584_v10, %v422_v16  ;;  %v2004_v37 = vadd.f32 %v6585_v2, %v1944_v7  ;;  %6587 = vst [vmem:[#allocation72_spill] sm:$0xff] %v5095_v50  ;;  %v6589_v10 = vld [vmem:[#allocation81_spill] sm:$0xff]  ;;  %v6591_v1 = vrot.slane %v6590_v51, 4  ;;  %v6592_v2 = vld [vmem:[#allocation78_spill] sm:$0xff]  ;;  %v6605_v51 = vrot.slane %v5038_v32, 4 }
 0x125   : > { %v500_v16 = vsel %vm496_vm4, %v6588_v38, %v499_v29  ;;  %v813_v19 = vmul.f32 %v5079_v55, %v6589_v10  ;;  %v1067_v34 = vadd.f32 %v1051_v31, %v1007_v40  ;;  %v608_v21 = vmul.f32 %v3244_v5, %v6592_v2  ;;  %v3371_v38 = vld [vmem:[%s4411_s6 + $0xd8] sm:$0xfe] }
 0x126   : > { %v519_v36 = vadd.f32 %v500_v16, %v458_v53  ;;  %v561_v7 = vsel %vm557_vm5, %v6591_v1, %v560_v48  ;;  %v2050_v59 = vadd.f32 %v4992_v9, %v2004_v37  ;;  %v5112_v29 = vmul.f32 %v3359_v35, %v6593_v39  ;;  %v6594_v31 = vld [vmem:[#allocation84_spill] sm:$0xff]  ;;  %v6597_v37 = vld [vmem:[#allocation66_spill] sm:$0xff]  ;;  %v3379_v9 = vld [vmem:[%s4411_s6 + $0xd8] sm:$0xfc] }
 0x127   : > { %v936_v40 = vmul.f32 %v3272_v12, %v6594_v31  ;;  %v6595_v53 = vrot.slane %v5026_v43, 2  ;;  %v5120_v48 = vmul.f32 %v3361_v56, %v6593_v39  ;;  %v5123_v33 = vmul.f32 %v3351_v58, %v6597_v37  ;;  %v6598_v35 = vld [vmem:[#allocation80_spill] sm:$0xff]  ;;  %v6602_v56 = vld [vmem:[#allocation87_spill] sm:$0xff]  ;;  %v3300_v58 = vld [vmem:[%s4411_s6 + $0x80] sm:$0x1] }
 0x128   : > { %v580_v1 = vadd.f32 %v561_v7, %v519_v36  ;;  %v2058_v5 = vmax.f32 %v2050_v59, 0.0  ;;  %v5126_v55 = vmul.f32 %v3367_v17, %v6598_v35  ;;  %v829_v47 = vrot.slane %v813_v19, 3  ;;  %v371_v7 = vld [vmem:[%s4411_s6 + $0x240] sm:$0x80] }
 0x129   : > { %v1138_v16 = vadd.f32 %v6595_v53, %v1067_v34  ;;  %6596 = vst [vmem:[#allocation81_spill] sm:$0xff] %v5120_v48  ;;  %v6600_v12 = vrot.slane %v5031_v15, 3  ;;  %v6601_v53 = vrot.slane %v5059_v44, 1  ;;  %v5135_v36 = vmul.f32 %v3371_v38, %v6602_v56  ;;  %v6607_v38 = vld [vmem:[#allocation77_spill] sm:$0xff]  ;;  %v430_v44 = vld [vmem:[%s4411_s6 + $0x250] sm:$0xff]  ;;  %v6614_v15 = vld [vmem:[#allocation90_spill] sm:$0xff] }
 0x12a   : > { %6599 = vst [vmem:[#allocation76_spill] sm:$0xff] %v5126_v55  ;;  %v616_v59 = vadd.f32 %v608_v21, %v580_v1  ;;  %v5139_v17 = vrot.slane %v2058_v5, 7  ;;  %v1831_v35 = vrot.slane %v5112_v29, 1  ;;  %v5148_v21 = vmul.f32 %v3379_v9, %v4754_v45  ;;  %v339_v19 = vld [vmem:[%s4411_s6 + $0x240] sm:$0xc0]  ;;  %v6610_v9 = vld [vmem:[#allocation67_spill] sm:$0xff] }
 0x12b   : > { %v1240_v34 = vadd.f32 %v6600_v12, %v1138_v16  ;;  %v1442_v39 = vsel %vm399_vm3, %v1440_v4, %v6601_v53  ;;  %6603 = vst [vmem:[#allocation78_spill] sm:$0xff] %v5135_v36  ;;  %v952_v16 = vrot.slane %v936_v40, 4  ;;  %v3280_v12 = vld [vmem:[%s4411_s6 + $0x70] sm:$0x3f]  ;;  %v6608_v1 = vrot.slane %v6607_v38, 1 }
 0x12c   : > { %6604 = vst [vmem:[#allocation71_spill] sm:$0xff] %v5139_v17  ;;  %6606 = vst [vmem:[#allocation84_spill] sm:$0xff] %v5148_v21  ;;  %v373_v53 = vld [vmem:[%s4411_s6 + $0x250] sm:$0x7f]  ;;  %2087 = vrot.lane.b32.xlu0 %v5139_v17, %s3990_s24  ;;  %v6609_v40 = vrot.slane %v4748_v14, 3  ;;  %v387_v4 = vmul.f32 %v6610_v9, %v371_v7 }
 0x12d   : > { %v1362_v37 = vadd.f32 %v6605_v51, %v1240_v34  ;;  %v676_v5 = vadd.f32 %v6608_v1, %v616_v59  ;;  %v1205_v34 = vmul.f32 %v3300_v58, %v4798_v3  ;;  %v468_v38 = vld [vmem:[%s4411_s6 + $0x250] sm:$0xfe]  ;;  %v3308_v14 = vld [vmem:[%s4411_s6 + $0x80] sm:$0x3] }
 0x12e   : > { %v830_v51 = vsel %vm496_vm4, %v6609_v40, %v829_v47  ;;  %v6611_v45 = vld [vmem:[#allocation83_spill] sm:$0xff]  ;;  %v6615_v47 = vrot.slane %v6614_v15, 4  ;;  %v5174_v40 = vmul.f32 %v6610_v9, %v373_v53  ;;  %v406_v7 = vrot.slane %v387_v4, 1  ;;  %v6616_v17 = vld [vmem:[#allocation68_spill] sm:$0xff] }
 0x12f   : > { %v1398_v59 = vadd.f32 %v5049_v52, %v1362_v37  ;;  %v6612_v56 = vrot.slane %v6611_v45, 2  ;;  %v6613_v29 = vld [vmem:[#allocation91_spill] sm:$0xff]  ;;  %v5177_v52 = vmul.f32 %v6616_v17, %v430_v44  ;;  %v529_v37 = vld [vmem:[%s4411_s6 + $0x250] sm:$0xfc]  ;;  %v1221_v4 = vrot.slane %v1205_v34, 3 }
 0x130   : > { %v1000_v43 = vmul.f32 %v3280_v12, %v6613_v29  ;;  %v953_v58 = vsel %vm557_vm5, %v6615_v47, %v952_v16  ;;  %v5182_v12 = vmul.f32 %v4635_v49, %v468_v38  ;;  %v5185_v15 = vld [vmem:[%s4411_s6 + $0x270] sm:$0x80]  ;;  %v5188_v16 = vld [vmem:[%s4411_s6 + $0x280] sm:$0x7f]  ;;  %v6396_v44 = vrot.slane %v5174_v40, 1 }
 0x131   : > { %v747_v32 = vadd.f32 %v6612_v56, %v676_v5  ;;  %v1458_v1 = vadd.f32 %v1442_v39, %v1398_v59  ;;  %v355_v56 = vmul.f32 %v4602_v26, %v339_v19  ;;  %6617 = vst [vmem:[#allocation80_spill] sm:$0xff] %v5185_v15  ;;  %6618 = vst [vmem:[#allocation77_spill] sm:$0xff] %v5188_v16  ;;  %v6619_v53 = vld [vmem:[#allocation96_spill] sm:$0xff]  ;;  %v6620_v39 = vrot.slane %v5074_v18, 2  ;;  %v3316_v19 = vld [vmem:[%s4411_s6 + $0xa0] sm:$0x3f] }
 0x132   : > { %v1327_v9 = vmul.f32 %v3308_v14, %v6619_v53  ;;  %v5199_v59 = vmul.f32 %v6578_v23, %v529_v37  ;;  %v6621_v47 = vrot.slane %v5120_v48, 1  ;;  %v408_v14 = vsel %vm399_vm3, %v406_v7, %v6396_v44  ;;  %v6622_v5 = vld [vmem:[#allocation74_spill] sm:$0xff]  ;;  %v3344_v38 = vld [vmem:[%s4411_s6 + $0xb0] sm:$0x3] }
 0x133   : > { %v849_v45 = vadd.f32 %v830_v51, %v747_v32  ;;  %v1529_v32 = vadd.f32 %v6620_v39, %v1458_v1  ;;  %v3336_v51 = vld [vmem:[%s4411_s6 + $0xb0] sm:$0x1]  ;;  %v642_v1 = vmul.f32 %v5185_v15, %v6622_v5  ;;  %v6623_v37 = vrot.slane %v5084_v24, 3 }
 0x134   : > { %v1833_v34 = vsel %vm399_vm3, %v1831_v35, %v6621_v47  ;;  %v424_v48 = vadd.f32 %v408_v14, %v355_v56  ;;  %v5218_v47 = vld [vmem:[%s4411_s6 + $0x280] sm:$0xff]  ;;  %v6625_v7 = vrot.slane %v4833_v30, 3  ;;  %v1343_v15 = vrot.slane %v1327_v9, 4  ;;  %v6627_v56 = vld [vmem:[#allocation92_spill] sm:$0xff] }
 0x135   : > { %v972_v17 = vadd.f32 %v953_v58, %v849_v45  ;;  %v5211_v58 = vmul.f32 %v5188_v16, %v6622_v5  ;;  %v1631_v45 = vadd.f32 %v6623_v37, %v1529_v32  ;;  %6624 = vst [vmem:[#allocation67_spill] sm:$0xff] %v5218_v47  ;;  %v1391_v18 = vmul.f32 %v3316_v19, %v4837_v0  ;;  %v3246_v16 = vld [vmem:[%s4411_s6 + $0x270] sm:$0xc0]  ;;  %v3352_v37 = vld [vmem:[%s4411_s6 + $0xd0] sm:$0x3f] }
 0x136   : > { %v1222_v44 = vsel %vm496_vm4, %v6625_v7, %v1221_v4  ;;  %v1596_v5 = vmul.f32 %v3336_v51, %v4857_v6  ;;  %v3372_v35 = vld [vmem:[%s4411_s6 + $0xe0] sm:$0x1]  ;;  %v6629_v30 = vrot.slane %v5177_v52, 2  ;;  %v1718_v9 = vmul.f32 %v3344_v38, %v4862_v54  ;;  %v6630_v7 = vld [vmem:[#allocation79_spill] sm:$0xff] }
 0x137   : > { %v1008_v39 = vadd.f32 %v1000_v43, %v972_v17  ;;  %v6626_v43 = vrot.slane %v5095_v50, 4  ;;  %v6628_v17 = vrot.slane %v6627_v56, 1  ;;  %v660_v19 = vrot.slane %v642_v1, 1  ;;  %v3380_v56 = vld [vmem:[%s4411_s6 + $0xe0] sm:$0x3] }
 0x138   : > { %v460_v24 = vadd.f32 %v6629_v30, %v424_v48  ;;  %v5239_v50 = vmul.f32 %v5218_v47, %v6630_v7  ;;  %v6632_v48 = vrot.slane %v4822_v13, 2  ;;  %v610_v1 = vmul.f32 %v3246_v16, %v6592_v2  ;;  %v5269_v16 = vld [vmem:[%s4411_s6 + $0x2b0] sm:$0x7f] }
 0x139   : > { %v1753_v32 = vadd.f32 %v6626_v43, %v1631_v45  ;;  %v1068_v14 = vadd.f32 %v6628_v17, %v1008_v39  ;;  %v5242_v45 = vld [vmem:[%s4411_s6 + $0x280] sm:$0xfe]  ;;  %v6633_v17 = vrot.slane %v5182_v12, 3  ;;  %v6634_v30 = vrot.slane %v4843_v25, 4  ;;  %6637 = vst [vmem:[#allocation90_spill] sm:$0xff] %v5269_v16 }
 0x13a   : > { %6631 = vst [vmem:[#allocation83_spill] sm:$0xff] %v5242_v45  ;;  %v1612_v51 = vrot.slane %v1596_v5, 3  ;;  %v5255_v4 = vmul.f32 %v3352_v37, %v4880_v41  ;;  %v1910_v47 = vmul.f32 %v3372_v35, %v4951_v20  ;;  %v5263_v25 = vmul.f32 %v5242_v45, %v6589_v10 }
 0x13b   : > { %v1789_v39 = vadd.f32 %v5123_v33, %v1753_v32  ;;  %v1139_v43 = vadd.f32 %v6632_v48, %v1068_v14  ;;  %v521_v38 = vadd.f32 %v6633_v17, %v460_v24  ;;  %v1344_v7 = vsel %vm557_vm5, %v6634_v30, %v1343_v15  ;;  %v3274_v33 = vld [vmem:[%s4411_s6 + $0x280] sm:$0xfc]  ;;  %v5282_v30 = vld [vmem:[%s4411_s6 + $0x2b0] sm:$0xff] }
 0x13c   : > { %v6635_v24 = vrot.slane %v5199_v59, 4  ;;  %v5266_v15 = vld [vmem:[%s4411_s6 + $0x2a0] sm:$0x80]  ;;  %v1734_v5 = vrot.slane %v1718_v9, 4  ;;  %v1970_v35 = vmul.f32 %v3380_v56, %v4959_v61  ;;  %v6638_v37 = vrot.slane %v5211_v58, 1  ;;  %6640 = vst [vmem:[#allocation68_spill] sm:$0xff] %v5282_v30 }
 0x13d   : > { %v1849_v13 = vadd.f32 %v1833_v34, %v1789_v39  ;;  %v1241_v32 = vadd.f32 %v1222_v44, %v1139_v43  ;;  %6636 = vst [vmem:[#allocation91_spill] sm:$0xff] %v5266_v15  ;;  %v6639_v39 = vrot.slane %v5126_v55, 2  ;;  %v5285_v9 = vld [vmem:[%s4411_s6 + $0x2b0] sm:$0xfe]  ;;  %v6643_v44 = vld [vmem:[#allocation86_spill] sm:$0xff]  ;;  %v6645_v55 = vld [vmem:[#allocation93_spill] sm:$0xff] }
 0x13e   : > { %v582_v14 = vadd.f32 %v6635_v24, %v521_v38  ;;  %v662_v34 = vsel %vm399_vm3, %v660_v19, %v6638_v37  ;;  %v5279_v38 = vmul.f32 %v3274_v33, %v6594_v31  ;;  %6641 = vst [vmem:[#allocation96_spill] sm:$0xff] %v5285_v9  ;;  %v3310_v56 = vld [vmem:[%s4411_s6 + $0x2b0] sm:$0xfc]  ;;  %v6642_v24 = vrot.slane %v4887_v46, 3  ;;  %v3282_v46 = vld [vmem:[%s4411_s6 + $0x2a0] sm:$0xc0] }
 0x13f   : > { %v1885_v48 = vadd.f32 %v6639_v39, %v1849_v13  ;;  %v1363_v43 = vadd.f32 %v1344_v7, %v1241_v32  ;;  %v1926_v37 = vrot.slane %v1910_v47, 3  ;;  %v1034_v45 = vmul.f32 %v5266_v15, %v6643_v44 }
 0x140   : > { %v618_v17 = vadd.f32 %v610_v1, %v582_v14  ;;  %v1613_v19 = vsel %vm496_vm4, %v6642_v24, %v1612_v51  ;;  %v5295_v7 = vmul.f32 %v5269_v16, %v6643_v44  ;;  %v6644_v1 = vrot.slane %v5135_v36, 3  ;;  %v6672_v36 = vld [vmem:[#allocation106_spill] sm:$0xff] }
 0x141   : > { %v1399_v13 = vadd.f32 %v1391_v18, %v1363_v43  ;;  %v1986_v39 = vrot.slane %v1970_v35, 4  ;;  %v5303_v47 = vmul.f32 %v5282_v30, %v6645_v55  ;;  %v5307_v51 = vmul.f32 %v5285_v9, %v4798_v3  ;;  %v6661_v30 = vld [vmem:[#allocation99_spill] sm:$0xff] }
 0x142   : > { %v1945_v33 = vadd.f32 %v6644_v1, %v1885_v48  ;;  %v678_v32 = vadd.f32 %v662_v34, %v618_v17  ;;  %v5310_v44 = vmul.f32 %v3310_v56, %v6619_v53  ;;  %v6646_v18 = vrot.slane %v5148_v21, 4  ;;  %v6671_v21 = vld [vmem:[#allocation49_spill] sm:$0xff] }
 0x143   : > { %v6647_v35 = vrot.slane %v4826_v27, 1  ;;  %v6648_v43 = vrot.slane %v5239_v50, 2  ;;  %v6406_v17 = vrot.slane %v5279_v38, 4  ;;  %v6649_v24 = vrot.slane %v4890_v11, 4  ;;  %v3318_v27 = vld [vmem:[%s4411_s6 + $0x2d0] sm:$0xc0] }
 0x144   : > { %v2005_v34 = vadd.f32 %v6646_v18, %v1945_v33  ;;  %v6650_v14 = vrot.slane %v4988_v60, 3  ;;  %v1052_v9 = vrot.slane %v1034_v45, 1  ;;  %v6409_v33 = vrot.slane %v5295_v7, 1  ;;  %v338_v45 = vld [vmem:[%s4411_s6 + $0x18] sm:$0x3f] }
 0x145   : > { %v1459_v48 = vadd.f32 %v6647_v35, %v1399_v13  ;;  %v749_v55 = vadd.f32 %v6648_v43, %v678_v32  ;;  %v1735_v1 = vsel %vm557_vm5, %v6649_v24, %v1734_v5  ;;  %v6651_v32 = vrot.slane %v4876_v28, 2  ;;  %v5336_v35 = vld [vmem:[%s4411_s6 + $0x2d0] sm:$0x80] }
 0x146   : > { %v5325_v56 = vsel %vm496_vm4, %v6650_v14, %v1926_v37  ;;  %v2051_v13 = vadd.f32 %v4758_v22, %v2005_v34  ;;  %v6652_v11 = vrot.slane %v5263_v25, 3  ;;  %v1002_v60 = vmul.f32 %v3282_v46, %v6613_v29  ;;  %6653 = vst [vmem:[#allocation74_spill] sm:$0xff] %v5336_v35  ;;  %v5339_v37 = vld [vmem:[%s4411_s6 + $0x2e0] sm:$0x7f]  ;;  %v5390_v22 = vld [vmem:[%s4411_s6 + $0x58] sm:$0x1] }
 0x147   : > { %v1530_v18 = vadd.f32 %v6651_v32, %v1459_v48  ;;  %6654 = vst [vmem:[#allocation92_spill] sm:$0xff] %v5339_v37  ;;  %v6655_v14 = vrot.slane %v5003_v63, 4  ;;  %v5357_v63 = vld [vmem:[%s4411_s6 + $0x2e0] sm:$0xff]  ;;  %v1054_v43 = vsel %vm399_vm3, %v1052_v9, %v6409_v33  ;;  %6665 = vst [vmem:[#allocation99_spill] sm:$0xff] %v5390_v22 }
 0x148   : > { %v851_v5 = vadd.f32 %v6652_v11, %v749_v55  ;;  %v467_v55 = vld [vmem:[%s4411_s6 + $0x28] sm:$0x1]  ;;  %v2059_v24 = vmax.f32 %v2051_v13, 0.0  ;;  %v5354_v11 = vmul.f32 %v3318_v27, %v4837_v0  ;;  %6656 = vst [vmem:[#allocation79_spill] sm:$0xff] %v5357_v63  ;;  %v354_v27 = vmul.f32 %v4418_v57, %v338_v45  ;;  %v3362_v33 = vld [vmem:[%s4411_s6 + $0x300] sm:$0x80] }
 0x149   : > { %v5345_v34 = vsel %vm557_vm5, %v6655_v14, %v1986_v39  ;;  %v1632_v46 = vadd.f32 %v1613_v19, %v1530_v18  ;;  %v5360_v39 = vld [vmem:[%s4411_s6 + $0x2e0] sm:$0xfe]  ;;  %v528_v14 = vld [vmem:[%s4411_s6 + $0x28] sm:$0x3]  ;;  %v483_v16 = vmul.f32 %v4432_v62, %v467_v55  ;;  %v5379_v9 = vmul.f32 %v5357_v63, %v6661_v30 }
 0x14a   : > { %v974_v32 = vadd.f32 %v6406_v17, %v851_v5  ;;  %6657 = vst [vmem:[#allocation86_spill] sm:$0xff] %v5360_v39  ;;  %v6658_v48 = vld [vmem:[#allocation94_spill] sm:$0xff]  ;;  %v5374_v5 = vrot.slane %v2059_v24, 7  ;;  %v6664_v24 = vld [vmem:[#allocation45_spill] sm:$0xff] }
 0x14b   : > { %v1425_v19 = vmul.f32 %v5336_v35, %v6658_v48  ;;  %v5370_v13 = vmul.f32 %v5339_v37, %v6658_v48  ;;  %v3346_v18 = vld [vmem:[%s4411_s6 + $0x2e0] sm:$0xfc]  ;;  %v1754_v17 = vadd.f32 %v1735_v1, %v1632_v46  ;;  %v5383_v48 = vmul.f32 %v5360_v39, %v4857_v6  ;;  %v6662_v37 = vld [vmem:[#allocation103_spill] sm:$0xff] }
 0x14c   : > { %6660 = vst [vmem:[#allocation94_spill] sm:$0xff] %v5374_v5  ;;  %v1010_v28 = vadd.f32 %v1002_v60, %v974_v32  ;;  %v6663_v45 = vrot.slane %v6662_v37, 1  ;;  %v544_v15 = vmul.f32 %v6664_v24, %v528_v14  ;;  %2089 = vrot.lane.b32.xlu0 %v5374_v5, %s3990_s24  ;;  %v5396_v30 = vmul.f32 %v3346_v18, %v4862_v54  ;;  %v3245_v46 = vld [vmem:[%s4411_s6 + $0x48] sm:$0x3f]  ;;  %v3273_v32 = vld [vmem:[%s4411_s6 + $0x58] sm:$0x3] }
 0x14d   : > { %6659 = vst [vmem:[#allocation93_spill] sm:$0xff] %v5370_v13  ;;  %v1790_v1 = vadd.f32 %v5255_v4, %v1754_v17  ;;  %v501_v55 = vrot.slane %v483_v16, 3  ;;  %v1443_v39 = vrot.slane %v1425_v19, 1  ;;  %v6666_v14 = vrot.slane %v4902_v8, 2 }
 0x14e   : > { %v423_v35 = vadd.f32 %v6663_v45, %v354_v27  ;;  %v1070_v60 = vadd.f32 %v1054_v43, %v1010_v28  ;;  %v3364_v27 = vld [vmem:[%s4411_s6 + $0x310] sm:$0x7f]  ;;  %v562_v63 = vrot.slane %v544_v15, 4  ;;  %v6667_v5 = vrot.slane %v4947_v42, 1 }
 0x14f   : > { %v6668_v17 = vrot.slane %v5303_v47, 2  ;;  %v6669_v43 = vld [vmem:[#allocation104_spill] sm:$0xff]  ;;  %v814_v19 = vmul.f32 %v5390_v22, %v6671_v21  ;;  %v6673_v8 = vrot.slane %v6672_v36, 4  ;;  %v6675_v42 = vld [vmem:[#allocation51_spill] sm:$0xff] }
 0x150   : > { %v459_v45 = vadd.f32 %v6666_v14, %v423_v35  ;;  %v1850_v4 = vadd.f32 %v6667_v5, %v1790_v1  ;;  %v6670_v16 = vrot.slane %v6669_v43, 3  ;;  %v6674_v15 = vld [vmem:[#allocation48_spill] sm:$0xff]  ;;  %v937_v5 = vmul.f32 %v3273_v32, %v6675_v42  ;;  %v3354_v43 = vld [vmem:[%s4411_s6 + $0x300] sm:$0xc0] }
 0x151   : > { %v1141_v28 = vadd.f32 %v6668_v17, %v1070_v60  ;;  %v563_v35 = vsel %vm557_vm5, %v6673_v8, %v562_v63  ;;  %v609_v14 = vmul.f32 %v3245_v46, %v6674_v15  ;;  %v6676_v1 = vld [vmem:[#allocation112_spill] sm:$0xff]  ;;  %v6678_v17 = vrot.slane %v5307_v51, 3  ;;  %v470_v46 = vld [vmem:[%s4411_s6 + $0x260] sm:$0x1] }
 0x152   : > { %v502_v18 = vsel %vm496_vm4, %v6670_v16, %v501_v55  ;;  %v6677_v54 = vrot.slane %v6676_v1, 2  ;;  %v6679_v16 = vld [vmem:[#allocation105_spill] sm:$0xff]  ;;  %v3368_v63 = vld [vmem:[%s4411_s6 + $0x310] sm:$0xff]  ;;  %v831_v1 = vrot.slane %v814_v19, 3  ;;  %v6689_v19 = vld [vmem:[#allocation114_spill] sm:$0xff] }
 0x153   : > { %v520_v37 = vadd.f32 %v502_v18, %v459_v45  ;;  %v1243_v55 = vadd.f32 %v6678_v17, %v1141_v28  ;;  %v5424_v22 = vmul.f32 %v3362_v33, %v6679_v16  ;;  %v5427_v36 = vmul.f32 %v3364_v27, %v6679_v16  ;;  %v3374_v45 = vld [vmem:[%s4411_s6 + $0x310] sm:$0xfe]  ;;  %v3281_v17 = vld [vmem:[%s4411_s6 + $0x78] sm:$0x3f]  ;;  %v5442_v16 = vld [vmem:[%s4411_s6 + $0x88] sm:$0x1] }
 0x154   : > { %v1886_v60 = vadd.f32 %v6677_v54, %v1850_v4  ;;  %v6680_v33 = vrot.slane %v5310_v44, 4  ;;  %v6681_v27 = vrot.slane %v5370_v13, 1  ;;  %6682 = vst [vmem:[#allocation103_spill] sm:$0xff] %v5442_v16  ;;  %v1784_v54 = vmul.f32 %v3354_v43, %v4880_v41  ;;  %v6683_v32 = vld [vmem:[#allocation108_spill] sm:$0xff]  ;;  %v6684_v43 = vld [vmem:[#allocation107_spill] sm:$0xff] }
 0x155   : > { %v581_v4 = vadd.f32 %v563_v35, %v520_v37  ;;  %v5446_v37 = vmul.f32 %v3368_v63, %v6683_v32  ;;  %v5456_v13 = vmul.f32 %v3374_v45, %v4951_v20  ;;  %v6685_v63 = vrot.slane %v6684_v43, 1  ;;  %v5469_v45 = vld [vmem:[%s4411_s6 + $0xb8] sm:$0x1] }
 0x156   : > { %v1946_v28 = vadd.f32 %v5325_v56, %v1886_v60  ;;  %v1365_v18 = vadd.f32 %v6680_v33, %v1243_v55  ;;  %v1445_v8 = vsel %vm399_vm3, %v1443_v39, %v6681_v27  ;;  %v954_v56 = vrot.slane %v937_v5, 4  ;;  %v341_v60 = vld [vmem:[%s4411_s6 + $0x250] sm:$0x3f]  ;;  %v3309_v27 = vld [vmem:[%s4411_s6 + $0x88] sm:$0x3] }
 0x157   : > { %v617_v35 = vadd.f32 %v609_v14, %v581_v4  ;;  %v1834_v39 = vrot.slane %v5424_v22, 1  ;;  %v6686_v14 = vld [vmem:[#allocation57_spill] sm:$0xff]  ;;  %v6690_v41 = vrot.slane %v6689_v19, 3  ;;  %v357_v43 = vmul.f32 %v4602_v26, %v341_v60 }
 0x158   : > { %v2006_v55 = vadd.f32 %v5345_v34, %v1946_v28  ;;  %v1401_v33 = vadd.f32 %v5354_v11, %v1365_v18  ;;  %v1001_v5 = vmul.f32 %v3281_v17, %v6686_v14  ;;  %v6687_v4 = vld [vmem:[#allocation53_spill] sm:$0xff]  ;;  %v6693_v14 = vld [vmem:[#allocation115_spill] sm:$0xff] }
 0x159   : > { %v677_v32 = vadd.f32 %v6685_v63, %v617_v35  ;;  %v1206_v34 = vmul.f32 %v5442_v16, %v6687_v4  ;;  %v531_v11 = vld [vmem:[%s4411_s6 + $0x260] sm:$0x3]  ;;  %v832_v0 = vsel %vm496_vm4, %v6690_v41, %v831_v1  ;;  %v6691_v35 = vld [vmem:[#allocation111_spill] sm:$0xff]  ;;  %v6694_v20 = vrot.slane %v6693_v14, 4 }
 0x15a   : > { %v6688_v28 = vld [vmem:[#allocation113_spill] sm:$0xff]  ;;  %v1461_v18 = vadd.f32 %v1445_v8, %v1401_v33  ;;  %v6692_v63 = vrot.slane %v6691_v35, 2  ;;  %v6695_v4 = vld [vmem:[#allocation55_spill] sm:$0xff]  ;;  %v486_v8 = vmul.f32 %v4635_v49, %v470_v46  ;;  %v6696_v41 = vrot.slane %v5379_v9, 2 }
 0x15b   : > { %v2052_v22 = vadd.f32 %v6688_v28, %v2006_v55  ;;  %v955_v16 = vsel %vm557_vm5, %v6694_v20, %v954_v56  ;;  %v1328_v6 = vmul.f32 %v3309_v27, %v6695_v4  ;;  %v6697_v33 = vrot.slane %v5174_v40, 1  ;;  %v3248_v19 = vld [vmem:[%s4411_s6 + $0x280] sm:$0x3f]  ;;  %v6698_v56 = vld [vmem:[#allocation64_spill] sm:$0xff] }
 0x15c   : > { %v748_v17 = vadd.f32 %v6692_v63, %v677_v32  ;;  %v1532_v1 = vadd.f32 %v6696_v41, %v1461_v18  ;;  %v547_v60 = vmul.f32 %v6578_v23, %v531_v11  ;;  %v5486_v32 = vld [vmem:[%s4411_s6 + $0x290] sm:$0x1]  ;;  %v1223_v20 = vrot.slane %v1206_v34, 3  ;;  %v3382_v18 = vld [vmem:[%s4411_s6 + $0x310] sm:$0xfc] }
 0x15d   : > { %v2060_v55 = vmax.f32 %v2052_v22, 0.0  ;;  %v426_v26 = vadd.f32 %v6697_v33, %v357_v43  ;;  %v1597_v27 = vmul.f32 %v5469_v45, %v6698_v56  ;;  %v505_v49 = vrot.slane %v486_v8, 3  ;;  %v3276_v23 = vld [vmem:[%s4411_s6 + $0x290] sm:$0x3] }
 0x15e   : > { %v850_v14 = vadd.f32 %v832_v0, %v748_v17  ;;  %v6699_v22 = vrot.slane %v5383_v48, 3  ;;  %v6700_v40 = vrot.slane %v5177_v52, 2  ;;  %v566_v63 = vrot.slane %v547_v60, 4  ;;  %v6702_v8 = vld [vmem:[#allocation71_spill] sm:$0xff]  ;;  %v3345_v52 = vld [vmem:[%s4411_s6 + $0xb8] sm:$0x3] }
 0x15f   : > { %v2077_v46 = vrot.slane %v2060_v55, 7  ;;  %v6701_v41 = vrot.slane %v5182_v12, 3  ;;  %v612_v34 = vmul.f32 %v3248_v19, %v6592_v2  ;;  %v817_v17 = vmul.f32 %v5486_v32, %v6589_v10 }
 0x160   : > { %v1634_v35 = vadd.f32 %v6699_v22, %v1532_v1  ;;  %v462_v43 = vadd.f32 %v6700_v40, %v426_v26  ;;  %v973_v11 = vadd.f32 %v955_v16, %v850_v14  ;;  %v6703_v1 = vrot.slane %v5396_v30, 4  ;;  %v6706_v40 = vld [vmem:[#allocation116_spill] sm:$0xff] }
 0x161   : > { %v506_v0 = vsel %vm496_vm4, %v6701_v41, %v505_v49  ;;  %v2078_v55 = vsel %vm2074_vm6, %v6702_v8, %v2077_v46  ;;  %v6704_v60 = vrot.slane %v5199_v59, 4  ;;  %v6705_v2 = vrot.slane %v5427_v36, 1  ;;  %v6708_v41 = vld [vmem:[#allocation65_spill] sm:$0xff] }
 0x162   : > { %v1756_v33 = vadd.f32 %v6703_v1, %v1634_v35  ;;  %v523_v26 = vadd.f32 %v506_v0, %v462_v43  ;;  %2091 = vrot.lane.b32.xlu1 %v2078_v55, %s3990_s24  ;;  %v5515_v10 = vmul.f32 %v3382_v18, %v4959_v61  ;;  %v1009_v19 = vadd.f32 %v1001_v5, %v973_v11  ;;  %v6709_v5 = vld [vmem:[#allocation118_spill] sm:$0xff]  ;;  %v6711_v8 = vld [vmem:[#allocation117_spill] sm:$0xff] }
 0x163   : > { %v567_v16 = vsel %vm557_vm5, %v6704_v60, %v566_v63  ;;  %v1836_v12 = vsel %vm399_vm3, %v1834_v39, %v6705_v2  ;;  %v940_v14 = vmul.f32 %v3276_v23, %v6594_v31  ;;  %v1878_v46 = vrot.slane %v5446_v37, 2  ;;  %v6713_v60 = vld [vmem:[#allocation119_spill] sm:$0xff] }
 0x164   : > { %v1792_v49 = vadd.f32 %v1784_v54, %v1756_v33  ;;  %v1345_v59 = vrot.slane %v1328_v6, 4  ;;  %v584_v22 = vadd.f32 %v567_v16, %v523_v26  ;;  %v1930_v35 = vrot.slane %v5456_v13, 3  ;;  %v3317_v54 = vld [vmem:[%s4411_s6 + $0xa8] sm:$0x3f]  ;;  %v5530_v26 = vld [vmem:[%s4411_s6 + $0x2c0] sm:$0x1] }
 0x165   : > { %v6707_v43 = vrot.slane %v6706_v40, 1  ;;  %v1719_v39 = vmul.f32 %v3345_v52, %v6708_v41  ;;  %v835_v18 = vrot.slane %v817_v17, 3  ;;  %v6710_v11 = vrot.slane %v6709_v5, 3 }
 0x166   : > { %v1852_v0 = vadd.f32 %v1836_v12, %v1792_v49  ;;  %v1614_v23 = vrot.slane %v1597_v27, 3  ;;  %v620_v6 = vadd.f32 %v612_v34, %v584_v22  ;;  %v6712_v55 = vrot.slane %v6711_v8, 2  ;;  %v3373_v27 = vld [vmem:[%s4411_s6 + $0xe8] sm:$0x1]  ;;  %v342_v12 = vld [vmem:[%s4411_s6 + $0x258] sm:$0x3f] }
 0x167   : > { %v1069_v63 = vadd.f32 %v6707_v43, %v1009_v19  ;;  %v1224_v31 = vsel %vm496_vm4, %v6710_v11, %v1223_v20  ;;  %v958_v33 = vrot.slane %v940_v14, 4  ;;  %v1990_v17 = vrot.slane %v5515_v10, 4  ;;  %v6716_v14 = vld [vmem:[#allocation62_spill] sm:$0xff] }
 0x168   : > { %v1888_v52 = vadd.f32 %v1878_v46, %v1852_v0  ;;  %v6714_v16 = vrot.slane %v6713_v60, 4  ;;  %v6715_v34 = vrot.slane %v5211_v58, 1  ;;  %v1392_v49 = vmul.f32 %v3317_v54, %v6716_v14  ;;  %v3312_v0 = vld [vmem:[%s4411_s6 + $0x2c0] sm:$0x3]  ;;  %v532_v54 = vld [vmem:[%s4411_s6 + $0x268] sm:$0x3] }
 0x169   : > { %v1140_v1 = vadd.f32 %v6712_v55, %v1069_v63  ;;  %v1736_v22 = vrot.slane %v1719_v39, 4  ;;  %v6717_v40 = vrot.slane %v5263_v25, 3  ;;  %v3284_v63 = vld [vmem:[%s4411_s6 + $0x2b0] sm:$0x3f]  ;;  %v471_v39 = vld [vmem:[%s4411_s6 + $0x268] sm:$0x1] }
 0x16a   : > { %v1346_v20 = vsel %vm557_vm5, %v6714_v16, %v1345_v59  ;;  %v680_v2 = vadd.f32 %v6715_v34, %v620_v6  ;;  %v1948_v5 = vadd.f32 %v1930_v35, %v1888_v52  ;;  %v6718_v59 = vld [vmem:[#allocation121_spill] sm:$0xff]  ;;  %v6720_v6 = vrot.slane %v5239_v50, 2  ;;  %v6721_v55 = vld [vmem:[#allocation87_spill] sm:$0xff] }
 0x16b   : > { %v1242_v19 = vadd.f32 %v1224_v31, %v1140_v1  ;;  %v836_v43 = vsel %vm496_vm4, %v6717_v40, %v835_v18  ;;  %v6719_v11 = vrot.slane %v6718_v59, 3  ;;  %v1209_v31 = vmul.f32 %v5530_v26, %v4798_v3  ;;  %v3381_v1 = vld [vmem:[%s4411_s6 + $0xe8] sm:$0x3]  ;;  %v5578_v59 = vld [vmem:[%s4411_s6 + $0x298] sm:$0x1] }
 0x16c   : > { %v751_v8 = vadd.f32 %v6720_v6, %v680_v2  ;;  %v5560_v18 = vmul.f32 %v3373_v27, %v6721_v55  ;;  %v6722_v52 = vrot.slane %v5279_v38, 4  ;;  %v2008_v50 = vadd.f32 %v1990_v17, %v1948_v5  ;;  %v6723_v27 = vld [vmem:[#allocation42_spill] sm:$0xff] }
 0x16d   : > { %v1615_v58 = vsel %vm496_vm4, %v6719_v11, %v1614_v23  ;;  %v1364_v25 = vadd.f32 %v1346_v20, %v1242_v19  ;;  %v358_v23 = vmul.f32 %v4418_v57, %v342_v12  ;;  %v1004_v3 = vmul.f32 %v3284_v63, %v6613_v29  ;;  %v6725_v12 = vld [vmem:[#allocation88_spill] sm:$0xff]  ;;  %v6728_v63 = vld [vmem:[#allocation43_spill] sm:$0xff] }
 0x16e   : > { %v959_v60 = vsel %vm557_vm5, %v6722_v52, %v958_v33  ;;  %v853_v16 = vadd.f32 %v836_v43, %v751_v8  ;;  %v1331_v20 = vmul.f32 %v3312_v0, %v6619_v53  ;;  %v6724_v2 = vrot.slane %v6723_v27, 1  ;;  %v6726_v29 = vld [vmem:[#allocation120_spill] sm:$0xff]  ;;  %v3249_v8 = vld [vmem:[%s4411_s6 + $0x288] sm:$0x3f] }
 0x16f   : > { %v1400_v34 = vadd.f32 %v1392_v49, %v1364_v25  ;;  %v487_v38 = vmul.f32 %v4432_v62, %v471_v39  ;;  %v548_v33 = vmul.f32 %v6664_v24, %v532_v54  ;;  %v2054_v57 = vadd.f32 %v6688_v28, %v2008_v50  ;;  %v6730_v39 = vld [vmem:[#allocation72_spill] sm:$0xff] }
 0x170   : > { %v427_v19 = vadd.f32 %v6724_v2, %v358_v23  ;;  %v1971_v40 = vmul.f32 %v3381_v1, %v6725_v12  ;;  %v976_v43 = vadd.f32 %v959_v60, %v853_v16  ;;  %v1227_v5 = vrot.slane %v1209_v31, 3  ;;  %v3353_v1 = vld [vmem:[%s4411_s6 + $0xd8] sm:$0x3f]  ;;  %v6732_v23 = vld [vmem:[#allocation63_spill] sm:$0xff] }
 0x171   : > { %v6727_v53 = vrot.slane %v6726_v29, 1  ;;  %v6729_v0 = vrot.slane %v6728_v63, 2  ;;  %v507_v6 = vrot.slane %v487_v38, 3  ;;  %v568_v62 = vrot.slane %v548_v33, 4  ;;  %v3277_v60 = vld [vmem:[%s4411_s6 + $0x298] sm:$0x3] }
 0x172   : > { %v2062_v24 = vmax.f32 %v2054_v57, 0.0  ;;  %v6731_v54 = vrot.slane %v6730_v39, 4  ;;  %v1012_v31 = vadd.f32 %v1004_v3, %v976_v43  ;;  %v1349_v52 = vrot.slane %v1331_v20, 4  ;;  %v5605_v43 = vld [vmem:[%s4411_s6 + $0x2f0] sm:$0x1]  ;;  %v6739_v63 = vld [vmem:[#allocation66_spill] sm:$0xff] }
 0x173   : > { %v1460_v49 = vadd.f32 %v6727_v53, %v1400_v34  ;;  %v463_v11 = vadd.f32 %v6729_v0, %v427_v19  ;;  %v6733_v50 = vrot.slane %v6732_v23, 2  ;;  %v6734_v34 = vld [vmem:[#allocation44_spill] sm:$0xff]  ;;  %v6736_v19 = vld [vmem:[#allocation46_spill] sm:$0xff]  ;;  %v6738_v3 = vrot.slane %v5295_v7, 1  ;;  %v3348_v39 = vld [vmem:[%s4411_s6 + $0x2f0] sm:$0x3] }
 0x174   : > { %v1737_v25 = vsel %vm557_vm5, %v6731_v54, %v1736_v22  ;;  %v6735_v27 = vrot.slane %v6734_v34, 3  ;;  %v6737_v38 = vrot.slane %v6736_v19, 4  ;;  %v818_v22 = vmul.f32 %v5578_v59, %v6671_v21  ;;  %v3320_v21 = vld [vmem:[%s4411_s6 + $0x2e0] sm:$0x3f]  ;;  %v6743_v23 = vld [vmem:[#allocation100_spill] sm:$0xff] }
 0x175   : > { %v1531_v16 = vadd.f32 %v6733_v50, %v1460_v49  ;;  %v5600_v57 = vrot.slane %v2062_v24, 7  ;;  %v1072_v20 = vadd.f32 %v6738_v3, %v1012_v31  ;;  %v613_v53 = vmul.f32 %v3249_v8, %v6674_v15  ;;  %v3376_v8 = vld [vmem:[%s4411_s6 + $0x320] sm:$0x1] }
 0x176   : > { %v508_v2 = vsel %vm496_vm4, %v6735_v27, %v507_v6  ;;  %v569_v33 = vsel %vm557_vm5, %v6737_v38, %v568_v62  ;;  %v1783_v0 = vmul.f32 %v3353_v1, %v6739_v63  ;;  %v6740_v6 = vrot.slane %v5307_v51, 3  ;;  %v3384_v54 = vld [vmem:[%s4411_s6 + $0x320] sm:$0x3]  ;;  %v5630_v27 = vld [vmem:[%s4411_s6 + $0x2c8] sm:$0x1] }
 0x177   : > { %v524_v29 = vadd.f32 %v508_v2, %v463_v11  ;;  %v1633_v49 = vadd.f32 %v1615_v58, %v1531_v16  ;;  %v941_v24 = vmul.f32 %v3277_v60, %v6675_v42  ;;  %2095 = vrot.lane.b32.xlu0 %v5600_v57, %s3990_s24  ;;  %v1928_v7 = vrot.slane %v5560_v18, 3  ;;  %v6744_v16 = vld [vmem:[#allocation98_spill] sm:$0xff] }
 0x178   : > { %v1228_v62 = vsel %vm496_vm4, %v6740_v6, %v1227_v5  ;;  %v1988_v11 = vrot.slane %v1971_v40, 4  ;;  %v6741_v15 = vrot.slane %v5303_v47, 2  ;;  %v6742_v5 = vrot.slane %v5310_v44, 4  ;;  %v6745_v40 = vld [vmem:[#allocation101_spill] sm:$0xff]  ;;  %v6747_v38 = vld [vmem:[#allocation78_spill] sm:$0xff] }
 0x179   : > { %v585_v1 = vadd.f32 %v569_v33, %v524_v29  ;;  %v1755_v51 = vadd.f32 %v1737_v25, %v1633_v49  ;;  %v1600_v42 = vmul.f32 %v5605_v43, %v6743_v23  ;;  %v837_v60 = vrot.slane %v818_v22, 3  ;;  %v6746_v25 = vld [vmem:[#allocation109_spill] sm:$0xff] }
 0x17a   : > { %v1143_v58 = vadd.f32 %v6741_v15, %v1072_v20  ;;  %v1350_v31 = vsel %vm557_vm5, %v6742_v5, %v1349_v52  ;;  %v1395_v18 = vmul.f32 %v3320_v21, %v6744_v16  ;;  %v1722_v47 = vmul.f32 %v3348_v39, %v6745_v40  ;;  %v6749_v20 = vld [vmem:[#allocation47_spill] sm:$0xff]  ;;  %v6751_v6 = vld [vmem:[#allocation81_spill] sm:$0xff]  ;;  %v6753_v39 = vld [vmem:[#allocation52_spill] sm:$0xff] }
 0x17b   : > { %v621_v34 = vadd.f32 %v613_v53, %v585_v1  ;;  %v1791_v2 = vadd.f32 %v1783_v0, %v1755_v51  ;;  %v1914_v19 = vmul.f32 %v3376_v8, %v6746_v25  ;;  %v1974_v44 = vmul.f32 %v3384_v54, %v4959_v61  ;;  %v6755_v61 = vld [vmem:[#allocation53_spill] sm:$0xff]  ;;  %v3313_v8 = vld [vmem:[%s4411_s6 + $0x2c8] sm:$0x3]  ;;  %v6756_v54 = vld [vmem:[#allocation84_spill] sm:$0xff] }
 0x17c   : > { %v1245_v50 = vadd.f32 %v1228_v62, %v1143_v58  ;;  %v960_v52 = vrot.slane %v941_v24, 4  ;;  %v6748_v33 = vrot.slane %v6747_v38, 3  ;;  %v6750_v29 = vrot.slane %v6749_v20, 1  ;;  %v3285_v58 = vld [vmem:[%s4411_s6 + $0x2b8] sm:$0x3f] }
 0x17d   : > { %v6752_v62 = vrot.slane %v6751_v6, 1  ;;  %v1618_v21 = vrot.slane %v1600_v42, 3  ;;  %v6754_v0 = vrot.slane %v6753_v39, 3  ;;  %v1210_v24 = vmul.f32 %v5630_v27, %v6755_v61  ;;  %v6762_v25 = vld [vmem:[#allocation56_spill] sm:$0xff]  ;;  %v6764_v20 = vld [vmem:[#allocation93_spill] sm:$0xff]  ;;  %v6770_v61 = vld [vmem:[#allocation102_spill] sm:$0xff] }
 0x17e   : > { %v1929_v22 = vsel %vm496_vm4, %v6748_v33, %v1928_v7  ;;  %v1367_v3 = vadd.f32 %v1350_v31, %v1245_v50  ;;  %v681_v49 = vadd.f32 %v6750_v29, %v621_v34  ;;  %v6757_v7 = vrot.slane %v6756_v54, 4  ;;  %v6758_v31 = vld [vmem:[#allocation50_spill] sm:$0xff]  ;;  %v6760_v50 = vld [vmem:[#allocation76_spill] sm:$0xff] }
 0x17f   : > { %v1851_v53 = vadd.f32 %v6752_v62, %v1791_v2  ;;  %v838_v15 = vsel %vm496_vm4, %v6754_v0, %v837_v60  ;;  %v1740_v5 = vrot.slane %v1722_v47, 4  ;;  %v6759_v23 = vrot.slane %v6758_v31, 2  ;;  %v3356_v60 = vld [vmem:[%s4411_s6 + $0x310] sm:$0x3f]  ;;  %v3321_v6 = vld [vmem:[%s4411_s6 + $0x2e8] sm:$0x3f] }
 0x180   : > { %v1989_v1 = vsel %vm557_vm5, %v6757_v7, %v1988_v11  ;;  %v1403_v51 = vadd.f32 %v1395_v18, %v1367_v3  ;;  %v6761_v16 = vrot.slane %v6760_v50, 2  ;;  %v1932_v34 = vrot.slane %v1914_v19, 3  ;;  %v6766_v3 = vld [vmem:[#allocation57_spill] sm:$0xff]  ;;  %v5668_v39 = vld [vmem:[%s4411_s6 + $0x2f8] sm:$0x1]  ;;  %v6774_v50 = vld [vmem:[#allocation37_spill] sm:$0xff] }
 0x181   : > { %v752_v42 = vadd.f32 %v6759_v23, %v681_v49  ;;  %v1992_v2 = vrot.slane %v1974_v44, 4  ;;  %v6763_v38 = vrot.slane %v6762_v25, 4  ;;  %v6765_v29 = vrot.slane %v6764_v20, 1  ;;  %v6771_v23 = vld [vmem:[#allocation89_spill] sm:$0xff]  ;;  %v6779_v20 = vld [vmem:[#allocation39_spill] sm:$0xff] }
 0x182   : > { %v1887_v40 = vadd.f32 %v6761_v16, %v1851_v53  ;;  %v1005_v47 = vmul.f32 %v3285_v58, %v6766_v3  ;;  %v1332_v49 = vmul.f32 %v3313_v8, %v6695_v4  ;;  %v6767_v19 = vrot.slane %v5383_v48, 3  ;;  %v3349_v8 = vld [vmem:[%s4411_s6 + $0x2f8] sm:$0x3]  ;;  %v6775_v16 = vld [vmem:[#allocation54_spill] sm:$0xff]  ;;  %v6777_v25 = vld [vmem:[#allocation41_spill] sm:$0xff] }
 0x183   : > { %v961_v33 = vsel %vm557_vm5, %v6763_v38, %v960_v52  ;;  %v1463_v11 = vadd.f32 %v6765_v29, %v1403_v51  ;;  %v854_v18 = vadd.f32 %v838_v15, %v752_v42  ;;  %v1229_v53 = vrot.slane %v1210_v24, 3  ;;  %v3385_v24 = vld [vmem:[%s4411_s6 + $0x328] sm:$0x3]  ;;  %v6772_v42 = vld [vmem:[#allocation59_spill] sm:$0xff] }
 0x184   : > { %v1947_v62 = vadd.f32 %v1929_v22, %v1887_v40  ;;  %v1619_v44 = vsel %vm496_vm4, %v6767_v19, %v1618_v21  ;;  %v6768_v52 = vrot.slane %v5379_v9, 2  ;;  %v6769_v15 = vrot.slane %v5396_v30, 4  ;;  %v3377_v21 = vld [vmem:[%s4411_s6 + $0x328] sm:$0x1] }
 0x185   : > { %v1786_v54 = vmul.f32 %v3356_v60, %v6770_v61  ;;  %v977_v4 = vadd.f32 %v961_v33, %v854_v18  ;;  %v1933_v48 = vsel %vm496_vm4, %v1930_v35, %v1932_v34  ;;  %v1993_v22 = vsel %vm557_vm5, %v1990_v17, %v1992_v2  ;;  %v6778_v38 = vld [vmem:[#allocation22_spill] sm:$0xff] }
 0x186   : > { %v1534_v0 = vadd.f32 %v6768_v52, %v1463_v11  ;;  %v1741_v58 = vsel %vm557_vm5, %v6769_v15, %v1740_v5  ;;  %v2007_v7 = vadd.f32 %v1989_v1, %v1947_v62  ;;  %v1396_v9 = vmul.f32 %v3321_v6, %v6716_v14  ;;  %v6780_v18 = vld [vmem:[#allocation58_spill] sm:$0xff] }
 0x187   : > { %v1013_v51 = vadd.f32 %v1005_v47, %v977_v4  ;;  %v1351_v5 = vrot.slane %v1332_v49, 4  ;;  %v1601_v31 = vmul.f32 %v5668_v39, %v6698_v56  ;;  %v6773_v13 = vrot.slane %v6772_v42, 3  ;;  %v6782_v49 = vld [vmem:[#allocation61_spill] sm:$0xff]  ;;  %v6788_v42 = vld [vmem:[#allocation70_spill] sm:$0xff] }
 0x188   : > { %v1636_v30 = vadd.f32 %v1619_v44, %v1534_v0  ;;  %v2053_v1 = vadd.f32 %v6771_v23, %v2007_v7  ;;  %v1723_v10 = vmul.f32 %v3349_v8, %v6708_v41  ;;  %v5694_v17 = vsub.s32 5, %v6774_v50  ;;  %v3357_v44 = vld [vmem:[%s4411_s6 + $0x318] sm:$0x3f]  ;;  %v6786_v8 = vld [vmem:[#allocation94_spill] sm:$0xff] }
 0x189   : > { %v1230_v35 = vsel %vm496_vm4, %v6773_v13, %v1229_v53  ;;  %v6776_v40 = vrot.slane %v6775_v16, 1  ;;  %v1915_v34 = vmul.f32 %v3377_v21, %v6721_v55  ;;  %v1975_v56 = vmul.f32 %v3385_v24, %v6725_v12  ;;  %v6784_v53 = vld [vmem:[#allocation38_spill] sm:$0xff] }
 0x18a   : > { %v1758_v14 = vadd.f32 %v1741_v58, %v1636_v30  ;;  %v2061_v2 = vmax.f32 %v2053_v1, 0.0  ;;  %v690_v33 = vrot.slane %v6778_v38, %v6777_v25  ;;  %v756_v29 = vrot.slane %v6778_v38, %v6779_v20 }
 0x18b   : > { %v1073_v60 = vadd.f32 %v6776_v40, %v1013_v51  ;;  %v5705_v41 = vsub.s32 6, %v6774_v50  ;;  %v6781_v3 = vrot.slane %v6780_v18, 2  ;;  %v6783_v6 = vrot.slane %v6782_v49, 4  ;;  %v3667_v18 = vld [vmem:[%s4411_s6 + $0x48] sm:$0x7f] }
 0x18c   : > { %v1794_v11 = vadd.f32 %v1786_v54, %v1758_v14  ;;  %v1620_v62 = vrot.slane %v1601_v31, 3  ;;  %v2079_v12 = vrot.slane %v2061_v2, 7  ;;  %v1742_v19 = vrot.slane %v1723_v10, 4  ;;  %v6787_v31 = vld [vmem:[#allocation40_spill] sm:$0xff]  ;;  %v6790_v10 = vld [vmem:[#allocation75_spill] sm:$0xff] }
 0x18d   : > { %v1144_v47 = vadd.f32 %v6781_v3, %v1073_v60  ;;  %v1352_v55 = vsel %vm557_vm5, %v6783_v6, %v1351_v5  ;;  %v686_v52 = vrot.slane %v6778_v38, %v6784_v53  ;;  %v760_v0 = vrot.slane %v6778_v38, %v5694_v17  ;;  %v6796_v6 = vld [vmem:[#allocation60_spill] sm:$0xff] }
 0x18e   : > { %v6785_v15 = vrot.slane %v5427_v36, 1  ;;  %v1934_v54 = vrot.slane %v1915_v34, 3  ;;  %v1994_v4 = vrot.slane %v1975_v56, 4  ;;  %v2080_v7 = vsel %vm2074_vm6, %v6786_v8, %v2079_v12  ;;  %v6794_v56 = vld [vmem:[#allocation97_spill] sm:$0xff]  ;;  %v3669_v12 = vld [vmem:[%s4411_s6 + $0x288] sm:$0x7f] }
 0x18f   : > { %v1246_v61 = vadd.f32 %v1230_v35, %v1144_v47  ;;  %v5722_v21 = vrot.slane %v690_v33, %v6784_v53  ;;  %v766_v24 = vrot.slane %v756_v29, %v6779_v20  ;;  %v862_v30 = vrot.slane %v6778_v38, %v5705_v41  ;;  %2093 = vrot.lane.b32.xlu1 %v2080_v7, %s3990_s24  ;;  %v3666_v29 = vld [vmem:[%s4411_s6 + $0x38] sm:$0x80] }
 0x190   : > { %v1854_v58 = vadd.f32 %v6785_v15, %v1794_v11  ;;  %v1787_v5 = vmul.f32 %v3357_v44, %v6739_v63  ;;  %v858_v1 = vrot.slane %v6778_v38, %v6787_v31  ;;  %v6789_v13 = vrot.slane %v6788_v42, 3  ;;  %v6792_v63 = vld [vmem:[#allocation95_spill] sm:$0xff]  ;;  %v3671_v15 = vld [vmem:[%s4411_s6 + $0x40] sm:$0x7f] }
 0x191   : > { %v1368_v51 = vadd.f32 %v1352_v55, %v1246_v61  ;;  %v6791_v50 = vrot.slane %v6790_v10, 4  ;;  %v696_v16 = vrot.slane %v686_v52, %v6784_v53  ;;  %v770_v37 = vrot.slane %v760_v0, %v6779_v20  ;;  %v3670_v52 = vld [vmem:[%s4411_s6 + $0x30] sm:$0x80]  ;;  %v3672_v61 = vld [vmem:[%s4411_s6 + $0x48] sm:$0xff]  ;;  %v6798_v7 = vld [vmem:[#allocation69_spill] sm:$0xff] }
 0x192   : > { %v1890_v36 = vadd.f32 %v1878_v46, %v1854_v58  ;;  %v1621_v35 = vsel %vm496_vm4, %v6789_v13, %v1620_v62  ;;  %v6793_v60 = vrot.slane %v6792_v63, 3  ;;  %v6795_v2 = vrot.slane %v6794_v56, 4  ;;  %v3718_v38 = vld [vmem:[#allocation10 + $0x40] ss:$8 sps:$4 sm:$0xff] (%p328_p0)  }
 0x193   : > { %v1743_v14 = vsel %vm557_vm5, %v6791_v50, %v1742_v19  ;;  %v1404_v40 = vadd.f32 %v1396_v9, %v1368_v51  ;;  %v702_v11 = vmul.f32 %v3666_v29, %v5722_v21  ;;  %v3668_v9 = vld [vmem:[%s4411_s6 + $0x40] sm:$0xff]  ;;  %v872_v47 = vrot.slane %v862_v30, %v6787_v31  ;;  %v6800_v51 = vld [vmem:[#allocation80_spill] sm:$0xff]  ;;  %v6802_v50 = vld [vmem:[#allocation67_spill] sm:$0xff] }
 0x194   : > { %v1950_v46 = vadd.f32 %v1933_v48, %v1890_v36  ;;  %v5744_v34 = vsel %vm496_vm4, %v6793_v60, %v1934_v54  ;;  %v5749_v33 = vsel %vm557_vm5, %v6795_v2, %v1994_v4  ;;  %v5755_v48 = vmul.f32 %v3667_v18, %v5722_v21  ;;  %v3673_v4 = vld [vmem:[%s4411_s6 + $0x288] sm:$0xfe]  ;;  %v3675_v29 = vld [vmem:[%s4411_s6 + $0x40] sm:$0xfe] }
 0x195   : > { %v771_v3 = vmul.f32 %v3668_v9, %v766_v24  ;;  %v6797_v55 = vrot.slane %v6796_v6, 1  ;;  %v708_v19 = vmul.f32 %v3669_v12, %v5722_v21  ;;  %v868_v44 = vrot.slane %v858_v1, %v6787_v31  ;;  %v6801_v1 = vld [vmem:[#allocation77_spill] sm:$0xff] }
 0x196   : > { %v2010_v49 = vadd.f32 %v1993_v22, %v1950_v46  ;;  %v701_v0 = vmul.f32 %v3670_v52, %v696_v16  ;;  %v703_v58 = vmul.f32 %v3671_v15, %v696_v16  ;;  %v772_v54 = vmul.f32 %v3672_v61, %v770_v37  ;;  %v6805_v52 = vld [vmem:[#allocation23_spill] sm:$0xff] }
 0x197   : > { %v1464_v62 = vadd.f32 %v6797_v55, %v1404_v40  ;;  %v5768_v8 = vmul.f32 %v3673_v4, %v872_v47  ;;  %v6799_v30 = vrot.slane %v6798_v7, 2  ;;  %v705_v42 = vmul.f32 %v6800_v51, %v696_v16  ;;  %v3674_v40 = vld [vmem:[%s4411_s6 + $0x288] sm:$0xff] }
 0x198   : > { %v2056_v22 = vadd.f32 %v6688_v28, %v2010_v49  ;;  %v880_v13 = vmul.f32 %v5578_v59, %v872_v47  ;;  %v707_v10 = vmul.f32 %v6801_v1, %v696_v16  ;;  %v773_v46 = vmul.f32 %v6802_v50, %v766_v24  ;;  %v6803_v28 = vld [vmem:[#allocation73_spill] sm:$0xff]  ;;  %v3676_v7 = vld [vmem:[%s4411_s6 + $0x48] sm:$0xfe] }
 0x199   : > { %v1535_v36 = vadd.f32 %v6799_v30, %v1464_v62  ;;  %v5778_v63 = vmul.f32 %v3674_v40, %v770_v37  ;;  %v779_v60 = vrot.slane %v771_v3, 1  ;;  %v873_v18 = vmul.f32 %v3675_v29, %v868_v44  ;;  %v6804_v62 = vld [vmem:[#allocation83_spill] sm:$0xff] }
 0x19a   : > { %v2064_v56 = vmax.f32 %v2056_v22, 0.0  ;;  %v875_v9 = vmul.f32 %v6803_v28, %v868_v44  ;;  %v780_v49 = vrot.slane %v772_v54, 1  ;;  %v897_v6 = vrot.slane %v5768_v8, 2  ;;  %v6808_v1 = vld [vmem:[#allocation99_spill] sm:$0xff] }
 0x19b   : > { %v1637_v2 = vadd.f32 %v1621_v35, %v1535_v36  ;;  %v900_v55 = vrot.slane %v880_v13, 2  ;;  %v877_v24 = vmul.f32 %v6804_v62, %v868_v44  ;;  %v879_v37 = vmul.f32 %v5486_v32, %v868_v44  ;;  %v6806_v36 = vld [vmem:[#allocation82_spill] sm:$0xff] }
 0x19c   : > { %v2083_v59 = vrot.slane %v2064_v56, 7  ;;  %v781_v12 = vrot.slane %v773_v46, 1  ;;  %v782_v3 = vrot.slane %v5778_v63, 1  ;;  %v1078_v15 = vrot.slane %v6805_v52, %v6784_v53 }
 0x19d   : > { %v1759_v16 = vadd.f32 %v1743_v14, %v1637_v2  ;;  %v901_v35 = vsel %vm889_vm7, %v897_v6, %v900_v55  ;;  %v890_v4 = vrot.slane %v873_v18, 2  ;;  %v892_v14 = vrot.slane %v875_v9, 2 }
 0x19e   : > { %v2084_v61 = vsel %vm2074_vm6, %v5600_v57, %v2083_v59  ;;  %v787_v22 = vadd.f32 %v779_v60, %v701_v0  ;;  %v5794_v32 = vadd.f32 %v780_v49, %v702_v11  ;;  %v789_v44 = vadd.f32 %v779_v60, %v703_v58  ;;  %v6809_v58 = vld [vmem:[#allocation85_spill] sm:$0xff] }
 0x19f   : > { %v1795_v54 = vadd.f32 %v1787_v5, %v1759_v16  ;;  %2099 = vrot.lane.b32.xlu0 %v2084_v61, %s3990_s24  ;;  %v5797_v30 = vmul.f32 %v3676_v7, %v872_v47  ;;  %v6807_v51 = vrot.slane %v6806_v36, 1  ;;  %v876_v50 = vmul.f32 %v6808_v1, %v872_v47  ;;  %v3678_v61 = vld [vmem:[%s4411_s6 + $0x70] sm:$0x7f] }
 0x1a0   : > { %v896_v46 = vrot.slane %v877_v24, 2  ;;  %v898_v40 = vrot.slane %v879_v37, 2  ;;  %v791_v57 = vadd.f32 %v781_v12, %v705_v42  ;;  %v794_v5 = vadd.f32 %v782_v3, %v708_v19 }
 0x1a1   : > { %v1855_v13 = vadd.f32 %v6807_v51, %v1795_v54  ;;  %v1082_v0 = vrot.slane %v6805_v52, %v6777_v25  ;;  %v1148_v11 = vrot.slane %v6805_v52, %v6779_v20  ;;  %v6810_v60 = vrot.slane %v6809_v58, 2  ;;  %v6812_v51 = vld [vmem:[#allocation68_spill] sm:$0xff] }
 0x1a2   : > { %v893_v2 = vsel %vm889_vm7, %v890_v4, %v892_v14  ;;  %v1088_v29 = vrot.slane %v1078_v15, %v6784_v53  ;;  %v1250_v47 = vrot.slane %v6805_v52, %v6787_v31  ;;  %v5815_v42 = vadd.f32 %v780_v49, %v5755_v48  ;;  %v3679_v14 = vld [vmem:[%s4411_s6 + $0x2b8] sm:$0x7f]  ;;  %v3682_v58 = vld [vmem:[%s4411_s6 + $0x70] sm:$0xfe] }
 0x1a3   : > { %v1891_v56 = vadd.f32 %v6810_v60, %v1855_v13  ;;  %v793_v19 = vadd.f32 %v781_v12, %v707_v10  ;;  %v891_v18 = vrot.slane %v5797_v30, 2  ;;  %v1152_v28 = vrot.slane %v6805_v52, %v5694_v17  ;;  %v3677_v12 = vld [vmem:[%s4411_s6 + $0x60] sm:$0x80]  ;;  %v3680_v30 = vld [vmem:[%s4411_s6 + $0x70] sm:$0xff] }
 0x1a4   : > { %v894_v55 = vrot.slane %v876_v50, 2  ;;  %v899_v59 = vsel %vm889_vm7, %v896_v46, %v898_v40  ;;  %v910_v16 = vadd.f32 %v890_v4, %v787_v22  ;;  %v912_v62 = vadd.f32 %v893_v2, %v789_v44 }
 0x1a5   : > { %v1951_v9 = vadd.f32 %v5744_v34, %v1891_v56  ;;  %v914_v24 = vadd.f32 %v896_v46, %v791_v57  ;;  %v5823_v48 = vrot.slane %v1082_v0, %v6784_v53  ;;  %v1158_v10 = vrot.slane %v1148_v11, %v6779_v20  ;;  %v6813_v46 = vld [vmem:[#allocation90_spill] sm:$0xff]  ;;  %v3681_v57 = vld [vmem:[%s4411_s6 + $0x2b8] sm:$0xff] }
 0x1a6   : > { %v917_v37 = vadd.f32 %v901_v35, %v794_v5  ;;  %v1093_v15 = vmul.f32 %v3677_v12, %v1088_v29  ;;  %v1260_v34 = vrot.slane %v1250_v47, %v6787_v31  ;;  %v1095_v54 = vmul.f32 %v3678_v61, %v1088_v29  ;;  %v6811_v35 = vld [vmem:[#allocation91_spill] sm:$0xff]  ;;  %v3684_v12 = vld [vmem:[%s4411_s6 + $0x2b8] sm:$0xfe] }
 0x1a7   : > { %v2011_v49 = vadd.f32 %v5749_v33, %v1951_v9  ;;  %v1100_v4 = vmul.f32 %v3679_v14, %v5823_v48  ;;  %v1162_v22 = vrot.slane %v1152_v28, %v6779_v20  ;;  %v1254_v44 = vrot.slane %v6805_v52, %v5705_v41  ;;  %v6814_v9 = vld [vmem:[#allocation96_spill] sm:$0xff]  ;;  %v6815_v14 = vld [vmem:[#allocation110_spill] sm:$0xff] }
 0x1a8   : > { %v1097_v7 = vmul.f32 %v6811_v35, %v1088_v29  ;;  %v1163_v36 = vmul.f32 %v3680_v30, %v1158_v10  ;;  %v1165_v13 = vmul.f32 %v6812_v51, %v1158_v10  ;;  %v895_v1 = vsel %vm889_vm7, %v891_v18, %v894_v55  ;;  %v6816_v35 = vld [vmem:[#allocation24_spill] sm:$0xff] }
 0x1a9   : > { %v2057_v33 = vadd.f32 %v6771_v23, %v2011_v49  ;;  %v916_v50 = vadd.f32 %v899_v59, %v793_v19  ;;  %v1099_v40 = vmul.f32 %v6813_v46, %v1088_v29  ;;  %v5842_v5 = vmul.f32 %v3681_v57, %v1162_v22  ;;  %v3683_v23 = vld [vmem:[%s4411_s6 + $0x80] sm:$0x1]  ;;  %v3719_v52 = vld [vmem:[#allocation10 + $0x54] ss:$8 sps:$4 sm:$0xff] (%p328_p0)  }
 0x1aa   : > { %v1101_v11 = vadd.f32 %v1093_v15, %v910_v16  ;;  %v1265_v60 = vmul.f32 %v3682_v58, %v1260_v34  ;;  %v1267_v56 = vmul.f32 %v3683_v23, %v1260_v34  ;;  %v1103_v2 = vadd.f32 %v1095_v54, %v912_v62  ;;  %v3686_v58 = vld [vmem:[%s4411_s6 + $0x78] sm:$0x7f] }
 0x1ab   : > { %v2065_v0 = vmax.f32 %v2057_v33, 0.0  ;;  %v1108_v47 = vadd.f32 %v1100_v4, %v917_v37  ;;  %v1264_v28 = vrot.slane %v1254_v44, %v6787_v31  ;;  %v1269_v10 = vmul.f32 %v6814_v9, %v1260_v34  ;;  %v3687_v23 = vld [vmem:[%s4411_s6 + $0x78] sm:$0xff] }
 0x1ac   : > { %v1105_v19 = vadd.f32 %v1097_v7, %v914_v24  ;;  %v1171_v59 = vrot.slane %v1163_v36, 1  ;;  %v1173_v29 = vrot.slane %v1165_v13, 1  ;;  %v1174_v49 = vrot.slane %v5842_v5, 1 }
 0x1ad   : > { %v2085_v55 = vrot.slane %v2065_v0, 7  ;;  %v5850_v61 = vmul.f32 %v3684_v12, %v1264_v28  ;;  %v1271_v16 = vmul.f32 %v5530_v26, %v1260_v34  ;;  %v1272_v15 = vmul.f32 %v5630_v27, %v1264_v28  ;;  %v3685_v0 = vld [vmem:[%s4411_s6 + $0x68] sm:$0x80] }
 0x1ae   : > { %v1107_v37 = vadd.f32 %v1099_v40, %v916_v50  ;;  %v1281_v54 = vrot.slane %v1265_v60, 2  ;;  %v1283_v4 = vrot.slane %v1267_v56, 2  ;;  %v1186_v24 = vadd.f32 %v1174_v49, %v1108_v47 }
 0x1af   : > { %v2086_v62 = vsel %vm2074_vm6, %v6815_v14, %v2085_v55  ;;  %v1287_v44 = vrot.slane %v1269_v10, 2  ;;  %v1289_v33 = vrot.slane %v1271_v16, 2  ;;  %v1469_v7 = vrot.slane %v6816_v35, %v6784_v53 }
 0x1b0   : > { %2101 = vrot.lane.b32.xlu1 %v2086_v62, %s3990_s24  ;;  %v911_v26 = vadd.f32 %v891_v18, %v5794_v32  ;;  %v1288_v27 = vrot.slane %v5850_v61, 2  ;;  %v1291_v34 = vrot.slane %v1272_v15, 2  ;;  %v913_v30 = vadd.f32 %v895_v1, %v5815_v42  ;;  %v6817_v15 = vld [vmem:[#allocation74_spill] sm:$0xff]  ;;  %v6818_v62 = vld [vmem:[#allocation92_spill] sm:$0xff] }
 0x1b1   : > { %v1179_v36 = vadd.f32 %v1171_v59, %v1101_v11  ;;  %v1181_v51 = vadd.f32 %v1171_v59, %v1103_v2  ;;  %v1183_v13 = vadd.f32 %v1173_v29, %v1105_v19  ;;  %v1185_v50 = vadd.f32 %v1173_v29, %v1107_v37  ;;  %v3688_v19 = vld [vmem:[%s4411_s6 + $0x90] sm:$0x80]  ;;  %v3689_v29 = vld [vmem:[%s4411_s6 + $0xa0] sm:$0x7f] }
 0x1b2   : > { %v1284_v46 = vsel %vm889_vm7, %v1281_v54, %v1283_v4  ;;  %v1290_v40 = vsel %vm889_vm7, %v1287_v44, %v1289_v33  ;;  %v1292_v57 = vsel %vm889_vm7, %v1288_v27, %v1291_v34  ;;  %v1473_v18 = vrot.slane %v6816_v35, %v6777_v25  ;;  %v3690_v33 = vld [vmem:[%s4411_s6 + $0x78] sm:$0xfe]  ;;  %v6819_v34 = vld [vmem:[#allocation103_spill] sm:$0xff] }
 0x1b3   : > { %v1308_v32 = vadd.f32 %v1292_v57, %v1186_v24  ;;  %v1479_v42 = vrot.slane %v1469_v7, %v6784_v53  ;;  %v1539_v1 = vrot.slane %v6816_v35, %v6779_v20  ;;  %v1094_v11 = vmul.f32 %v3685_v0, %v5823_v48 }
 0x1b4   : > { %v1096_v60 = vmul.f32 %v3686_v58, %v5823_v48  ;;  %v1164_v56 = vmul.f32 %v3687_v23, %v1162_v22  ;;  %v1641_v2 = vrot.slane %v6816_v35, %v6787_v31  ;;  %v1301_v47 = vadd.f32 %v1281_v54, %v1179_v36 }
 0x1b5   : > { %v1303_v9 = vadd.f32 %v1284_v46, %v1181_v51  ;;  %v1305_v25 = vadd.f32 %v1287_v44, %v1183_v13  ;;  %v1543_v10 = vrot.slane %v6816_v35, %v5694_v17  ;;  %v1307_v55 = vadd.f32 %v1290_v40, %v1185_v50  ;;  %v3691_v51 = vld [vmem:[%s4411_s6 + $0x2e8] sm:$0x7f] }
 0x1b6   : > { %v1484_v59 = vmul.f32 %v3688_v19, %v1479_v42  ;;  %v1486_v12 = vmul.f32 %v3689_v29, %v1479_v42  ;;  %v1549_v16 = vrot.slane %v1539_v1, %v6779_v20  ;;  %v5887_v22 = vrot.slane %v1473_v18, %v6784_v53  ;;  %v3693_v1 = vld [vmem:[%s4411_s6 + $0x2e8] sm:$0xff] }
 0x1b7   : > { %v1488_v14 = vmul.f32 %v6817_v15, %v1479_v42  ;;  %v1490_v37 = vmul.f32 %v6818_v62, %v1479_v42  ;;  %v1645_v54 = vrot.slane %v6816_v35, %v5705_v41  ;;  %v1102_v17 = vadd.f32 %v1094_v11, %v911_v26  ;;  %v3692_v41 = vld [vmem:[%s4411_s6 + $0xa0] sm:$0xff] }
 0x1b8   : > { %v1104_v4 = vadd.f32 %v1096_v60, %v913_v30  ;;  %v1172_v24 = vrot.slane %v1164_v56, 1  ;;  %v1651_v44 = vrot.slane %v1641_v2, %v6787_v31  ;;  %v1266_v7 = vmul.f32 %v3690_v33, %v1264_v28  ;;  %v6820_v30 = vld [vmem:[#allocation79_spill] sm:$0xff]  ;;  %v3694_v60 = vld [vmem:[%s4411_s6 + $0xa0] sm:$0xfe] }
 0x1b9   : > { %v1268_v36 = vmul.f32 %v6819_v34, %v1264_v28  ;;  %v1491_v13 = vmul.f32 %v3691_v51, %v5887_v22  ;;  %v1553_v50 = vrot.slane %v1543_v10, %v6779_v20  ;;  %v1492_v46 = vadd.f32 %v1484_v59, %v1301_v47  ;;  %v3695_v56 = vld [vmem:[%s4411_s6 + $0xb0] sm:$0x1]  ;;  %v6821_v10 = vld [vmem:[#allocation86_spill] sm:$0xff] }
 0x1ba   : > { %v1494_v40 = vadd.f32 %v1486_v12, %v1303_v9  ;;  %v1554_v26 = vmul.f32 %v3692_v41, %v1549_v16  ;;  %v1556_v57 = vmul.f32 %v6820_v30, %v1549_v16  ;;  %v1496_v18 = vadd.f32 %v1488_v14, %v1305_v25  ;;  %v3696_v12 = vld [vmem:[%s4411_s6 + $0x2e8] sm:$0xfe] }
 0x1bb   : > { %v1498_v42 = vadd.f32 %v1490_v37, %v1307_v55  ;;  %v5902_v0 = vmul.f32 %v3693_v1, %v1553_v50  ;;  %v1655_v28 = vrot.slane %v1645_v54, %v6787_v31  ;;  %v1656_v23 = vmul.f32 %v3694_v60, %v1651_v44  ;;  %v3740_v35 = vld [vmem:[#allocation10 + $0x104] ss:$8 sps:$4 sm:$0xff] (%p328_p0)  }
 0x1bc   : > { %v1562_v11 = vrot.slane %v1554_v26, 1  ;;  %v1564_v58 = vrot.slane %v1556_v57, 1  ;;  %v1658_v2 = vmul.f32 %v3695_v56, %v1651_v44  ;;  %v1180_v47 = vadd.f32 %v1172_v24, %v1102_v17  ;;  %v3697_v26 = vld [vmem:[%s4411_s6 + $0x98] sm:$0x80]  ;;  %2619 = vmatprep.subr.bf16.mxu1 (%p328_p0), %v3740_v35 }
 0x1bd   : > { %v1499_v9 = vadd.f32 %v1491_v13, %v1308_v32  ;;  %v1660_v19 = vmul.f32 %v6821_v10, %v1651_v44  ;;  %v1662_v59 = vmul.f32 %v5605_v43, %v1651_v44  ;;  %v1182_v25 = vadd.f32 %v1172_v24, %v1104_v4  ;;  %v6822_v44 = vld [vmem:[#allocation35_spill] sm:$0xff] }
 0x1be   : > { %v1282_v55 = vrot.slane %v1266_v7, 2  ;;  %v1570_v29 = vadd.f32 %v1562_v11, %v1492_v46  ;;  %v5910_v16 = vmul.f32 %v3696_v12, %v1655_v28  ;;  %v1285_v15 = vrot.slane %v1268_v36, 2  ;;  %v3700_v12 = vld [vmem:[%s4411_s6 + $0xa8] sm:$0xfe] }
 0x1bf   : > { %v1565_v31 = vrot.slane %v5902_v0, 1  ;;  %v1572_v14 = vadd.f32 %v1562_v11, %v1494_v40  ;;  %v1574_v62 = vadd.f32 %v1564_v58, %v1496_v18  ;;  %v1576_v37 = vadd.f32 %v1564_v58, %v1498_v42  ;;  %v3698_v18 = vld [vmem:[%s4411_s6 + $0xa8] sm:$0xff] }
 0x1c0   : > { %v1663_v54 = vmul.f32 %v5668_v39, %v1655_v28  ;;  %v1672_v32 = vrot.slane %v1656_v23, 2  ;;  %v1674_v17 = vrot.slane %v1658_v2, 2  ;;  %v1678_v4 = vrot.slane %v1660_v19, 2  ;;  %v3699_v2 = vld [vmem:[%s4411_s6 + $0xa8] sm:$0x7f] }
 0x1c1   : > { %v1577_v43 = vadd.f32 %v1565_v31, %v1499_v9  ;;  %v1680_v24 = vrot.slane %v1662_v59, 2  ;;  %v2016_v33 = vrot.slane %v6822_v44, %v6784_v53  ;;  %v1679_v34 = vrot.slane %v5910_v16, 2 }
 0x1c2   : > { %v1675_v7 = vsel %vm889_vm7, %v1672_v32, %v1674_v17  ;;  %v1682_v36 = vrot.slane %v1663_v54, 2  ;;  %v1692_v51 = vadd.f32 %v1672_v32, %v1570_v29  ;;  %v1302_v13 = vadd.f32 %v1282_v55, %v1180_v47 }
 0x1c3   : > { %v1681_v39 = vsel %vm889_vm7, %v1678_v4, %v1680_v24  ;;  %v1694_v46 = vadd.f32 %v1675_v7, %v1572_v14  ;;  %v1696_v40 = vadd.f32 %v1678_v4, %v1574_v62  ;;  %v1286_v41 = vsel %vm889_vm7, %v1282_v55, %v1285_v15 }
 0x1c4   : > { %v1485_v30 = vmul.f32 %v3697_v26, %v5887_v22  ;;  %v1683_v53 = vsel %vm889_vm7, %v1679_v34, %v1682_v36  ;;  %v1698_v57 = vadd.f32 %v1681_v39, %v1576_v37  ;;  %v1555_v42 = vmul.f32 %v3698_v18, %v1553_v50  ;;  %v2098_v39 = vpop.permute.xlu1 %2097 }
 0x1c5   : > { %v5928_v1 = vadd.f32 %v1683_v53, %v1577_v43  ;;  %v2023_v11 = vadd.f32 %v2016_v33, %v1692_v51  ;;  %v2025_v58 = vadd.f32 %v2016_v33, %v1694_v46  ;;  %v2027_v60 = vadd.f32 %v2016_v33, %v1696_v40  ;;  %v2088_v40 = vpop.permute.xlu0 %2087 }
 0x1c6   : > { %v2029_v23 = vadd.f32 %v2016_v33, %v1698_v57  ;;  %v1304_v56 = vadd.f32 %v1286_v41, %v1182_v25  ;;  %v1487_v47 = vmul.f32 %v3699_v2, %v5887_v22  ;;  %v1493_v55 = vadd.f32 %v1485_v30, %v1302_v13 }
 0x1c7   : > { %v2031_v9 = vmax.f32 %v2023_v11, 0.0  ;;  %v2033_v10 = vmax.f32 %v2025_v58, 0.0  ;;  %v2035_v19 = vmax.f32 %v2027_v60, 0.0  ;;  %v1563_v29 = vrot.slane %v1555_v42, 1 }
 0x1c8   : > { %v2037_v59 = vmax.f32 %v2029_v23, 0.0  ;;  %v1657_v50 = vmul.f32 %v3700_v12, %v1655_v28  ;;  %v1659_v15 = vmul.f32 %v5469_v45, %v1655_v28  ;;  %v1495_v32 = vadd.f32 %v1487_v47, %v1304_v56  ;;  %v3702_v23 = vld [vmem:[%s4411_s6 + $0x2a8] sm:$0x80] }
 0x1c9   : > { %v2123_v14 = vrot.slane %v2031_v9, 7  ;;  %v2124_v62 = vrot.slane %v2033_v10, 7  ;;  %v2132_v37 = vrot.slane %v2035_v19, 7  ;;  %v1571_v4 = vadd.f32 %v1563_v29, %v1493_v55  ;;  %v3703_v10 = vld [vmem:[%s4411_s6 + $0x2d8] sm:$0x80]  ;;  %v2090_v63 = vpop.permute.xlu0 %2089 }
 0x1ca   : > { %v2133_v54 = vrot.slane %v2037_v59, 7  ;;  %v1676_v43 = vrot.slane %v1659_v15, 2  ;;  %v1673_v24 = vrot.slane %v1657_v50, 2  ;;  %v1573_v33 = vadd.f32 %v1563_v29, %v1495_v32 }
 0x1cb   : > { %v2125_v25 = vsel %vm2074_vm6, %v2123_v14, %v2124_v62  ;;  %v2020_v7 = vrot.slane %v6822_v44, %v6779_v20  ;;  %v3701_v20 = vld [vmem:[%s4411_s6 + $0x278] sm:$0x80]  ;;  %v1098_v56 = vmul.f32 %v3702_v23, %v5823_v48  ;;  %v3721_v44 = vld [vmem:[#allocation10 + $0x50] ss:$8 sps:$4 sm:$0xff] (%p328_p0)  }
 0x1cc   : > { %v2134_v17 = vsel %vm2074_vm6, %v2132_v37, %v2133_v54  ;;  %2150 = vst [vmem:[%s5937_s11] sm:$0xff] %v2125_v25  ;;  %v1677_v45 = vsel %vm889_vm7, %v1673_v24, %v1676_v43  ;;  %v1693_v28 = vadd.f32 %v1673_v24, %v1571_v4  ;;  %v706_v11 = vmul.f32 %v3701_v20, %v5722_v21  ;;  %v3704_v25 = vld [vmem:[#allocation10 + $0x4] ss:$8 sps:$4 sm:$0xff] (%p328_p0)   ;;  %v3707_v4 = vld [vmem:[#allocation10 + $0x14] ss:$8 sps:$4 sm:$0xff] (%p328_p0)   ;;  %v3709_v24 = vld [vmem:[#allocation10 + $0x10] ss:$8 sps:$4 sm:$0xff] (%p328_p0)  }
 0x1cd   : > { %2154 = vst [vmem:[%s5937_s11 + $0xc0] sm:$0xff] %v2134_v17  ;;  %v1695_v36 = vadd.f32 %v1677_v45, %v1573_v33  ;;  %v1489_v21 = vmul.f32 %v3703_v10, %v5887_v22  ;;  %v2030_v0 = vadd.f32 %v2020_v7, %v5928_v1  ;;  %v3706_v17 = vld [vmem:[#allocation10] ss:$8 sps:$4 sm:$0xff] (%p328_p0)   ;;  %v3991_v43 = vmov (%p328_p0), 0   ;;  %2506 = vmatprep.subr.bf16.mxu0 (%p328_p0), %v3704_v25  ;;  %v3710_v33 = vld [vmem:[#allocation10 + $0x24] ss:$8 sps:$4 sm:$0xff] (%p328_p0)  }
 0x1ce   : > { %v2024_v51 = vadd.f32 %v2020_v7, %v1693_v28  ;;  %v792_v58 = vadd.f32 %v782_v3, %v706_v11  ;;  %2651 = vmatprep.mubr.bf16.mxu1 (%p328_p0), %v3991_v43  ;;  %2507 = vmatpush1.bf16.msra.mxu0 (%p328_p0), %v3706_v17  ;;  %v3712_v45 = vld [vmem:[#allocation10 + $0x20] ss:$8 sps:$4 sm:$0xff] (%p328_p0)   ;;  %v3713_v28 = vld [vmem:[#allocation10 + $0x34] ss:$8 sps:$4 sm:$0xff] (%p328_p0)   ;;  %v3762_v11 = vld [vmem:[#allocation10 + $0x130] ss:$8 sps:$4 sm:$0xff] (%p328_p0)  }
 0x1cf   : > { %v2026_v13 = vadd.f32 %v2020_v7, %v1695_v36  ;;  %v2038_v55 = vmax.f32 %v2030_v0, 0.0  ;;  %2508 = vmatprep.subr.bf16.mxu0 (%p328_p0), %v3707_v4  ;;  %v3716_v36 = vld [vmem:[#allocation10 + $0x44] ss:$8 sps:$4 sm:$0xff] (%p328_p0)   ;;  %v3751_v0 = vld [vmem:[#allocation10 + $0xd0] ss:$8 sps:$4 sm:$0xff] (%p328_p0)  }
 0x1d0   : > { %v2032_v46 = vmax.f32 %v2024_v51, 0.0  ;;  %v915_v60 = vadd.f32 %v897_v6, %v792_v58  ;;  %v2103_v6 = vsel %vm131_vm0, %v2088_v40, %v2090_v63  ;;  %v3744_v51 = vld [vmem:[#allocation10 + $0x100] ss:$8 sps:$4 sm:$0xff] (%p328_p0)   ;;  %v3734_v10 = vld [vmem:[#allocation10 + $0xa4] ss:$8 sps:$4 sm:$0xff] (%p328_p0)  }
 0x1d1   : > { %v2034_v41 = vmax.f32 %v2026_v13, 0.0  ;;  %v3746_v13 = vld [vmem:[#allocation10 + $0x114] ss:$8 sps:$4 sm:$0xff] (%p328_p0)   ;;  %2620 = vmatpush1.bf16.msra.mxu1 (%p328_p0), %v3744_v51  ;;  %v3736_v63 = vld [vmem:[#allocation10 + $0xa0] ss:$8 sps:$4 sm:$0xff] (%p328_p0)  }
 0x1d2   : > { %v2111_v26 = vsel %vm131_vm0, %v2032_v46, %v2088_v40  ;;  %v1106_v2 = vadd.f32 %v1098_v56, %v915_v60  ;;  %2509 = vmatpush1.bf16.msra.mxu0 (%p328_p0), %v3709_v24  ;;  %v3750_v46 = vld [vmem:[#allocation10 + $0x110] ss:$8 sps:$4 sm:$0xff] (%p328_p0)   ;;  %2621 = vmatprep.subr.bf16.mxu1 (%p328_p0), %v3746_v13  ;;  %v3752_v40 = vld [vmem:[#allocation10 + $0x124] ss:$8 sps:$4 sm:$0xff] (%p328_p0)   ;;  %v3730_v56 = vld [vmem:[#allocation10 + $0x80] ss:$8 sps:$4 sm:$0xff] (%p328_p0)  }
 0x1d3   : > { %v2126_v57 = vrot.slane %v2111_v26, 7  ;;  %2510 = vmatprep.subr.bf16.mxu0 (%p328_p0), %v3710_v33  ;;  %v3725_v26 = vld [vmem:[#allocation10 + $0x74] ss:$8 sps:$4 sm:$0xff] (%p328_p0)  }
 0x1d4   : > { %v2092_v30 = vpop.permute.xlu1 %2091  ;;  %v1184_v47 = vadd.f32 %v1174_v49, %v1106_v2  ;;  %v2129_v49 = vrot.slane %v2103_v6, 7  ;;  %v3737_v6 = vld [vmem:[#allocation10 + $0xb4] ss:$8 sps:$4 sm:$0xff] (%p328_p0)  }
 0x1d5   : > { %v2112_v53 = vsel %vm131_vm0, %v2034_v41, %v2092_v30  ;;  %v3724_v41 = vld [vmem:[#allocation10 + $0x60] ss:$8 sps:$4 sm:$0xff] (%p328_p0)   ;;  %2622 = vmatpush1.bf16.msra.mxu1 (%p328_p0), %v3750_v46 }
 0x1d6   : > { %v2127_v18 = vrot.slane %v2112_v53, 7  ;;  %v1306_v9 = vadd.f32 %v1288_v27, %v1184_v47  ;;  %2511 = vmatpush1.bf16.msra.mxu0 (%p328_p0), %v3712_v45  ;;  %2623 = vmatprep.subr.bf16.mxu1 (%p328_p0), %v3752_v40  ;;  %v3758_v53 = vld [vmem:[#allocation10 + $0x134] ss:$8 sps:$4 sm:$0xff] (%p328_p0)  }
 0x1d7   :  { %2512 = vmatprep.subr.bf16.mxu0 (%p328_p0), %v3713_v28  ;;  %v3731_v47 = vld [vmem:[#allocation10 + $0x94] ss:$8 sps:$4 sm:$0xff] (%p328_p0)  }
 0x1d8   : > { %v2128_v42 = vsel %vm2074_vm6, %v2126_v57, %v2127_v18  ;;  %v1497_v19 = vadd.f32 %v1489_v21, %v1306_v9  ;;  %v3727_v18 = vld [vmem:[#allocation10 + $0x70] ss:$8 sps:$4 sm:$0xff] (%p328_p0)  }
 0x1d9   : > { %2151 = vst [vmem:[%s5937_s11 + $0x8] sm:$0xff] %v2128_v42  ;;  %v3728_v42 = vld [vmem:[#allocation10 + $0x84] ss:$8 sps:$4 sm:$0xff] (%p328_p0)   ;;  %v3733_v9 = vld [vmem:[#allocation10 + $0x90] ss:$8 sps:$4 sm:$0xff] (%p328_p0)  }
 0x1da   : > { %v1575_v8 = vadd.f32 %v1565_v31, %v1497_v19 }
 0x1dc   : > { %v1697_v48 = vadd.f32 %v1679_v34, %v1575_v8 }
 0x1de   : > { %v2028_v27 = vadd.f32 %v2020_v7, %v1697_v48  ;;  %v3715_v7 = vld [vmem:[#allocation10 + $0x30] ss:$8 sps:$4 sm:$0xff] (%p328_p0)   ;;  %v3742_v48 = vld [vmem:[#allocation10 + $0xc4] ss:$8 sps:$4 sm:$0xff] (%p328_p0)  }
 0x1df   :  { %2513 = vmatpush1.bf16.msra.mxu0 (%p328_p0), %v3715_v7 }
 0x1e0   : > { %v2036_v59 = vmax.f32 %v2028_v27, 0.0  ;;  %2514 = vmatprep.subr.bf16.mxu0 (%p328_p0), %v3716_v36  ;;  %v3748_v27 = vld [vmem:[#allocation10 + $0xd4] ss:$8 sps:$4 sm:$0xff] (%p328_p0)  }
 0x1e3   :  { %2515 = vmatpush1.bf16.msra.mxu0 (%p328_p0), %v3718_v38 }
 0x1e4   :  { %2516 = vmatprep.subr.bf16.mxu0 (%p328_p0), %v3719_v52 }
 0x1e7   :  { %2517 = vmatpush1.bf16.msra.mxu0 (%p328_p0), %v3721_v44 }
 0x1e9   : > { %v2096_v31 = vpop.permute.xlu0 %2095 }
 0x1ea   : > { %v2113_v16 = vsel %vm131_vm0, %v2036_v59, %v2096_v31  ;;  %v2105_v14 = vsel %vm131_vm0, %v2096_v31, %v2098_v39  ;;  %v3722_v39 = vld [vmem:[#allocation10 + $0x64] ss:$8 sps:$4 sm:$0xff] (%p328_p0)  }
 0x1eb   : > { %v2135_v12 = vrot.slane %v2113_v16, 7  ;;  %v2138_v1 = vrot.slane %v2105_v14, 7  ;;  %2518 = vmatprep.subr.bf16.mxu0 (%p328_p0), %v3722_v39  ;;  %v3754_v31 = vld [vmem:[#allocation10 + $0xe4] ss:$8 sps:$4 sm:$0xff] (%p328_p0)   ;;  %v3757_v16 = vld [vmem:[#allocation10 + $0xe0] ss:$8 sps:$4 sm:$0xff] (%p328_p0)  }
 0x1ec   :  { %2519 = vmatpush1.bf16.msra.mxu0 (%p328_p0), %v3724_v41 }
 0x1ed   :  { %2520 = vmatprep.subr.bf16.mxu0 (%p328_p0), %v3725_v26 }
 0x1f0   :  { %2521 = vmatpush1.bf16.msra.mxu0 (%p328_p0), %v3727_v18 }
 0x1f1   :  { %2522 = vmatprep.subr.bf16.mxu0 (%p328_p0), %v3728_v42 }
 0x1f4   :  { %2523 = vmatpush1.bf16.msra.mxu0 (%p328_p0), %v3730_v56 }
 0x1f5   :  { %2524 = vmatprep.subr.bf16.mxu0 (%p328_p0), %v3731_v47 }
 0x1f8   :  { %2525 = vmatpush1.bf16.msra.mxu0 (%p328_p0), %v3733_v9 }
 0x1f9   :  { %2526 = vmatprep.subr.bf16.mxu0 (%p328_p0), %v3734_v10 }
 0x1fc   :  { %2527 = vmatpush1.bf16.msra.mxu0 (%p328_p0), %v3736_v63 }
 0x1fd   :  { %2528 = vmatprep.subr.bf16.mxu0 (%p328_p0), %v3737_v6 }
 0x201   : > { %v2094_v3 = vpop.permute.xlu1 %2093 }
 0x202   : > { %v2104_v5 = vsel %vm131_vm0, %v2092_v30, %v2094_v3  ;;  %v3756_v30 = vld [vmem:[#allocation10 + $0x120] ss:$8 sps:$4 sm:$0xff] (%p328_p0)   ;;  %v3739_v3 = vld [vmem:[#allocation10 + $0xb0] ss:$8 sps:$4 sm:$0xff] (%p328_p0)  }
 0x203   : > { %v2130_v61 = vrot.slane %v2104_v5, 7  ;;  %2624 = vmatpush1.bf16.msra.mxu1 (%p328_p0), %v3756_v30  ;;  %2529 = vmatpush1.bf16.msra.mxu0 (%p328_p0), %v3739_v3 }
 0x204   :  { %2625 = vmatprep.subr.bf16.mxu1 (%p328_p0), %v3758_v53  ;;  %2530 = vmatprep.subr.bf16.mxu0 (%p328_p0), %v3742_v48 }
 0x205   : > { %v2131_v22 = vsel %vm2074_vm6, %v2129_v49, %v2130_v61  ;;  %v3745_v61 = vld [vmem:[#allocation10 + $0xc0] ss:$8 sps:$4 sm:$0xff] (%p328_p0)  }
 0x206   : > { %2153 = vst.msk [vmem:[%s5937_s11 + $0x10] sm:$0xff] %vm2152_vm8, %v2131_v22 }
 0x207   :  { %2626 = vmatpush1.bf16.msra.mxu1 (%p328_p0), %v3762_v11  ;;  %2531 = vmatpush1.bf16.msra.mxu0 (%p328_p0), %v3745_v61 }
 0x208   :  { %2532 = vmatprep.subr.bf16.mxu0 (%p328_p0), %v3748_v27 }
 0x20b   :  { %2533 = vmatpush1.bf16.msra.mxu0 (%p328_p0), %v3751_v0 }
 0x20c   :  { %2534 = vmatprep.subr.bf16.mxu0 (%p328_p0), %v3754_v31  ;;  %v3764_v31 = vld [vmem:[%s6251_s7 + $0x40] sm:$0xff] (%p328_p0)  }
 0x20d   :  { %3457 = vmatprep.subr.bf16.mxu1 (%p328_p0), %v3764_v31 }
 0x20f   :  { %2535 = vmatpush1.bf16.msra.mxu0 (%p328_p0), %v3757_v16  ;;  %v3767_v16 = vld [vmem:[%s6251_s7 + $0x8] sm:$0xff] (%p328_p0)  }
 0x211   : > { %v2100_v34 = vpop.permute.xlu0 %2099 }
 0x212   : > { %v2114_v29 = vsel %vm131_vm0, %v2038_v55, %v2100_v34 }
 0x213   : > { %v2136_v50 = vrot.slane %v2114_v29, 7  ;;  %v3760_v29 = vld [vmem:[#allocation10 + $0xf4] ss:$8 sps:$4 sm:$0xff] (%p328_p0)  }
 0x214   :  { %2536 = vmatprep.subr.bf16.mxu0 (%p328_p0), %v3760_v29  ;;  %v3769_v29 = vld [vmem:[%s6251_s7 + $0x10] sm:$0xff] (%p328_p0)  }
 0x215   : > { %v2137_v15 = vsel %vm2074_vm6, %v2135_v12, %v2136_v50  ;;  %v3763_v12 = vld [vmem:[#allocation10 + $0xf0] ss:$8 sps:$4 sm:$0xff] (%p328_p0)  }
 0x216   : > { %2155 = vst [vmem:[%s5937_s11 + $0xc8] sm:$0xff] %v2137_v15  ;;  %2537 = vmatpush1.bf16.msra.mxu0 (%p328_p0), %v3763_v12  ;;  %v3770_v12 = vld [vmem:[%s6251_s7 + $0x58] sm:$0xff] (%p328_p0)  }
 0x221   :  { %330 = sbr.rel (!%p328_p0) target bundleno = 208 (0xd0), region = 111 }
 0x222   : > { %v2102_v62 = vpop.permute.xlu1 %2101 }
 0x223   : > { %v2106_v37 = vsel %vm131_vm0, %v2100_v34, %v2102_v62 }
 0x224   : > { %v2139_v54 = vrot.slane %v2106_v37, 7 }
 0x226   : > { %v2140_v32 = vsel %vm2074_vm6, %v2138_v1, %v2139_v54 }
 0x227   : > { %2156 = vst.msk [vmem:[%s5937_s11 + $0xd0] sm:$0xff] %vm2152_vm8, %v2140_v32 }
 0x22e   :  { %v2158_v57 = vld [vmem:[#allocation3 + $0x8] sm:$0xff]  ;;  %v2161_v20 = vld [vmem:[#allocation3 + $0x20] sm:$0xff]  ;;  %v2159_v60 = vld [vmem:[#allocation3 + $0x10] sm:$0xff] }
 0x22f   :  { %v2206_v58 = vpack.c.bf16 %v2161_v20, %v2158_v57  ;;  %v2162_v23 = vld [vmem:[#allocation3 + $0x28] sm:$0xff]  ;;  %v2165_v21 = vld [vmem:[#allocation3 + $0x40] sm:$0xff]  ;;  %v2168_v19 = vld [vmem:[#allocation3 + $0x58] sm:$0xff] }
 0x230   :  { %v2207_v2 = vpack.c.bf16 %v2162_v23, %v2159_v60  ;;  %v2210_v8 = vpack.c.bf16 %v2168_v19, %v2165_v21  ;;  %v2171_v5 = vld [vmem:[#allocation3 + $0x70] sm:$0xff]  ;;  %v2174_v49 = vld [vmem:[#allocation3 + $0x88] sm:$0xff]  ;;  %v2177_v59 = vld [vmem:[#allocation3 + $0xa0] sm:$0xff] }
 0x231   :  { %2538 = vmatprep.mubr.bf16.mxu0 %v2206_v58  ;;  %v2213_v22 = vpack.c.bf16 %v2174_v49, %v2171_v5  ;;  %v2180_v55 = vld [vmem:[#allocation3 + $0xb8] sm:$0xff]  ;;  %v2157_v50 = vld [vmem:[#allocation3] sm:$0xff]  ;;  %v2167_v62 = vld [vmem:[#allocation3 + $0x50] sm:$0xff] }
 0x232   :  { %3427 = vmatmul.mubr.msk.bf16.vlgmr.msra.gmra.mrb[0].mxu1 %vm2152_vm8, %v2207_v2  ;;  %v2216_v34 = vpack.c.bf16 %v2180_v55, %v2177_v59  ;;  %v2160_v15 = vld [vmem:[#allocation3 + $0x18] sm:$0xff]  ;;  %v2183_v37 = vld [vmem:[#allocation3 + $0xd0] sm:$0xff]  ;;  %v2186_v1 = vld [vmem:[#allocation3 + $0xe8] sm:$0xff] }
 0x233   :  { %2661 = vmatprep.mubr.bf16.mxu1 %v3991_v43  ;;  %v2164_v14 = vld [vmem:[#allocation3 + $0x38] sm:$0xff]  ;;  %v2205_v54 = vpack.c.bf16 %v2160_v15, %v2157_v50  ;;  %v2219_v25 = vpack.c.bf16 %v2186_v1, %v2183_v37  ;;  %v2163_v17 = vld [vmem:[#allocation3 + $0x30] sm:$0xff]  ;;  %v2166_v4 = vld [vmem:[#allocation3 + $0x48] sm:$0xff] }
 0x234   :  { %v2209_v32 = vpack.c.bf16 %v2167_v62, %v2164_v14  ;;  %v2170_v24 = vld [vmem:[#allocation3 + $0x68] sm:$0xff]  ;;  %v2173_v33 = vld [vmem:[#allocation3 + $0x80] sm:$0xff]  ;;  %v2192_v28 = vld [vmem:[#allocation3 + $0x118] sm:$0xff]  ;;  %v2208_v7 = vpack.c.bf16 %v2166_v4, %v2163_v17  ;;  %v3992_v17 = vmov 0.0|0.0  }
 0x235   :  { %2539 = vmatmul.mubr.bf16.vlgmr.msra.gmra.mrb[0].mxu0 %v2205_v54  ;;  %v2189_v45 = vld [vmem:[#allocation3 + $0x100] sm:$0xff]  ;;  %v2212_v36 = vpack.c.bf16 %v2173_v33, %v2170_v24  ;;  %v2172_v35 = vld [vmem:[#allocation3 + $0x78] sm:$0xff]  ;;  %v2179_v51 = vld [vmem:[#allocation3 + $0xb0] sm:$0xff] }
 0x236   :  { %2548 = vmatprep.mubr.bf16.mxu0 %v2209_v32  ;;  %v2222_v38 = vpack.c.bf16 %v2192_v28, %v2189_v45  ;;  %v2169_v52 = vld [vmem:[#allocation3 + $0x60] sm:$0xff]  ;;  %v2176_v44 = vld [vmem:[#allocation3 + $0x98] sm:$0xff]  ;;  %v2195_v13 = vld [vmem:[#allocation3 + $0x130] sm:$0xff] }
 0x237   :  { %v2198_v39 = vld [vmem:[#allocation3 + $0x148] sm:$0xff]  ;;  %v2211_v46 = vpack.c.bf16 %v2172_v35, %v2169_v52  ;;  %v2215_v40 = vpack.c.bf16 %v2179_v51, %v2176_v44  ;;  %v2175_v26 = vld [vmem:[#allocation3 + $0x90] sm:$0xff]  ;;  %v2185_v57 = vld [vmem:[#allocation3 + $0xe0] sm:$0xff] }
 0x238   :  { %v2225_v41 = vpack.c.bf16 %v2198_v39, %v2195_v13  ;;  %v2178_v30 = vld [vmem:[#allocation3 + $0xa8] sm:$0xff]  ;;  %v2201_v18 = vld [vmem:[#allocation3 + $0x160] sm:$0xff]  ;;  %v2204_v42 = vld [vmem:[#allocation3 + $0x178] sm:$0xff] }
 0x239   :  { %v2182_v53 = vld [vmem:[#allocation3 + $0xc8] sm:$0xff]  ;;  %v2214_v20 = vpack.c.bf16 %v2178_v30, %v2175_v26  ;;  %v2228_v58 = vpack.c.bf16 %v2204_v42, %v2201_v18  ;;  %v2181_v60 = vld [vmem:[#allocation3 + $0xc0] sm:$0xff]  ;;  %v2184_v23 = vld [vmem:[#allocation3 + $0xd8] sm:$0xff] }
 0x23a   :  { %3428 = vmatmul.mubr.msk.bf16.gmra.mrb[4].mxu1 %vm2152_vm8, %v2210_v8  ;;  %v2218_v11 = vpack.c.bf16 %v2185_v57, %v2182_v53  ;;  %v2188_v56 = vld [vmem:[#allocation3 + $0xf8] sm:$0xff]  ;;  %v2191_v2 = vld [vmem:[#allocation3 + $0x110] sm:$0xff]  ;;  %v2217_v47 = vpack.c.bf16 %v2184_v23, %v2181_v60  ;;  %v2190_v21 = vld [vmem:[#allocation3 + $0x108] sm:$0xff] }
 0x23b   :  { %2671 = vmatprep.mubr.bf16.mxu1 %v3991_v43  ;;  %v2221_v9 = vpack.c.bf16 %v2191_v2, %v2188_v56  ;;  %v2187_v10 = vld [vmem:[#allocation3 + $0xf0] sm:$0xff]  ;;  %v2197_v19 = vld [vmem:[#allocation3 + $0x140] sm:$0xff]  ;;  %v2196_v3 = vld [vmem:[#allocation3 + $0x138] sm:$0xff] }
 0x23c   :  { %v2220_v63 = vpack.c.bf16 %v2190_v21, %v2187_v10  ;;  %v2193_v6 = vld [vmem:[#allocation3 + $0x120] sm:$0xff]  ;;  %v2200_v48 = vld [vmem:[#allocation3 + $0x158] sm:$0xff]  ;;  %v2203_v5 = vld [vmem:[#allocation3 + $0x170] sm:$0xff] }
 0x23d   :  { %2549 = vmatmul.mubr.bf16.gmra.mrb[4].mxu0 %v2208_v7  ;;  %v2223_v49 = vpack.c.bf16 %v2196_v3, %v2193_v6  ;;  %v2227_v61 = vpack.c.bf16 %v2203_v5, %v2200_v48  ;;  %v2199_v27 = vld [vmem:[#allocation3 + $0x150] sm:$0xff]  ;;  %v3765_v59 = vld [vmem:[%s6251_s7] sm:$0xff]   ;;  %v3766_v55 = vld [vmem:[%s6251_s7 + $0x48] sm:$0xff]  }
 0x23e   :  { %2558 = vmatprep.mubr.bf16.mxu0 %v2212_v36  ;;  %3458 = vmatpush3.bf16.msra.mxu1 %v3765_v59  ;;  %v3771_v50 = vld [vmem:[%s6251_s7 + $0x18] sm:$0xff]   ;;  %v3772_v15 = vld [vmem:[%s6251_s7 + $0x60] sm:$0xff]   ;;  %v3774_v62 = vld [vmem:[%s6251_s7 + $0x68] sm:$0xff]  }
 0x23f   :  { %3459 = vmatprep.subr.bf16.mxu1 %v3766_v55  ;;  %v3773_v14 = vld [vmem:[%s6251_s7 + $0x20] sm:$0xff]   ;;  %v3775_v37 = vld [vmem:[%s6251_s7 + $0x28] sm:$0xff]   ;;  %v3776_v1 = vld [vmem:[%s6251_s7 + $0x70] sm:$0xff]  }
 0x240   :  { %v3777_v54 = vld [vmem:[%s6251_s7 + $0x30] sm:$0xff]   ;;  %v3778_v32 = vld [vmem:[%s6251_s7 + $0x78] sm:$0xff]   ;;  %v6824_v53 = vld [vmem:[#allocation39_spill] sm:$0xff] }
 0x241   :  { %v2269_v39 = vld [vmem:[#allocation12] sm:$0x3] }
 0x242   :  { %3429 = vmatmul.mubr.msk.bf16.gmra.mrb[8].mxu1 %vm2152_vm8, %v2213_v22  ;;  %v2202_v22 = vld [vmem:[#allocation3 + $0x168] sm:$0xff]  ;;  %v6823_v26 = vld [vmem:[#allocation38_spill] sm:$0xff]  ;;  %v6069_v57 = vrot.slane %v2269_v39, %v6824_v53 }
 0x243   :  { %2681 = vmatprep.mubr.bf16.mxu1 %v3991_v43  ;;  %v2226_v0 = vpack.c.bf16 %v2202_v22, %v2199_v27  ;;  %3460 = vmatpush3.bf16.msra.mxu1 %v3767_v16  ;;  %v6066_v30 = vrot.slane %v2269_v39, %v6823_v26 }
 0x245   :  { %2559 = vmatmul.mubr.bf16.gmra.mrb[8].mxu0 %v2211_v46 }
 0x246   :  { %2568 = vmatprep.mubr.bf16.mxu0 %v2215_v40 }
 0x24a   :  { %3430 = vmatmul.mubr.msk.bf16.gmra.mrb[12].mxu1 %vm2152_vm8, %v2216_v34  ;;  %v3768_v34 = vld [vmem:[%s6251_s7 + $0x50] sm:$0xff]  }
 0x24b   :  { %2691 = vmatprep.mubr.bf16.mxu1 %v3991_v43  ;;  %3461 = vmatprep.subr.bf16.mxu1 %v3768_v34 }
 0x24c   :  { %3462 = vmatpush3.bf16.msra.mxu1 %v3769_v29 }
 0x24d   :  { %2569 = vmatmul.mubr.bf16.gmra.mrb[12].mxu0 %v2214_v20  ;;  %3463 = vmatprep.subr.bf16.mxu1 %v3770_v12 }
 0x24e   :  { %2578 = vmatprep.mubr.bf16.mxu0 %v2218_v11 }
 0x250   :  { %3464 = vmatpush3.bf16.msra.mxu1 %v3771_v50 }
 0x251   :  { %3465 = vmatprep.subr.bf16.mxu1 %v3772_v15 }
 0x252   :  { %3431 = vmatmul.mubr.msk.bf16.gmra.mrb[16].mxu1 %vm2152_vm8, %v2219_v25  ;;  %v3779_v25 = vld [vmem:[%s6251_s7 + $0x38] sm:$0xff]  }
 0x253   :  { %2701 = vmatprep.mubr.bf16.mxu1 %v3991_v43 }
 0x254   :  { %3466 = vmatpush3.bf16.msra.mxu1 %v3773_v14 }
 0x255   :  { %2579 = vmatmul.mubr.bf16.gmra.mrb[16].mxu0 %v2217_v47  ;;  %3467 = vmatprep.subr.bf16.mxu1 %v3774_v62 }
 0x256   :  { %2588 = vmatprep.mubr.bf16.mxu0 %v2221_v9 }
 0x258   :  { %3468 = vmatpush3.bf16.msra.mxu1 %v3775_v37 }
 0x259   :  { %3469 = vmatprep.subr.bf16.mxu1 %v3776_v1 }
 0x25a   :  { %3432 = vmatmul.mubr.msk.bf16.gmra.mrb[20].mxu1 %vm2152_vm8, %v2222_v38 }
 0x25b   :  { %2711 = vmatprep.mubr.bf16.mxu1 %v3991_v43 }
 0x25c   :  { %3470 = vmatpush3.bf16.msra.mxu1 %v3777_v54 }
 0x25d   :  { %2589 = vmatmul.mubr.bf16.gmra.mrb[20].mxu0 %v2220_v63  ;;  %3471 = vmatprep.subr.bf16.mxu1 %v3778_v32 }
 0x260   :  { %3472 = vmatpush3.bf16.msra.mxu1 %v3779_v25 }
 0x261   :  { %3547 = vmatprep.subr.bf16.mxu1 %v3992_v17 }
 0x262   :  { %3433 = vmatmul.mubr.msk.bf16.gmra.mrb[24].mxu1 %vm2152_vm8, %v2225_v41 }
 0x263   :  { %2721 = vmatprep.mubr.bf16.mxu1 %v3991_v43  ;;  %v2194_v43 = vld [vmem:[#allocation3 + $0x128] sm:$0xff] }
 0x264   :  { %v2224_v8 = vpack.c.bf16 %v2197_v19, %v2194_v43 }
 0x266   :  { %2598 = vmatprep.mubr.bf16.mxu0 %v2224_v8 }
 0x267   :  { %2599 = vmatmul.mubr.bf16.gmra.mrb[24].mxu0 %v2223_v49 }
 0x268   :  { %2608 = vmatprep.mubr.bf16.mxu0 %v2227_v61 }
 0x26a   :  { %3434 = vmatmul.mubr.msk.bf16.gmra.mrb[28].mxu1 %vm2152_vm8, %v2228_v58 }
 0x26f   :  { %2609 = vmatmul.mubr.bf16.gmra.mrb[28].mxu0 %v2226_v0 }
 0x305   :  { %v2653_v4 = vpop.f32.mrb[0].mxu1 }
 0x306   :  { %v2655_v24 = vpop.f32.mrb[1].mxu1 }
 0x307   :  { %v2657_v33 = vpop.f32.mrb[2].mxu1 }
 0x308   :  { %v2659_v45 = vpop.f32.mrb[3].mxu1  ;;  %v2540_v18 = vpop.f32.mrb[0].mxu0 }
 0x309   :  { %v2541_v42 = vadd.f32 %v2540_v18, %v6066_v30  ;;  %v2542_v20 = vpop.f32.mrb[1].mxu0 }
 0x30a   :  { %v2543_v58 = vadd.f32 %v2542_v20, %v6069_v57  ;;  %v2544_v60 = vpop.f32.mrb[2].mxu0 }
 0x30b   :  { %v2654_v56 = vadd.f32 %v2653_v4, %v2541_v42  ;;  %v2545_v2 = vadd.f32 %v2544_v60, %v6066_v30  ;;  %v2546_v47 = vpop.f32.mrb[3].mxu0 }
 0x30c   :  { %v2656_v10 = vadd.f32 %v2655_v24, %v2543_v58  ;;  %v2547_v21 = vadd.f32 %v2546_v47, %v6069_v57 }
 0x30d   :  { %v2663_v28 = vpop.f32.mrb[4].mxu1  ;;  %v2658_v19 = vadd.f32 %v2657_v33, %v2545_v2  ;;  %v2732_v8 = vmax.f32 %v2654_v56, 0.0 }
 0x30e   :  { %v2665_v7 = vpop.f32.mrb[5].mxu1  ;;  %v2660_v63 = vadd.f32 %v2659_v45, %v2547_v21  ;;  %v2733_v3 = vmax.f32 %v2656_v10, 0.0 }
 0x30f   :  { %v2667_v36 = vpop.f32.mrb[6].mxu1  ;;  %v2734_v6 = vmax.f32 %v2658_v19, 0.0 }
 0x310   :  { %v2669_v38 = vpop.f32.mrb[7].mxu1  ;;  %v2735_v48 = vmax.f32 %v2660_v63, 0.0  ;;  %v2550_v5 = vpop.f32.mrb[4].mxu0 }
 0x311   :  { %v2764_v49 = vadd.f32 %v2734_v6, %v2732_v8  ;;  %v2551_v61 = vadd.f32 %v2550_v5, %v6066_v30  ;;  %v2552_v27 = vpop.f32.mrb[5].mxu0 }
 0x312   :  { %v2777_v0 = vadd.f32 %v2735_v48, %v2733_v3  ;;  %v2553_v31 = vadd.f32 %v2552_v27, %v6069_v57  ;;  %v2554_v59 = vpop.f32.mrb[6].mxu0 }
 0x313   :  { %v2664_v16 = vadd.f32 %v2663_v28, %v2551_v61  ;;  %v2555_v34 = vadd.f32 %v2554_v59, %v6066_v30  ;;  %v2556_v29 = vpop.f32.mrb[7].mxu0 }
 0x314   :  { %v2666_v50 = vadd.f32 %v2665_v7, %v2553_v31  ;;  %v2557_v15 = vadd.f32 %v2556_v29, %v6069_v57 }
 0x315   :  { %v6049_v52 = vpop.f32.mrb[8].mxu1  ;;  %v2736_v62 = vmax.f32 %v2664_v16, 0.0  ;;  %v2668_v37 = vadd.f32 %v2667_v36, %v2555_v34 }
 0x316   :  { %v6051_v35 = vpop.f32.mrb[9].mxu1  ;;  %v2737_v1 = vmax.f32 %v2666_v50, 0.0  ;;  %v2670_v54 = vadd.f32 %v2669_v38, %v2557_v15 }
 0x317   :  { %v6053_v44 = vpop.f32.mrb[10].mxu1  ;;  %v2765_v32 = vadd.f32 %v2764_v49, %v2736_v62  ;;  %v2738_v25 = vmax.f32 %v2668_v37, 0.0 }
 0x318   :  { %v6055_v51 = vpop.f32.mrb[11].mxu1  ;;  %v2778_v4 = vadd.f32 %v2777_v0, %v2737_v1  ;;  %v2739_v24 = vmax.f32 %v2670_v54, 0.0  ;;  %v2560_v33 = vpop.f32.mrb[8].mxu0 }
 0x319   :  { %v2766_v45 = vadd.f32 %v2765_v32, %v2738_v25  ;;  %v2561_v28 = vadd.f32 %v2560_v33, %v6066_v30  ;;  %v2562_v39 = vpop.f32.mrb[9].mxu0 }
 0x31a   :  { %v2779_v7 = vadd.f32 %v2778_v4, %v2739_v24  ;;  %v2563_v53 = vadd.f32 %v2562_v39, %v6069_v57  ;;  %v2564_v18 = vpop.f32.mrb[10].mxu0 }
 0x31b   :  { %v2674_v36 = vadd.f32 %v6049_v52, %v2561_v28  ;;  %v2565_v38 = vadd.f32 %v2564_v18, %v6066_v30  ;;  %v2566_v20 = vpop.f32.mrb[11].mxu0 }
 0x31c   :  { %v2676_v60 = vadd.f32 %v6051_v35, %v2563_v53  ;;  %v2567_v56 = vadd.f32 %v2566_v20, %v6069_v57 }
 0x31d   :  { %v6057_v13 = vpop.f32.mrb[12].mxu1  ;;  %v2740_v47 = vmax.f32 %v2674_v36, 0.0  ;;  %v2678_v10 = vadd.f32 %v6053_v44, %v2565_v38 }
 0x31e   :  { %v6059_v46 = vpop.f32.mrb[13].mxu1  ;;  %v2741_v21 = vmax.f32 %v2676_v60, 0.0  ;;  %v2680_v19 = vadd.f32 %v6055_v51, %v2567_v56 }
 0x31f   :  { %v6061_v40 = vpop.f32.mrb[14].mxu1  ;;  %v2767_v63 = vadd.f32 %v2766_v45, %v2740_v47  ;;  %v2742_v8 = vmax.f32 %v2678_v10, 0.0 }
 0x320   :  { %v6063_v41 = vpop.f32.mrb[15].mxu1  ;;  %v2780_v52 = vadd.f32 %v2779_v7, %v2741_v21  ;;  %v2743_v6 = vmax.f32 %v2680_v19, 0.0  ;;  %v2570_v3 = vpop.f32.mrb[12].mxu0 }
 0x321   :  { %v2768_v48 = vadd.f32 %v2767_v63, %v2742_v8  ;;  %v2571_v5 = vadd.f32 %v2570_v3, %v6066_v30  ;;  %v2572_v49 = vpop.f32.mrb[13].mxu0 }
 0x322   :  { %v2781_v61 = vadd.f32 %v2780_v52, %v2743_v6  ;;  %v2573_v27 = vadd.f32 %v2572_v49, %v6069_v57  ;;  %v2574_v0 = vpop.f32.mrb[14].mxu0 }
 0x323   :  { %v2684_v44 = vadd.f32 %v6057_v13, %v2571_v5  ;;  %v2575_v51 = vadd.f32 %v2574_v0, %v6066_v30  ;;  %v2576_v59 = vpop.f32.mrb[15].mxu0 }
 0x324   :  { %v2686_v34 = vadd.f32 %v6059_v46, %v2573_v27  ;;  %v2577_v29 = vadd.f32 %v2576_v59, %v6069_v57 }
 0x325   :  { %v6072_v11 = vpop.f32.mrb[16].mxu1  ;;  %v2744_v15 = vmax.f32 %v2684_v44, 0.0  ;;  %v2688_v62 = vadd.f32 %v6061_v40, %v2575_v51 }
 0x326   :  { %v6075_v23 = vpop.f32.mrb[17].mxu1  ;;  %v2745_v37 = vmax.f32 %v2686_v34, 0.0  ;;  %v2690_v1 = vadd.f32 %v6063_v41, %v2577_v29 }
 0x327   :  { %v6078_v9 = vpop.f32.mrb[18].mxu1  ;;  %v2769_v54 = vadd.f32 %v2768_v48, %v2744_v15  ;;  %v2746_v32 = vmax.f32 %v2688_v62, 0.0 }
 0x328   :  { %v6081_v43 = vpop.f32.mrb[19].mxu1  ;;  %v2782_v13 = vadd.f32 %v2781_v61, %v2745_v37  ;;  %v2747_v25 = vmax.f32 %v2690_v1, 0.0  ;;  %v2580_v4 = vpop.f32.mrb[16].mxu0 }
 0x329   :  { %v2770_v24 = vadd.f32 %v2769_v54, %v2746_v32  ;;  %v2581_v33 = vadd.f32 %v2580_v4, %v6066_v30  ;;  %v2582_v45 = vpop.f32.mrb[17].mxu0 }
 0x32a   :  { %v2783_v46 = vadd.f32 %v2782_v13, %v2747_v25  ;;  %v2583_v28 = vadd.f32 %v2582_v45, %v6069_v57  ;;  %v2584_v39 = vpop.f32.mrb[18].mxu0 }
 0x32b   :  { %v2694_v7 = vadd.f32 %v6072_v11, %v2581_v33  ;;  %v2585_v40 = vadd.f32 %v2584_v39, %v6066_v30  ;;  %v2586_v53 = vpop.f32.mrb[19].mxu0  ;;  %v2771_v37 = vrot.slane %v2770_v24, 4 }
 0x32c   :  { %v2696_v41 = vadd.f32 %v6075_v23, %v2583_v28  ;;  %v2587_v18 = vadd.f32 %v2586_v53, %v6069_v57 }
 0x32d   :  { %v6084_v22 = vpop.f32.mrb[20].mxu1  ;;  %v2698_v36 = vadd.f32 %v6078_v9, %v2585_v40  ;;  %v2748_v20 = vmax.f32 %v2694_v7, 0.0  ;;  %v2772_v28 = vadd.f32 %v2771_v37, %v2770_v24 }
 0x32e   :  { %v6087_v55 = vpop.f32.mrb[21].mxu1  ;;  %v2700_v38 = vadd.f32 %v6081_v43, %v2587_v18  ;;  %v2749_v56 = vmax.f32 %v2696_v41, 0.0 }
 0x32f   :  { %v6090_v12 = vpop.f32.mrb[22].mxu1  ;;  %v2750_v60 = vmax.f32 %v2698_v36, 0.0 }
 0x330   :  { %v6093_v14 = vpop.f32.mrb[23].mxu1  ;;  %v2751_v47 = vmax.f32 %v2700_v38, 0.0  ;;  %v2590_v10 = vpop.f32.mrb[20].mxu0 }
 0x331   :  { %v2790_v21 = vadd.f32 %v2750_v60, %v2748_v20  ;;  %v2591_v19 = vadd.f32 %v2590_v10, %v6066_v30  ;;  %v2592_v11 = vpop.f32.mrb[21].mxu0 }
 0x332   :  { %v2803_v63 = vadd.f32 %v2751_v47, %v2749_v56  ;;  %v2593_v8 = vadd.f32 %v2592_v11, %v6069_v57  ;;  %v2594_v52 = vpop.f32.mrb[22].mxu0  ;;  %v2773_v56 = vrot.slane %v2772_v28, 2 }
 0x333   :  { %v2704_v23 = vadd.f32 %v6084_v22, %v2591_v19  ;;  %v2595_v6 = vadd.f32 %v2594_v52, %v6066_v30  ;;  %v2596_v9 = vpop.f32.mrb[23].mxu0 }
 0x334   :  { %v2706_v43 = vadd.f32 %v6087_v55, %v2593_v8  ;;  %v2597_v3 = vadd.f32 %v2596_v9, %v6069_v57  ;;  %v2774_v8 = vadd.f32 %v2773_v56, %v2772_v28  ;;  %v3025_v56 = vld [vmem:[%s6253_s9 + $0x40] sm:$0xff] }
 0x335   :  { %v6096_v26 = vpop.f32.mrb[24].mxu1  ;;  %v2752_v48 = vmax.f32 %v2704_v23, 0.0  ;;  %v2708_v5 = vadd.f32 %v6090_v12, %v2595_v6 }
 0x336   :  { %v6099_v42 = vpop.f32.mrb[25].mxu1  ;;  %v2753_v49 = vmax.f32 %v2706_v43, 0.0  ;;  %v2710_v61 = vadd.f32 %v6093_v14, %v2597_v3  ;;  %v2784_v14 = vrot.slane %v2783_v46, 4  ;;  %v2775_v3 = vrot.slane %v2774_v8, 1 }
 0x337   :  { %v6103_v58 = vpop.f32.mrb[26].mxu1  ;;  %v2791_v27 = vadd.f32 %v2790_v21, %v2752_v48  ;;  %v2754_v0 = vmax.f32 %v2708_v5, 0.0 }
 0x338   :  { %v6107_v2 = vpop.f32.mrb[27].mxu1  ;;  %v2804_v44 = vadd.f32 %v2803_v63, %v2753_v49  ;;  %v2755_v51 = vmax.f32 %v2710_v61, 0.0  ;;  %v2785_v40 = vadd.f32 %v2784_v14, %v2783_v46  ;;  %v2776_v61 = vadd.f32 %v2775_v3, %v2774_v8  ;;  %v3115_v3 = vld [vmem:[%s6254_s10 + $0x20] sm:$0xff] }
 0x339   :  { %v2792_v34 = vadd.f32 %v2791_v27, %v2754_v0 }
 0x33a   :  { %v2600_v59 = vpop.f32.mrb[24].mxu0  ;;  %v2805_v15 = vadd.f32 %v2804_v44, %v2755_v51  ;;  %v2786_v47 = vrot.slane %v2785_v40, 2  ;;  %v2817_v51 = vmul.f32 0.015625, %v2776_v61  ;;  %v3119_v61 = vld [vmem:[%s6254_s10 + $0x40] sm:$0xff] }
 0x33b   :  { %v2601_v22 = vadd.f32 %v2600_v59, %v6066_v30  ;;  %v2602_v29 = vpop.f32.mrb[25].mxu0 }
 0x33c   :  { %v2603_v55 = vadd.f32 %v2602_v29, %v6069_v57  ;;  %v2604_v62 = vpop.f32.mrb[26].mxu0  ;;  %v2787_v6 = vadd.f32 %v2786_v47, %v2785_v40 }
 0x33d   :  { %v6112_v35 = vpop.f32.mrb[28].mxu1  ;;  %v2714_v1 = vadd.f32 %v6096_v26, %v2601_v22  ;;  %v2605_v12 = vadd.f32 %v2604_v62, %v6066_v30  ;;  %v2606_v54 = vpop.f32.mrb[27].mxu0 }
 0x33e   :  { %v6115_v31 = vpop.f32.mrb[29].mxu1  ;;  %v2716_v32 = vadd.f32 %v6099_v42, %v2603_v55  ;;  %v2607_v13 = vadd.f32 %v2606_v54, %v6069_v57  ;;  %v2788_v5 = vrot.slane %v2787_v6, 1  ;;  %v2821_v55 = vpack.c.bf16 %v2817_v51, %v2817_v51 }
 0x33f   :  { %v6119_v16 = vpop.f32.mrb[30].mxu1  ;;  %v2756_v25 = vmax.f32 %v2714_v1, 0.0  ;;  %v2718_v4 = vadd.f32 %v6103_v58, %v2605_v12 }
 0x340   :  { %v6123_v50 = vpop.f32.mrb[31].mxu1  ;;  %v2757_v33 = vmax.f32 %v2716_v32, 0.0  ;;  %v2720_v45 = vadd.f32 %v6107_v2, %v2607_v13  ;;  %v2789_v0 = vadd.f32 %v2788_v5, %v2787_v6  ;;  %v2868_v14 = vunpack.c.l.b16 %v2821_v55  ;;  %v3112_v6 = vld [vmem:[%s6254_s10 + $0x8] sm:$0xff] }
 0x341   :  { %v2793_v39 = vadd.f32 %v2792_v34, %v2756_v25  ;;  %v2758_v7 = vmax.f32 %v2718_v4, 0.0  ;;  %v3017_v4 = vld [vmem:[%s6253_s9] sm:$0xff] }
 0x342   :  { %v2806_v53 = vadd.f32 %v2805_v15, %v2757_v33  ;;  %v2759_v26 = vmax.f32 %v2720_v45, 0.0  ;;  %v2610_v41 = vpop.f32.mrb[28].mxu0  ;;  %v2818_v22 = vmul.f32 0.015625, %v2789_v0  ;;  %v3018_v33 = vld [vmem:[%s6253_s9 + $0x8] sm:$0xff] }
 0x343   :  { %v2794_v18 = vadd.f32 %v2793_v39, %v2758_v7  ;;  %v2611_v36 = vadd.f32 %v2610_v41, %v6066_v30  ;;  %v2612_v38 = vpop.f32.mrb[29].mxu0  ;;  %v3548_v7 = vpack.c.bf16 %v3018_v33, %v3017_v4 }
 0x344   :  { %v2807_v42 = vadd.f32 %v2806_v53, %v2759_v26  ;;  %v2613_v20 = vadd.f32 %v2612_v38, %v6069_v57  ;;  %v2614_v60 = vpop.f32.mrb[30].mxu0  ;;  %v2822_v1 = vpack.c.bf16 %v2818_v22, %v2818_v22  ;;  %v3019_v53 = vld [vmem:[%s6253_s9 + $0x10] sm:$0xff]  ;;  %v3020_v26 = vld [vmem:[%s6253_s9 + $0x18] sm:$0xff] }
 0x345   :  { %v2724_v58 = vadd.f32 %v6112_v35, %v2611_v36  ;;  %v2615_v2 = vadd.f32 %v2614_v60, %v6066_v30  ;;  %v2616_v24 = vpop.f32.mrb[31].mxu0  ;;  %v3551_v41 = vpack.c.bf16 %v3020_v26, %v3019_v53  ;;  %v3022_v36 = vld [vmem:[%s6253_s9 + $0x28] sm:$0xff] }
 0x346   :  { %v2726_v46 = vadd.f32 %v6115_v31, %v2613_v20  ;;  %v2617_v10 = vadd.f32 %v2616_v24, %v6069_v57  ;;  %v2869_v13 = vunpack.c.l.b16 %v2822_v1  ;;  %v3024_v20 = vld [vmem:[%s6253_s9 + $0x38] sm:$0xff]  ;;  %v6825_v24 = vmov 0.0  }
 0x347   :  { %v2760_v21 = vmax.f32 %v2724_v58, 0.0  ;;  %v2728_v19 = vadd.f32 %v6119_v16, %v2615_v2  ;;  %v3026_v58 = vld [vmem:[%s6253_s9 + $0x48] sm:$0xff] }
 0x348   :  { %v2761_v11 = vmax.f32 %v2726_v46, 0.0  ;;  %v2730_v63 = vadd.f32 %v6123_v50, %v2617_v10  ;;  %v3560_v2 = vpack.c.bf16 %v3026_v58, %v3025_v56  ;;  %v3435_v46 = vld [vmem:[#allocation13] ss:$0 sm:$0xff] }
 0x349   :  { %v2795_v52 = vadd.f32 %v2794_v18, %v2760_v21  ;;  %v2762_v23 = vmax.f32 %v2728_v19, 0.0  ;;  %v3021_v18 = vld [vmem:[%s6253_s9 + $0x20] sm:$0xff] }
 0x34a   :  { %v2808_v9 = vadd.f32 %v2807_v42, %v2761_v11  ;;  %v2763_v35 = vmax.f32 %v2730_v63, 0.0  ;;  %v3554_v38 = vpack.c.bf16 %v3022_v36, %v3021_v18  ;;  %v3023_v42 = vld [vmem:[%s6253_s9 + $0x30] sm:$0xff] }
 0x34b   :  { %v2796_v43 = vadd.f32 %v2795_v52, %v2762_v23  ;;  %v3557_v60 = vpack.c.bf16 %v3024_v20, %v3023_v42  ;;  %v3111_v23 = vld [vmem:[%s6254_s10] sm:$0xff] }
 0x34c   :  { %v2809_v30 = vadd.f32 %v2808_v9, %v2763_v35  ;;  %v3563_v9 = vpack.c.bf16 %v3112_v6, %v3111_v23  ;;  %v3113_v35 = vld [vmem:[%s6254_s10 + $0x10] sm:$0xff] }
 0x34d   :  { %v2797_v48 = vrot.slane %v2796_v43, 4 }
 0x34e   :  { %v2810_v31 = vrot.slane %v2809_v30, 4 }
 0x34f   :  { %v2798_v49 = vadd.f32 %v2797_v48, %v2796_v43  ;;  %v3114_v43 = vld [vmem:[%s6254_s10 + $0x18] sm:$0xff]  ;;  %v3116_v48 = vld [vmem:[%s6254_s10 + $0x28] sm:$0xff] }
 0x350   :  { %v2811_v57 = vadd.f32 %v2810_v31, %v2809_v30  ;;  %v3566_v30 = vpack.c.bf16 %v3114_v43, %v3113_v35  ;;  %v3569_v5 = vpack.c.bf16 %v3116_v48, %v3115_v3  ;;  %v3117_v31 = vld [vmem:[%s6254_s10 + $0x30] sm:$0xff] }
 0x351   :  { %v2799_v27 = vrot.slane %v2798_v49, 2 }
 0x352   :  { %v2812_v16 = vrot.slane %v2811_v57, 2 }
 0x353   :  { %v2800_v44 = vadd.f32 %v2799_v27, %v2798_v49  ;;  %v3118_v49 = vld [vmem:[%s6254_s10 + $0x38] sm:$0xff]  ;;  %v3120_v27 = vld [vmem:[%s6254_s10 + $0x48] sm:$0xff]  ;;  %s3994_s10 = smov [#allocation16]  }
 0x354   :  { %v2813_v50 = vadd.f32 %v2812_v16, %v2811_v57  ;;  %v3572_v57 = vpack.c.bf16 %v3118_v49, %v3117_v31  ;;  %v3575_v16 = vpack.c.bf16 %v3120_v27, %v3119_v61  ;;  %s3208_s13 = sshll.u32 %s3994_s10, 4  ;;  %s3209_s13 = int_to_ptr.vmem [resolvable:$true] %s3208_s13 }
 0x355   :  { %v2801_v59 = vrot.slane %v2800_v44, 1  ;;  %s3938_s14 = scalar_lea.vmem %s3209_s13, 32  ;;  %p3943_p2 = scmp.lt.s32.totalorder %s3209_s13, %s3209_s13 }
 0x356   :  { %v2814_v34 = vrot.slane %v2813_v50, 1  ;;  %p3939_p1 = scmp.ne.s32.totalorder %s3209_s13, %s3938_s14  ;;  %p3944_p3 = scmp.lt.s32.totalorder %s3938_s14, %s3938_s14 }
 0x357   :  { %v2802_v29 = vadd.f32 %v2801_v59, %v2800_v44 }
 0x358   :  { %v2815_v15 = vadd.f32 %v2814_v34, %v2813_v50  ;;  %p3945_p4 = por %p3944_p3, %p3943_p2 }
 0x359   :  { %v2819_v62 = vmul.f32 0.015625, %v2802_v29 }
 0x35a   :  { %v2820_v37 = vmul.f32 0.015625, %v2815_v15  ;;  %p3946_p5 = pnand %p3945_p4, %p3939_p1 }
 0x35b   :  { %v2823_v12 = vpack.c.bf16 %v2819_v62, %v2819_v62  ;;  %v3453_v62 = vld [vmem:[#allocation15] ss:$0 sm:$0xff] }
 0x35c   :  { %v2824_v54 = vpack.c.bf16 %v2820_v37, %v2820_v37 }
 0x35d   :  { %v2870_v32 = vunpack.c.l.b16 %v2823_v12 }
 0x35e   :  { %v2871_v25 = vunpack.c.l.b16 %v2824_v54 }
 0x35f   :  { %v2873_v45 = vsel %vm2872_vm9, %v2870_v32, %v2868_v14 }
 0x360   :  { %v2874_v28 = vsel %vm2872_vm9, %v2871_v25, %v2869_v13  ;;  %v2875_v40 = vpack.c.b16 %v2873_v45, %v2873_v45 }
 0x361   :  { %v2876_v39 = vpack.c.b16 %v2874_v28, %v2874_v28 }
 0x363   :  { %3007 = vmatprep.mubr.bf16.mxu1 %v2876_v39 }
 0x364   :  { %3008 = vmatmul.mubr.bf16.vlgmr.msra.gmra.mrb[32].mxu1 %v2875_v40 }
 0x365   :  { %3549 = vmatpush3.bf16.msra.mxu1 %v3548_v7  ;;  %3521 = vmatprep.mubr.msk.f32.mxu1 %vm3993_vm10, %v6825_v24 }
 0x366   :  { %3550 = vmatprep.subr.bf16.mxu1 %v3992_v17 }
 0x369   :  { %3552 = vmatpush3.bf16.msra.mxu1 %v3551_v41 }
 0x36a   :  { %3553 = vmatprep.subr.bf16.mxu1 %v3992_v17 }
 0x36d   :  { %3555 = vmatpush3.bf16.msra.mxu1 %v3554_v38 }
 0x36e   :  { %3556 = vmatprep.subr.bf16.mxu1 %v3992_v17 }
 0x371   :  { %3558 = vmatpush3.bf16.msra.mxu1 %v3557_v60 }
 0x372   :  { %3559 = vmatprep.subr.bf16.mxu1 %v3992_v17 }
 0x375   :  { %3561 = vmatpush3.bf16.msra.mxu1 %v3560_v2 }
 0x376   :  { %3562 = vmatprep.subr.bf16.mxu1 %v3992_v17 }
 0x437   :  { %v3473_v47 = vpop.f32.mrb[32].mxu1 }
 0x438   :  { %v3474_v10 = vpop.f32.mrb[33].mxu1 }
 0x439   :  { %v3475_v21 = vadd.f32 %v3474_v10, %v3473_v47  ;;  %v3476_v19 = vpop.f32.mrb[34].mxu1 }
 0x43a   :  { %v3477_v11 = vpop.f32.mrb[35].mxu1 }
 0x43b   :  { %v3010_v63 = vadd.f32 %v3475_v21, %v3435_v46 }
 0x43d   :  { %v3015_v8 = vmax.f32 %v3010_v63, 0.0 }
 0x43f   :  { %v3016_v52 = vmul.f32 %v3015_v8, %v3015_v8 }
 0x441   :  { %3522 = vmatmul.mubr.msk.f32.vlgmr.msra.gmra.mrb[36].mxu1 %vm3027_vm11, %v3016_v52 }
 0x442   :  { %3544 = vmatprep.mubr.msk.f32.mxu1 %vm3993_vm10, %v6825_v24  ;;  %3564 = vmatpush3.bf16.msra.mxu1 %v3563_v9 }
 0x443   :  { %3565 = vmatprep.subr.bf16.mxu1 %v3992_v17 }
 0x446   :  { %3567 = vmatpush3.bf16.msra.mxu1 %v3566_v30 }
 0x447   :  { %3568 = vmatprep.subr.bf16.mxu1 %v3992_v17 }
 0x44a   :  { %3570 = vmatpush3.bf16.msra.mxu1 %v3569_v5 }
 0x44b   :  { %3571 = vmatprep.subr.bf16.mxu1 %v3992_v17 }
 0x44e   :  { %3573 = vmatpush3.bf16.msra.mxu1 %v3572_v57 }
 0x44f   :  { %3574 = vmatprep.subr.bf16.mxu1 %v3992_v17 }
 0x452   :  { %3576 = vmatpush3.bf16.msra.mxu1 %v3575_v16 }
 0x514   :  { %v3097_v0 = vpop.f32.mrb[36].mxu1 }
 0x515   :  { %3780 = vrsqrt.f32 %v3097_v0  ;;  %v3523_v44 = vpop.f32.mrb[37].mxu1  ;;  %vm3103_vm12 = vcmp.eq.f32.partialorder %v3097_v0, inf  ;;  %v3106_v59 = vand.u32 2147483648, %v3097_v0  ;;  %vm3105_vm13 = vcmp.eq.f32.partialorder %v3097_v0, 0.0 }
 0x51f   :  { %v3781_v50 = vpop.eup %3780 }
 0x520   :  { %v3102_v51 = vmul.f32 %v3781_v50, %v3097_v0 }
 0x522   :  { %v3104_v34 = vsel %vm3103_vm12, %v3097_v0, %v3102_v51 }
 0x523   :  { %v3107_v22 = vsel %vm3105_vm13, %v3106_v59, %v3104_v34 }
 0x524   :  { %v3108_v29 = vmax.f32 %v3107_v22, 1e-12 }
 0x526   :  { %3782 = vrcp.f32 %v3108_v29 }
 0x530   :  { %v3783_v15 = vpop.eup %3782 }
 0x531   :  { %v3110_v55 = vmul.f32 %v3783_v15, %v3015_v8 }
 0x533   :  { %3545 = vmatmul.mubr.msk.f32.vlgmr.msra.gmra.mrb[38].mxu1 %vm3027_vm11, %v3110_v55 }
 0x606   :  { %v3197_v17 = vpop.f32.mrb[38].mxu1 }
 0x607   :  { %v3198_v37 = vadd.f32 %v3453_v62, %v3197_v17  ;;  %v3546_v1 = vpop.f32.mrb[39].mxu1 }
 0x609   :  { %3201 = vst [vmem:[#allocation16] sm:$0x3] %v3198_v37 }
 0x60a   :  { %3949 = shalt.err (!%p3946_p5)
}
 0x60b   :  { %s3950_s28 = scalar_lea.hbm %s6256_s12, 32 }
 0x60c   :  { %p3951_p6 = scmp.ne.s32.totalorder %s6256_s12, %s3950_s28  ;;  %p3954_p7 = scmp.lt.u32.totalorder %s3950_s28, %s6256_s12 }
 0x60e   :  { %p3956_p8 = pnand %p3954_p7, %p3951_p6 }
 0x610   :  { %3959 = shalt.err (!%p3956_p8)
}
 0x611   :  { %3211 = dma.vmem_to_hbm [thread:$0]  %s3209_s13, 32, %s6256_s12, [#allocation6]  }
 0x612   :  { %3972 = dma.done.wait [#allocation6], 32  }
 0x613   :  { %3973 = vsyncadd [#allocation6], 4294967264 }
 0x614   :  { %3215 = vsyncpa [#allocation5], 1 }
 0x615   :  { %3216 = vsyncpa [#allocation8], 1 }
 0x616   :  { %3217 = vsyncpa [#allocation11], 1 }
 0x617   :  { %3218 = vsyncpa [#allocation14], 1 }
 0x618   :  { %3219 = vsyncpa [#allocation6], 1 }

</bundles_post_ra>
